<compile_context>
chip_gen: v5e
topology: v5e:2x2
jax: 0.10.0
libtpu: 0.0.40
codegen_flags: <defaults>
</compile_context>

<pallas_src>
import numpy as np
import jax
import jax.numpy as jnp
from jax import lax
from jax.experimental import pallas as pl
from jax.experimental.pallas import tpu as pltpu


def _spec(shape):
    n = len(shape)

    def index_map():
        return (0,) * n

    return pl.BlockSpec(shape, index_map)


# ----------------------------------------------------------------------------
# Fused kernel factory (num_layers / shapes are static Python values).
#
# Ref order: x, [per layer: wih_fused, whh_fused, b_fused],
#            h2s_w, h2s_b, trans_t, stop_row,
#            feats_out, bptr_out, term_out, xg_scratch
#
# Weight layouts (pre-fused on host, gate columns grouped i_f i_b f_f f_b ...):
#   wih_fused: [Din, 8H]   (layer>0: rows 0:H = fwd hidden, H:2H = bwd hidden)
#   whh_fused: [2H, 8H]    block-diagonal per direction
#   b_fused:   [1, 8H]     (b_ih + b_hh per direction)
#   trans_t[j, i] = transitions[i, j]        (source j, target i)
#   stop_row[0, j] = transitions[STOP, j]
# ----------------------------------------------------------------------------
def make_fused_kernel(T, H, K, num_layers, unroll):
    START = K - 2
    H2, H8 = 2 * H, 8 * H
    n_lstm = num_layers * 3

    def kernel(*refs):
        x_ref = refs[0]
        lstm_refs = refs[1:1 + n_lstm]
        h2s_w_ref, h2s_b_ref, trans_t_ref, stop_ref = refs[1 + n_lstm:5 + n_lstm]
        feats_ref, bptr_ref, term_ref = refs[5 + n_lstm:8 + n_lstm]
        xg_sc = refs[8 + n_lstm]

        # -------------------- hoisted constants (no per-iter broadcasts) -----
        lane8 = lax.broadcasted_iota(jnp.int32, (1, H8), 1)
        fwd_mask = (lane8 % H2) < H               # True on fwd-direction gate lanes
        row_iota = lax.broadcasted_iota(jnp.int32, (T, 1), 0)

        # -------------------- bidirectional stacked LSTM ---------------------
        h_f_all = jnp.zeros((T, H), jnp.float32)  # per-direction hidden history
        h_b_all = jnp.zeros((T, H), jnp.float32)  # (kept entirely in vregs)

        for layer in range(num_layers):
            wih_ref, whh_ref, b_ref = lstm_refs[3 * layer:3 * layer + 3]
            wih = wih_ref[...]
            if layer == 0:
                # single fused (T, Din) @ (Din, 8H) projection for BOTH
                # directions and all 4 gates (8H = 128 lanes -> unmasked).
                xg = jnp.dot(x_ref[...], wih, preferred_element_type=jnp.float32)
            else:
                # feed the previous layer's per-direction histories without
                # ever materializing a (T, 2H) concat.
                xg = (jnp.dot(h_f_all, wih[0:H, :],
                              preferred_element_type=jnp.float32)
                      + jnp.dot(h_b_all, wih[H:H2, :],
                                preferred_element_type=jnp.float32))
            xg_sc[...] = xg + b_ref[...]
            whh = whh_ref[...]                    # (2H, 8H), hoisted

            def step(t, carry):
                h_fb, c_fb, hf, hb = carry        # (1,2H) vreg carries
                idx_b = T - 1 - t                 # in-kernel time reversal (bwd)
                row_f = xg_sc[pl.ds(t, 1), :]     # (1, 8H) full-lane load
                row_b = xg_sc[pl.ds(idx_b, 1), :]
                gate_x = jnp.where(fwd_mask, row_f, row_b)
                # one block-diagonal recurrence dot covers both directions
                g = gate_x + jnp.dot(h_fb, whh, preferred_element_type=jnp.float32)
                s = jax.nn.sigmoid(g)             # one wide sigmoid (8H lanes)
                i_fb = s[:, 0:H2]
                f_fb = s[:, H2:2 * H2]
                o_fb = s[:, 3 * H2:4 * H2]
                g_fb = jnp.tanh(g[:, 2 * H2:3 * H2])
                c_new = f_fb * c_fb + i_fb * g_fb
                h_new = o_fb * jnp.tanh(c_new)
                # accumulate hidden histories in carried values (no VMEM stores,
                # off the serial dependency chain)
                hf = jnp.where(row_iota == t, h_new[:, 0:H], hf)
                hb = jnp.where(row_iota == idx_b, h_new[:, H:H2], hb)
                return (h_new, c_new, hf, hb)

            z2 = jnp.zeros((1, H2), jnp.float32)
            zT = jnp.zeros((T, H), jnp.float32)
            _, _, h_f_all, h_b_all = lax.fori_loop(
                0, T, step, (z2, z2, zT, zT), unroll=unroll)

        # ------------------------- h2s projection ----------------------------
        h2s_w = h2s_w_ref[...]                    # (2H, K)
        feats_val = (jnp.dot(h_f_all, h2s_w[0:H, :],
                             preferred_element_type=jnp.float32)
                     + jnp.dot(h_b_all, h2s_w[H:H2, :],
                               preferred_element_type=jnp.float32)
                     + h2s_b_ref[...])
        feats_ref[...] = feats_val                # single (T, K) store

        # ------------------ CRF Viterbi forward recursion --------------------
        trans_t = trans_t_ref[...]                # [K, K]  [from j, to i]
        lane_k = lax.broadcasted_iota(jnp.int32, (1, K), 1)
        src_iota = lax.broadcasted_iota(jnp.int32, (K, K), 0)
        eye_f = (src_iota == lax.broadcasted_iota(jnp.int32, (K, K), 1)
                 ).astype(jnp.float32)
        ones_kk = jnp.ones((K, K), jnp.float32)
        fv_row0 = jnp.where(lane_k == START, 0.0, -10000.0).astype(jnp.float32)
        bptr0 = jnp.zeros((T, K), jnp.int32)

        def vstep(t, carry):
            fv_row, bptr_acc = carry
            # lane-broadcast of fv over the source axis done on the (idle) MXU:
            # fv_bcast[j, i] = fv[j]  (replaces the per-step eye-max transpose)
            fv_bcast = jnp.dot(eye_f * fv_row, ones_kk,
                               preferred_element_type=jnp.float32)
            ntv = fv_bcast + trans_t              # ntv[j,i] = fv[j] + trans[i,j]
            m_row = jnp.max(ntv, axis=0, keepdims=True)              # (1, K)
            bp_row = jnp.min(jnp.where(ntv == m_row, src_iota, K),
                             axis=0, keepdims=True)                  # (1, K)
            bptr_acc = jnp.where(row_iota == t, bp_row, bptr_acc)    # in-vreg
            fv_row = m_row + feats_ref[pl.ds(t, 1), :]
            return (fv_row, bptr_acc)

        fv_last, bptr_acc = lax.fori_loop(0, T, vstep, (fv_row0, bptr0),
                                          unroll=unroll)
        bptr_ref[...] = bptr_acc                  # single batched store
        term_ref[...] = fv_last + stop_ref[...]

    return kernel


# ----------------------------------------------------------------------------
# Host-side weight fusion (PyTorch layout -> fused kernel layout)
# ----------------------------------------------------------------------------
def _fuse_direction_pair(w_ih_f, w_hh_f, b_f, w_ih_b, w_hh_b, b_b, H):
    # Inputs (PyTorch): w_ih_*: [4H, Din] (gate rows i|f|g|o), w_hh_*: [4H, H],
    #                   b_*: [4H] (already b_ih + b_hh).
    # Outputs: wih [Din, 8H], whh [2H, 8H] block-diag, b [1, 8H];
    # gate column order [i_f i_b f_f f_b g_f g_b o_f o_b].
    wih_cols, b_cols = [], []
    whh = np.zeros((2 * H, 8 * H), np.float32)
    for gi in range(4):
        sl = slice(gi * H, (gi + 1) * H)
        wih_cols += [np.asarray(w_ih_f)[sl].T, np.asarray(w_ih_b)[sl].T]
        b_cols += [np.asarray(b_f)[sl], np.asarray(b_b)[sl]]
        whh[0:H, (2 * gi) * H:(2 * gi + 1) * H] = np.asarray(w_hh_f)[sl].T
        whh[H:2 * H, (2 * gi + 1) * H:(2 * gi + 2) * H] = np.asarray(w_hh_b)[sl].T
    wih = np.concatenate(wih_cols, axis=1)
    b = np.concatenate(b_cols)[None, :]
    return jnp.asarray(wih), jnp.asarray(whh), jnp.asarray(b)


def init_params(key, din, hidden, num_layers, tagset_size):
    H = hidden
    params = {"hidden": H, "num_layers": num_layers, "tagset_size": tagset_size}
    keys = iter(jax.random.split(key, 8 * num_layers + 8))

    lstm_fused = []
    for layer in range(num_layers):
        in_size = din if layer == 0 else 2 * H
        scale = 1.0 / np.sqrt(H)
        raw = []
        for _d in range(2):  # forward, backward
            w_ih = jax.random.uniform(next(keys), (4 * H, in_size),
                                      jnp.float32, -scale, scale)
            w_hh = jax.random.uniform(next(keys), (4 * H, H),
                                      jnp.float32, -scale, scale)
            b_ih = jax.random.uniform(next(keys), (4 * H,),
                                      jnp.float32, -scale, scale)
            b_hh = jax.random.uniform(next(keys), (4 * H,),
                                      jnp.float32, -scale, scale)
            raw.append((w_ih, w_hh, b_ih + b_hh))
        (wf, hf, bf), (wb, hb, bb) = raw
        lstm_fused.append(_fuse_direction_pair(wf, hf, bf, wb, hb, bb, H))
    params["lstm"] = lstm_fused

    scale = 1.0 / np.sqrt(2 * H)
    w = jax.random.uniform(next(keys), (tagset_size, 2 * H),
                           jnp.float32, -scale, scale)
    b = jax.random.uniform(next(keys), (tagset_size,),
                           jnp.float32, -scale, scale)
    params["h2s"] = (jnp.asarray(w.T), b[None, :])      # [2H, K], [1, K]

    trans = jax.random.normal(next(keys), (tagset_size, tagset_size),
                              jnp.float32)
    start_tag, stop_tag = tagset_size - 2, tagset_size - 1
    trans = trans.at[start_tag, :].set(-10000.0)
    trans = trans.at[:, stop_tag].set(-10000.0)
    params["transitions"] = trans
    return params


# ----------------------------------------------------------------------------
# Forward pass (Model.forward for a single document) — one pallas_call
# ----------------------------------------------------------------------------
def model_forward(params, encoded_sentences):
    # TODO(synk): sentence_encoder + pack_padded_sequence document batching is
    # host-side Python glue around an external module; we start from its
    # encoded sentence outputs for a single document.
    T, _din = encoded_sentences.shape
    H = params["hidden"]
    K = params["tagset_size"]
    L = params["num_layers"]

    inputs = [encoded_sentences]
    for (wih, whh, b) in params["lstm"]:
        inputs += [wih, whh, b]
    h2s_w, h2s_b = params["h2s"]
    trans = params["transitions"]
    inputs += [h2s_w, h2s_b, trans.T, trans[K - 1][None, :]]

    in_specs = [_spec(tuple(a.shape)) for a in inputs]
    out_shape = (jax.ShapeDtypeStruct((T, K), jnp.float32),   # feats
                 jax.ShapeDtypeStruct((T, K), jnp.int32),     # backpointers
                 jax.ShapeDtypeStruct((1, K), jnp.float32))   # terminal var
    out_specs = (_spec((T, K)), _spec((T, K)), _spec((1, K)))

    unroll = max(1, min(T, 8))                    # bounded unroll factor
    kernel = make_fused_kernel(T, H, K, L, unroll)
    feats, bptrs, term = pl.pallas_call(
        kernel,
        out_shape=out_shape,
        in_specs=in_specs,
        out_specs=out_specs,
        scratch_shapes=[pltpu.VMEM((T, 8 * H), jnp.float32)],  # fused gate proj
    )(*inputs)
    return feats, bptrs, term


def viterbi_backtrack(bptrs, term, tagset_size):
    # Mirrors the PyTorch .tolist() backtracking loop (host side).
    bptrs = np.asarray(bptrs)
    term = np.asarray(term)
    best = int(np.argmax(term[0]))
    path = [best]
    for row in bptrs[::-1]:
        best = int(row[best])
        path.append(best)
    start = path.pop()
    assert start == tagset_size - 2, "backtrack did not terminate at START_TAG"
    path.reverse()
    return path


if __name__ == "__main__":
    # Small shapes consistent with the module:
    enc_hidden, enc_num_layers = 8, 2
    hidden, num_layers = 16, 2
    tag_to_ix = {"O": 0, "B": 1, "I": 2, "E": 3}
    tagset_size = len(tag_to_ix) + 2                      # +START, +STOP = 6
    T = 8                                                 # sentences in the doc
    din = enc_hidden * enc_num_layers * 2                 # 32

    key = jax.random.PRNGKey(0)
    k_param, k_x = jax.random.split(key)
    params = init_params(k_param, din, hidden, num_layers, tagset_size)
    encoded_sentences = jax.random.normal(k_x, (T, din), jnp.float32)

    feats, bptrs, term = model_forward(params, encoded_sentences)
    jax.block_until_ready((feats, bptrs, term))

    tag_seq = viterbi_backtrack(bptrs, term, tagset_size)
    assert len(tag_seq) == T
    assert feats.shape == (T, tagset_size)
    assert bptrs.shape == (T, tagset_size)
    print("KERNEL_OK")
</pallas_src>

<mosaic_0001>
module attributes {stable_mosaic.version = 11 : i64} {
  func.func @kernel(%arg0: memref<8x32xf32, #tpu.memory_space<vmem>>, %arg1: memref<32x128xf32, #tpu.memory_space<vmem>>, %arg2: memref<32x128xf32, #tpu.memory_space<vmem>>, %arg3: memref<1x128xf32, #tpu.memory_space<vmem>>, %arg4: memref<32x128xf32, #tpu.memory_space<vmem>>, %arg5: memref<32x128xf32, #tpu.memory_space<vmem>>, %arg6: memref<1x128xf32, #tpu.memory_space<vmem>>, %arg7: memref<32x6xf32, #tpu.memory_space<vmem>>, %arg8: memref<1x6xf32, #tpu.memory_space<vmem>>, %arg9: memref<6x6xf32, #tpu.memory_space<vmem>>, %arg10: memref<1x6xf32, #tpu.memory_space<vmem>>, %arg11: memref<8x6xf32, #tpu.memory_space<vmem>>, %arg12: memref<8x6xi32, #tpu.memory_space<vmem>>, %arg13: memref<1x6xf32, #tpu.memory_space<vmem>>, %arg14: memref<8x128xf32, #tpu.memory_space<vmem>>) attributes {dimension_semantics = [], scalar_prefetch = 0 : i64, scratch_operands = 1 : i64, tpu.core_type = #tpu.core_type<tc>} {
    %0 = tpu.iota {dimensions = array<i32: 1>} : vector<1x128xi32>
    %c32_i32 = arith.constant 32 : i32
    %c0_i32 = arith.constant 0 : i32
    %1 = arith.cmpi eq, %c32_i32, %c0_i32 : i32
    %c1_i32 = arith.constant 1 : i32
    %2 = arith.select %1, %c1_i32, %c32_i32 : i32
    %3 = vector.broadcast %2 : i32 to vector<1x128xi32>
    %4 = arith.remsi %0, %3 : vector<1x128xi32>
    %c0_i32_0 = arith.constant 0 : i32
    %5 = vector.broadcast %c0_i32_0 : i32 to vector<1x128xi32>
    %6 = arith.cmpi ne, %4, %5 : vector<1x128xi32>
    %c0_i32_1 = arith.constant 0 : i32
    %7 = vector.broadcast %c0_i32_1 : i32 to vector<1x128xi32>
    %8 = arith.cmpi slt, %4, %7 : vector<1x128xi32>
    %c0_i32_2 = arith.constant 0 : i32
    %9 = arith.cmpi slt, %2, %c0_i32_2 : i32
    %10 = vector.broadcast %9 : i1 to vector<1x128xi1>
    %11 = vector.broadcast %10 : vector<1x128xi1> to vector<1x128xi1>
    %12 = arith.xori %8, %11 : vector<1x128xi1>
    %13 = arith.andi %12, %6 : vector<1x128xi1>
    %14 = vector.broadcast %2 : i32 to vector<1x128xi32>
    %15 = arith.addi %4, %14 : vector<1x128xi32>
    %16 = arith.select %13, %15, %4 : vector<1x128xi1>, vector<1x128xi32>
    %c16_i32 = arith.constant 16 : i32
    %17 = vector.broadcast %c16_i32 : i32 to vector<1x128xi32>
    %18 = arith.cmpi slt, %16, %17 : vector<1x128xi32>
    %19 = tpu.iota {dimensions = array<i32: 0>} : vector<8x1xi32>
    %c0 = arith.constant 0 : index
    %c0_3 = arith.constant 0 : index
    %20 = vector.load %arg1[%c0, %c0_3] : memref<32x128xf32, #tpu.memory_space<vmem>>, vector<32x128xf32>
    %c0_4 = arith.constant 0 : index
    %c0_5 = arith.constant 0 : index
    %21 = vector.load %arg0[%c0_4, %c0_5] : memref<8x32xf32, #tpu.memory_space<vmem>>, vector<8x32xf32>
    %cst = arith.constant dense<0.000000e+00> : vector<8x128xf32>
    %22 = tpu.matmul %21, %20, %cst {dimension_numbers = #tpu.dot_dimension_numbers<[1], [0], [0], [1], [0, 0, 1, 1], [], []>} : vector<8x32xf32>, vector<32x128xf32>, vector<8x128xf32> -> vector<8x128xf32>
    %c0_6 = arith.constant 0 : index
    %c0_7 = arith.constant 0 : index
    %23 = vector.load %arg3[%c0_6, %c0_7] : memref<1x128xf32, #tpu.memory_space<vmem>>, vector<1x128xf32>
    %24 = vector.broadcast %23 : vector<1x128xf32> to vector<8x128xf32>
    %25 = arith.addf %22, %24 : vector<8x128xf32>
    %c0_8 = arith.constant 0 : index
    %c0_9 = arith.constant 0 : index
    %26 = vector.load %arg14[%c0_8, %c0_9] : memref<8x128xf32, #tpu.memory_space<vmem>>, vector<8x128xf32>
    tpu.vector_store %arg14[%c0_8, %c0_9], %25 {strides = array<i32>} : memref<8x128xf32, #tpu.memory_space<vmem>>, vector<8x128xf32>,
    %c0_10 = arith.constant 0 : index
    %c0_11 = arith.constant 0 : index
    %27 = vector.load %arg2[%c0_10, %c0_11] : memref<32x128xf32, #tpu.memory_space<vmem>>, vector<32x128xf32>
    %cst_12 = arith.constant 0.000000e+00 : f32
    %28 = vector.broadcast %cst_12 : f32 to vector<1x32xf32>
    %cst_13 = arith.constant 0.000000e+00 : f32
    %29 = vector.broadcast %cst_13 : f32 to vector<8x16xf32>
    %c0_i32_14 = arith.constant 0 : i32
    %c7_i32 = arith.constant 7 : i32
    %30 = arith.subi %c7_i32, %c0_i32_14 : i32
    %31 = arith.index_cast %c0_i32_14 : i32 to index
    %c0_15 = arith.constant 0 : index
    %32 = vector.load %arg14[%31, %c0_15] : memref<8x128xf32, #tpu.memory_space<vmem>>, vector<1x128xf32>
    %33 = arith.index_cast %30 : i32 to index
    %c0_16 = arith.constant 0 : index
    %34 = vector.load %arg14[%33, %c0_16] : memref<8x128xf32, #tpu.memory_space<vmem>>, vector<1x128xf32>
    %35 = arith.select %18, %32, %34 : vector<1x128xi1>, vector<1x128xf32>
    %cst_17 = arith.constant dense<0.000000e+00> : vector<1x128xf32>
    %36 = tpu.matmul %28, %27, %cst_17 {dimension_numbers = #tpu.dot_dimension_numbers<[1], [0], [0], [1], [0, 0, 1, 1], [], []>} : vector<1x32xf32>, vector<32x128xf32>, vector<1x128xf32> -> vector<1x128xf32>
    %37 = arith.addf %35, %36 : vector<1x128xf32>
    %38 = arith.negf %37 : vector<1x128xf32>
    %39 = math.exp %38 : vector<1x128xf32>
    %cst_18 = arith.constant 1.000000e+00 : f32
    %40 = vector.broadcast %cst_18 : f32 to vector<1x128xf32>
    %41 = arith.addf %40, %39 : vector<1x128xf32>
    %42 = arith.divf %40, %41 : vector<1x128xf32>
    %43 = vector.extract_strided_slice %42 {offsets = [0, 0], sizes = [1, 32], strides = [1, 1]} : vector<1x128xf32> to vector<1x32xf32>
    %44 = vector.extract_strided_slice %42 {offsets = [0, 32], sizes = [1, 32], strides = [1, 1]} : vector<1x128xf32> to vector<1x32xf32>
    %45 = vector.extract_strided_slice %42 {offsets = [0, 96], sizes = [1, 32], strides = [1, 1]} : vector<1x128xf32> to vector<1x32xf32>
    %46 = vector.extract_strided_slice %37 {offsets = [0, 64], sizes = [1, 32], strides = [1, 1]} : vector<1x128xf32> to vector<1x32xf32>
    %47 = math.tanh %46 : vector<1x32xf32>
    %48 = arith.mulf %44, %28 : vector<1x32xf32>
    %49 = arith.mulf %43, %47 : vector<1x32xf32>
    %50 = arith.addf %48, %49 : vector<1x32xf32>
    %51 = math.tanh %50 : vector<1x32xf32>
    %52 = arith.mulf %45, %51 : vector<1x32xf32>
    %53 = vector.broadcast %c0_i32_14 : i32 to vector<8x1xi32>
    %54 = arith.cmpi eq, %19, %53 : vector<8x1xi32>
    %55 = vector.extract_strided_slice %52 {offsets = [0, 0], sizes = [1, 16], strides = [1, 1]} : vector<1x32xf32> to vector<1x16xf32>
    %56 = vector.shape_cast %54 : vector<8x1xi1> to vector<8x1xi1>
    %57 = vector.broadcast %56 : vector<8x1xi1> to vector<8x16xi1>
    %58 = vector.shape_cast %55 : vector<1x16xf32> to vector<1x16xf32>
    %59 = vector.broadcast %58 : vector<1x16xf32> to vector<8x16xf32>
    %60 = arith.select %57, %59, %29 : vector<8x16xi1>, vector<8x16xf32>
    %61 = vector.broadcast %30 : i32 to vector<8x1xi32>
    %62 = arith.cmpi eq, %19, %61 : vector<8x1xi32>
    %63 = vector.extract_strided_slice %52 {offsets = [0, 16], sizes = [1, 16], strides = [1, 1]} : vector<1x32xf32> to vector<1x16xf32>
    %64 = vector.shape_cast %62 : vector<8x1xi1> to vector<8x1xi1>
    %65 = vector.broadcast %64 : vector<8x1xi1> to vector<8x16xi1>
    %66 = vector.shape_cast %63 : vector<1x16xf32> to vector<1x16xf32>
    %67 = vector.broadcast %66 : vector<1x16xf32> to vector<8x16xf32>
    %68 = arith.select %65, %67, %29 : vector<8x16xi1>, vector<8x16xf32>
    %c1_i32_19 = arith.constant 1 : i32
    %c7_i32_20 = arith.constant 7 : i32
    %69 = arith.subi %c7_i32_20, %c1_i32_19 : i32
    %70 = arith.index_cast %c1_i32_19 : i32 to index
    %c0_21 = arith.constant 0 : index
    %71 = vector.load %arg14[%70, %c0_21] : memref<8x128xf32, #tpu.memory_space<vmem>>, vector<1x128xf32>
    %72 = arith.index_cast %69 : i32 to index
    %c0_22 = arith.constant 0 : index
    %73 = vector.load %arg14[%72, %c0_22] : memref<8x128xf32, #tpu.memory_space<vmem>>, vector<1x128xf32>
    %74 = arith.select %18, %71, %73 : vector<1x128xi1>, vector<1x128xf32>
    %cst_23 = arith.constant dense<0.000000e+00> : vector<1x128xf32>
    %75 = tpu.matmul %52, %27, %cst_23 {dimension_numbers = #tpu.dot_dimension_numbers<[1], [0], [0], [1], [0, 0, 1, 1], [], []>} : vector<1x32xf32>, vector<32x128xf32>, vector<1x128xf32> -> vector<1x128xf32>
    %76 = arith.addf %74, %75 : vector<1x128xf32>
    %77 = arith.negf %76 : vector<1x128xf32>
    %78 = math.exp %77 : vector<1x128xf32>
    %cst_24 = arith.constant 1.000000e+00 : f32
    %79 = vector.broadcast %cst_24 : f32 to vector<1x128xf32>
    %80 = arith.addf %79, %78 : vector<1x128xf32>
    %81 = arith.divf %79, %80 : vector<1x128xf32>
    %82 = vector.extract_strided_slice %81 {offsets = [0, 0], sizes = [1, 32], strides = [1, 1]} : vector<1x128xf32> to vector<1x32xf32>
    %83 = vector.extract_strided_slice %81 {offsets = [0, 32], sizes = [1, 32], strides = [1, 1]} : vector<1x128xf32> to vector<1x32xf32>
    %84 = vector.extract_strided_slice %81 {offsets = [0, 96], sizes = [1, 32], strides = [1, 1]} : vector<1x128xf32> to vector<1x32xf32>
    %85 = vector.extract_strided_slice %76 {offsets = [0, 64], sizes = [1, 32], strides = [1, 1]} : vector<1x128xf32> to vector<1x32xf32>
    %86 = math.tanh %85 : vector<1x32xf32>
    %87 = arith.mulf %83, %50 : vector<1x32xf32>
    %88 = arith.mulf %82, %86 : vector<1x32xf32>
    %89 = arith.addf %87, %88 : vector<1x32xf32>
    %90 = math.tanh %89 : vector<1x32xf32>
    %91 = arith.mulf %84, %90 : vector<1x32xf32>
    %92 = vector.broadcast %c1_i32_19 : i32 to vector<8x1xi32>
    %93 = arith.cmpi eq, %19, %92 : vector<8x1xi32>
    %94 = vector.extract_strided_slice %91 {offsets = [0, 0], sizes = [1, 16], strides = [1, 1]} : vector<1x32xf32> to vector<1x16xf32>
    %95 = vector.shape_cast %93 : vector<8x1xi1> to vector<8x1xi1>
    %96 = vector.broadcast %95 : vector<8x1xi1> to vector<8x16xi1>
    %97 = vector.shape_cast %94 : vector<1x16xf32> to vector<1x16xf32>
    %98 = vector.broadcast %97 : vector<1x16xf32> to vector<8x16xf32>
    %99 = arith.select %96, %98, %60 : vector<8x16xi1>, vector<8x16xf32>
    %100 = vector.broadcast %69 : i32 to vector<8x1xi32>
    %101 = arith.cmpi eq, %19, %100 : vector<8x1xi32>
    %102 = vector.extract_strided_slice %91 {offsets = [0, 16], sizes = [1, 16], strides = [1, 1]} : vector<1x32xf32> to vector<1x16xf32>
    %103 = vector.shape_cast %101 : vector<8x1xi1> to vector<8x1xi1>
    %104 = vector.broadcast %103 : vector<8x1xi1> to vector<8x16xi1>
    %105 = vector.shape_cast %102 : vector<1x16xf32> to vector<1x16xf32>
    %106 = vector.broadcast %105 : vector<1x16xf32> to vector<8x16xf32>
    %107 = arith.select %104, %106, %68 : vector<8x16xi1>, vector<8x16xf32>
    %c2_i32 = arith.constant 2 : i32
    %c7_i32_25 = arith.constant 7 : i32
    %108 = arith.subi %c7_i32_25, %c2_i32 : i32
    %109 = arith.index_cast %c2_i32 : i32 to index
    %c0_26 = arith.constant 0 : index
    %110 = vector.load %arg14[%109, %c0_26] : memref<8x128xf32, #tpu.memory_space<vmem>>, vector<1x128xf32>
    %111 = arith.index_cast %108 : i32 to index
    %c0_27 = arith.constant 0 : index
    %112 = vector.load %arg14[%111, %c0_27] : memref<8x128xf32, #tpu.memory_space<vmem>>, vector<1x128xf32>
    %113 = arith.select %18, %110, %112 : vector<1x128xi1>, vector<1x128xf32>
    %cst_28 = arith.constant dense<0.000000e+00> : vector<1x128xf32>
    %114 = tpu.matmul %91, %27, %cst_28 {dimension_numbers = #tpu.dot_dimension_numbers<[1], [0], [0], [1], [0, 0, 1, 1], [], []>} : vector<1x32xf32>, vector<32x128xf32>, vector<1x128xf32> -> vector<1x128xf32>
    %115 = arith.addf %113, %114 : vector<1x128xf32>
    %116 = arith.negf %115 : vector<1x128xf32>
    %117 = math.exp %116 : vector<1x128xf32>
    %cst_29 = arith.constant 1.000000e+00 : f32
    %118 = vector.broadcast %cst_29 : f32 to vector<1x128xf32>
    %119 = arith.addf %118, %117 : vector<1x128xf32>
    %120 = arith.divf %118, %119 : vector<1x128xf32>
    %121 = vector.extract_strided_slice %120 {offsets = [0, 0], sizes = [1, 32], strides = [1, 1]} : vector<1x128xf32> to vector<1x32xf32>
    %122 = vector.extract_strided_slice %120 {offsets = [0, 32], sizes = [1, 32], strides = [1, 1]} : vector<1x128xf32> to vector<1x32xf32>
    %123 = vector.extract_strided_slice %120 {offsets = [0, 96], sizes = [1, 32], strides = [1, 1]} : vector<1x128xf32> to vector<1x32xf32>
    %124 = vector.extract_strided_slice %115 {offsets = [0, 64], sizes = [1, 32], strides = [1, 1]} : vector<1x128xf32> to vector<1x32xf32>
    %125 = math.tanh %124 : vector<1x32xf32>
    %126 = arith.mulf %122, %89 : vector<1x32xf32>
    %127 = arith.mulf %121, %125 : vector<1x32xf32>
    %128 = arith.addf %126, %127 : vector<1x32xf32>
    %129 = math.tanh %128 : vector<1x32xf32>
    %130 = arith.mulf %123, %129 : vector<1x32xf32>
    %131 = vector.broadcast %c2_i32 : i32 to vector<8x1xi32>
    %132 = arith.cmpi eq, %19, %131 : vector<8x1xi32>
    %133 = vector.extract_strided_slice %130 {offsets = [0, 0], sizes = [1, 16], strides = [1, 1]} : vector<1x32xf32> to vector<1x16xf32>
    %134 = vector.shape_cast %132 : vector<8x1xi1> to vector<8x1xi1>
    %135 = vector.broadcast %134 : vector<8x1xi1> to vector<8x16xi1>
    %136 = vector.shape_cast %133 : vector<1x16xf32> to vector<1x16xf32>
    %137 = vector.broadcast %136 : vector<1x16xf32> to vector<8x16xf32>
    %138 = arith.select %135, %137, %99 : vector<8x16xi1>, vector<8x16xf32>
    %139 = vector.broadcast %108 : i32 to vector<8x1xi32>
    %140 = arith.cmpi eq, %19, %139 : vector<8x1xi32>
    %141 = vector.extract_strided_slice %130 {offsets = [0, 16], sizes = [1, 16], strides = [1, 1]} : vector<1x32xf32> to vector<1x16xf32>
    %142 = vector.shape_cast %140 : vector<8x1xi1> to vector<8x1xi1>
    %143 = vector.broadcast %142 : vector<8x1xi1> to vector<8x16xi1>
    %144 = vector.shape_cast %141 : vector<1x16xf32> to vector<1x16xf32>
    %145 = vector.broadcast %144 : vector<1x16xf32> to vector<8x16xf32>
    %146 = arith.select %143, %145, %107 : vector<8x16xi1>, vector<8x16xf32>
    %c3_i32 = arith.constant 3 : i32
    %c7_i32_30 = arith.constant 7 : i32
    %147 = arith.subi %c7_i32_30, %c3_i32 : i32
    %148 = arith.index_cast %c3_i32 : i32 to index
    %c0_31 = arith.constant 0 : index
    %149 = vector.load %arg14[%148, %c0_31] : memref<8x128xf32, #tpu.memory_space<vmem>>, vector<1x128xf32>
    %150 = arith.index_cast %147 : i32 to index
    %c0_32 = arith.constant 0 : index
    %151 = vector.load %arg14[%150, %c0_32] : memref<8x128xf32, #tpu.memory_space<vmem>>, vector<1x128xf32>
    %152 = arith.select %18, %149, %151 : vector<1x128xi1>, vector<1x128xf32>
    %cst_33 = arith.constant dense<0.000000e+00> : vector<1x128xf32>
    %153 = tpu.matmul %130, %27, %cst_33 {dimension_numbers = #tpu.dot_dimension_numbers<[1], [0], [0], [1], [0, 0, 1, 1], [], []>} : vector<1x32xf32>, vector<32x128xf32>, vector<1x128xf32> -> vector<1x128xf32>
    %154 = arith.addf %152, %153 : vector<1x128xf32>
    %155 = arith.negf %154 : vector<1x128xf32>
    %156 = math.exp %155 : vector<1x128xf32>
    %cst_34 = arith.constant 1.000000e+00 : f32
    %157 = vector.broadcast %cst_34 : f32 to vector<1x128xf32>
    %158 = arith.addf %157, %156 : vector<1x128xf32>
    %159 = arith.divf %157, %158 : vector<1x128xf32>
    %160 = vector.extract_strided_slice %159 {offsets = [0, 0], sizes = [1, 32], strides = [1, 1]} : vector<1x128xf32> to vector<1x32xf32>
    %161 = vector.extract_strided_slice %159 {offsets = [0, 32], sizes = [1, 32], strides = [1, 1]} : vector<1x128xf32> to vector<1x32xf32>
    %162 = vector.extract_strided_slice %159 {offsets = [0, 96], sizes = [1, 32], strides = [1, 1]} : vector<1x128xf32> to vector<1x32xf32>
    %163 = vector.extract_strided_slice %154 {offsets = [0, 64], sizes = [1, 32], strides = [1, 1]} : vector<1x128xf32> to vector<1x32xf32>
    %164 = math.tanh %163 : vector<1x32xf32>
    %165 = arith.mulf %161, %128 : vector<1x32xf32>
    %166 = arith.mulf %160, %164 : vector<1x32xf32>
    %167 = arith.addf %165, %166 : vector<1x32xf32>
    %168 = math.tanh %167 : vector<1x32xf32>
    %169 = arith.mulf %162, %168 : vector<1x32xf32>
    %170 = vector.broadcast %c3_i32 : i32 to vector<8x1xi32>
    %171 = arith.cmpi eq, %19, %170 : vector<8x1xi32>
    %172 = vector.extract_strided_slice %169 {offsets = [0, 0], sizes = [1, 16], strides = [1, 1]} : vector<1x32xf32> to vector<1x16xf32>
    %173 = vector.shape_cast %171 : vector<8x1xi1> to vector<8x1xi1>
    %174 = vector.broadcast %173 : vector<8x1xi1> to vector<8x16xi1>
    %175 = vector.shape_cast %172 : vector<1x16xf32> to vector<1x16xf32>
    %176 = vector.broadcast %175 : vector<1x16xf32> to vector<8x16xf32>
    %177 = arith.select %174, %176, %138 : vector<8x16xi1>, vector<8x16xf32>
    %178 = vector.broadcast %147 : i32 to vector<8x1xi32>
    %179 = arith.cmpi eq, %19, %178 : vector<8x1xi32>
    %180 = vector.extract_strided_slice %169 {offsets = [0, 16], sizes = [1, 16], strides = [1, 1]} : vector<1x32xf32> to vector<1x16xf32>
    %181 = vector.shape_cast %179 : vector<8x1xi1> to vector<8x1xi1>
    %182 = vector.broadcast %181 : vector<8x1xi1> to vector<8x16xi1>
    %183 = vector.shape_cast %180 : vector<1x16xf32> to vector<1x16xf32>
    %184 = vector.broadcast %183 : vector<1x16xf32> to vector<8x16xf32>
    %185 = arith.select %182, %184, %146 : vector<8x16xi1>, vector<8x16xf32>
    %c4_i32 = arith.constant 4 : i32
    %c7_i32_35 = arith.constant 7 : i32
    %186 = arith.subi %c7_i32_35, %c4_i32 : i32
    %187 = arith.index_cast %c4_i32 : i32 to index
    %c0_36 = arith.constant 0 : index
    %188 = vector.load %arg14[%187, %c0_36] : memref<8x128xf32, #tpu.memory_space<vmem>>, vector<1x128xf32>
    %189 = arith.index_cast %186 : i32 to index
    %c0_37 = arith.constant 0 : index
    %190 = vector.load %arg14[%189, %c0_37] : memref<8x128xf32, #tpu.memory_space<vmem>>, vector<1x128xf32>
    %191 = arith.select %18, %188, %190 : vector<1x128xi1>, vector<1x128xf32>
    %cst_38 = arith.constant dense<0.000000e+00> : vector<1x128xf32>
    %192 = tpu.matmul %169, %27, %cst_38 {dimension_numbers = #tpu.dot_dimension_numbers<[1], [0], [0], [1], [0, 0, 1, 1], [], []>} : vector<1x32xf32>, vector<32x128xf32>, vector<1x128xf32> -> vector<1x128xf32>
    %193 = arith.addf %191, %192 : vector<1x128xf32>
    %194 = arith.negf %193 : vector<1x128xf32>
    %195 = math.exp %194 : vector<1x128xf32>
    %cst_39 = arith.constant 1.000000e+00 : f32
    %196 = vector.broadcast %cst_39 : f32 to vector<1x128xf32>
    %197 = arith.addf %196, %195 : vector<1x128xf32>
    %198 = arith.divf %196, %197 : vector<1x128xf32>
    %199 = vector.extract_strided_slice %198 {offsets = [0, 0], sizes = [1, 32], strides = [1, 1]} : vector<1x128xf32> to vector<1x32xf32>
    %200 = vector.extract_strided_slice %198 {offsets = [0, 32], sizes = [1, 32], strides = [1, 1]} : vector<1x128xf32> to vector<1x32xf32>
    %201 = vector.extract_strided_slice %198 {offsets = [0, 96], sizes = [1, 32], strides = [1, 1]} : vector<1x128xf32> to vector<1x32xf32>
    %202 = vector.extract_strided_slice %193 {offsets = [0, 64], sizes = [1, 32], strides = [1, 1]} : vector<1x128xf32> to vector<1x32xf32>
    %203 = math.tanh %202 : vector<1x32xf32>
    %204 = arith.mulf %200, %167 : vector<1x32xf32>
    %205 = arith.mulf %199, %203 : vector<1x32xf32>
    %206 = arith.addf %204, %205 : vector<1x32xf32>
    %207 = math.tanh %206 : vector<1x32xf32>
    %208 = arith.mulf %201, %207 : vector<1x32xf32>
    %209 = vector.broadcast %c4_i32 : i32 to vector<8x1xi32>
    %210 = arith.cmpi eq, %19, %209 : vector<8x1xi32>
    %211 = vector.extract_strided_slice %208 {offsets = [0, 0], sizes = [1, 16], strides = [1, 1]} : vector<1x32xf32> to vector<1x16xf32>
    %212 = vector.shape_cast %210 : vector<8x1xi1> to vector<8x1xi1>
    %213 = vector.broadcast %212 : vector<8x1xi1> to vector<8x16xi1>
    %214 = vector.shape_cast %211 : vector<1x16xf32> to vector<1x16xf32>
    %215 = vector.broadcast %214 : vector<1x16xf32> to vector<8x16xf32>
    %216 = arith.select %213, %215, %177 : vector<8x16xi1>, vector<8x16xf32>
    %217 = vector.broadcast %186 : i32 to vector<8x1xi32>
    %218 = arith.cmpi eq, %19, %217 : vector<8x1xi32>
    %219 = vector.extract_strided_slice %208 {offsets = [0, 16], sizes = [1, 16], strides = [1, 1]} : vector<1x32xf32> to vector<1x16xf32>
    %220 = vector.shape_cast %218 : vector<8x1xi1> to vector<8x1xi1>
    %221 = vector.broadcast %220 : vector<8x1xi1> to vector<8x16xi1>
    %222 = vector.shape_cast %219 : vector<1x16xf32> to vector<1x16xf32>
    %223 = vector.broadcast %222 : vector<1x16xf32> to vector<8x16xf32>
    %224 = arith.select %221, %223, %185 : vector<8x16xi1>, vector<8x16xf32>
    %c5_i32 = arith.constant 5 : i32
    %c7_i32_40 = arith.constant 7 : i32
    %225 = arith.subi %c7_i32_40, %c5_i32 : i32
    %226 = arith.index_cast %c5_i32 : i32 to index
    %c0_41 = arith.constant 0 : index
    %227 = vector.load %arg14[%226, %c0_41] : memref<8x128xf32, #tpu.memory_space<vmem>>, vector<1x128xf32>
    %228 = arith.index_cast %225 : i32 to index
    %c0_42 = arith.constant 0 : index
    %229 = vector.load %arg14[%228, %c0_42] : memref<8x128xf32, #tpu.memory_space<vmem>>, vector<1x128xf32>
    %230 = arith.select %18, %227, %229 : vector<1x128xi1>, vector<1x128xf32>
    %cst_43 = arith.constant dense<0.000000e+00> : vector<1x128xf32>
    %231 = tpu.matmul %208, %27, %cst_43 {dimension_numbers = #tpu.dot_dimension_numbers<[1], [0], [0], [1], [0, 0, 1, 1], [], []>} : vector<1x32xf32>, vector<32x128xf32>, vector<1x128xf32> -> vector<1x128xf32>
    %232 = arith.addf %230, %231 : vector<1x128xf32>
    %233 = arith.negf %232 : vector<1x128xf32>
    %234 = math.exp %233 : vector<1x128xf32>
    %cst_44 = arith.constant 1.000000e+00 : f32
    %235 = vector.broadcast %cst_44 : f32 to vector<1x128xf32>
    %236 = arith.addf %235, %234 : vector<1x128xf32>
    %237 = arith.divf %235, %236 : vector<1x128xf32>
    %238 = vector.extract_strided_slice %237 {offsets = [0, 0], sizes = [1, 32], strides = [1, 1]} : vector<1x128xf32> to vector<1x32xf32>
    %239 = vector.extract_strided_slice %237 {offsets = [0, 32], sizes = [1, 32], strides = [1, 1]} : vector<1x128xf32> to vector<1x32xf32>
    %240 = vector.extract_strided_slice %237 {offsets = [0, 96], sizes = [1, 32], strides = [1, 1]} : vector<1x128xf32> to vector<1x32xf32>
    %241 = vector.extract_strided_slice %232 {offsets = [0, 64], sizes = [1, 32], strides = [1, 1]} : vector<1x128xf32> to vector<1x32xf32>
    %242 = math.tanh %241 : vector<1x32xf32>
    %243 = arith.mulf %239, %206 : vector<1x32xf32>
    %244 = arith.mulf %238, %242 : vector<1x32xf32>
    %245 = arith.addf %243, %244 : vector<1x32xf32>
    %246 = math.tanh %245 : vector<1x32xf32>
    %247 = arith.mulf %240, %246 : vector<1x32xf32>
    %248 = vector.broadcast %c5_i32 : i32 to vector<8x1xi32>
    %249 = arith.cmpi eq, %19, %248 : vector<8x1xi32>
    %250 = vector.extract_strided_slice %247 {offsets = [0, 0], sizes = [1, 16], strides = [1, 1]} : vector<1x32xf32> to vector<1x16xf32>
    %251 = vector.shape_cast %249 : vector<8x1xi1> to vector<8x1xi1>
    %252 = vector.broadcast %251 : vector<8x1xi1> to vector<8x16xi1>
    %253 = vector.shape_cast %250 : vector<1x16xf32> to vector<1x16xf32>
    %254 = vector.broadcast %253 : vector<1x16xf32> to vector<8x16xf32>
    %255 = arith.select %252, %254, %216 : vector<8x16xi1>, vector<8x16xf32>
    %256 = vector.broadcast %225 : i32 to vector<8x1xi32>
    %257 = arith.cmpi eq, %19, %256 : vector<8x1xi32>
    %258 = vector.extract_strided_slice %247 {offsets = [0, 16], sizes = [1, 16], strides = [1, 1]} : vector<1x32xf32> to vector<1x16xf32>
    %259 = vector.shape_cast %257 : vector<8x1xi1> to vector<8x1xi1>
    %260 = vector.broadcast %259 : vector<8x1xi1> to vector<8x16xi1>
    %261 = vector.shape_cast %258 : vector<1x16xf32> to vector<1x16xf32>
    %262 = vector.broadcast %261 : vector<1x16xf32> to vector<8x16xf32>
    %263 = arith.select %260, %262, %224 : vector<8x16xi1>, vector<8x16xf32>
    %c6_i32 = arith.constant 6 : i32
    %c7_i32_45 = arith.constant 7 : i32
    %264 = arith.subi %c7_i32_45, %c6_i32 : i32
    %265 = arith.index_cast %c6_i32 : i32 to index
    %c0_46 = arith.constant 0 : index
    %266 = vector.load %arg14[%265, %c0_46] : memref<8x128xf32, #tpu.memory_space<vmem>>, vector<1x128xf32>
    %267 = arith.index_cast %264 : i32 to index
    %c0_47 = arith.constant 0 : index
    %268 = vector.load %arg14[%267, %c0_47] : memref<8x128xf32, #tpu.memory_space<vmem>>, vector<1x128xf32>
    %269 = arith.select %18, %266, %268 : vector<1x128xi1>, vector<1x128xf32>
    %cst_48 = arith.constant dense<0.000000e+00> : vector<1x128xf32>
    %270 = tpu.matmul %247, %27, %cst_48 {dimension_numbers = #tpu.dot_dimension_numbers<[1], [0], [0], [1], [0, 0, 1, 1], [], []>} : vector<1x32xf32>, vector<32x128xf32>, vector<1x128xf32> -> vector<1x128xf32>
    %271 = arith.addf %269, %270 : vector<1x128xf32>
    %272 = arith.negf %271 : vector<1x128xf32>
    %273 = math.exp %272 : vector<1x128xf32>
    %cst_49 = arith.constant 1.000000e+00 : f32
    %274 = vector.broadcast %cst_49 : f32 to vector<1x128xf32>
    %275 = arith.addf %274, %273 : vector<1x128xf32>
    %276 = arith.divf %274, %275 : vector<1x128xf32>
    %277 = vector.extract_strided_slice %276 {offsets = [0, 0], sizes = [1, 32], strides = [1, 1]} : vector<1x128xf32> to vector<1x32xf32>
    %278 = vector.extract_strided_slice %276 {offsets = [0, 32], sizes = [1, 32], strides = [1, 1]} : vector<1x128xf32> to vector<1x32xf32>
    %279 = vector.extract_strided_slice %276 {offsets = [0, 96], sizes = [1, 32], strides = [1, 1]} : vector<1x128xf32> to vector<1x32xf32>
    %280 = vector.extract_strided_slice %271 {offsets = [0, 64], sizes = [1, 32], strides = [1, 1]} : vector<1x128xf32> to vector<1x32xf32>
    %281 = math.tanh %280 : vector<1x32xf32>
    %282 = arith.mulf %278, %245 : vector<1x32xf32>
    %283 = arith.mulf %277, %281 : vector<1x32xf32>
    %284 = arith.addf %282, %283 : vector<1x32xf32>
    %285 = math.tanh %284 : vector<1x32xf32>
    %286 = arith.mulf %279, %285 : vector<1x32xf32>
    %287 = vector.broadcast %c6_i32 : i32 to vector<8x1xi32>
    %288 = arith.cmpi eq, %19, %287 : vector<8x1xi32>
    %289 = vector.extract_strided_slice %286 {offsets = [0, 0], sizes = [1, 16], strides = [1, 1]} : vector<1x32xf32> to vector<1x16xf32>
    %290 = vector.shape_cast %288 : vector<8x1xi1> to vector<8x1xi1>
    %291 = vector.broadcast %290 : vector<8x1xi1> to vector<8x16xi1>
    %292 = vector.shape_cast %289 : vector<1x16xf32> to vector<1x16xf32>
    %293 = vector.broadcast %292 : vector<1x16xf32> to vector<8x16xf32>
    %294 = arith.select %291, %293, %255 : vector<8x16xi1>, vector<8x16xf32>
    %295 = vector.broadcast %264 : i32 to vector<8x1xi32>
    %296 = arith.cmpi eq, %19, %295 : vector<8x1xi32>
    %297 = vector.extract_strided_slice %286 {offsets = [0, 16], sizes = [1, 16], strides = [1, 1]} : vector<1x32xf32> to vector<1x16xf32>
    %298 = vector.shape_cast %296 : vector<8x1xi1> to vector<8x1xi1>
    %299 = vector.broadcast %298 : vector<8x1xi1> to vector<8x16xi1>
    %300 = vector.shape_cast %297 : vector<1x16xf32> to vector<1x16xf32>
    %301 = vector.broadcast %300 : vector<1x16xf32> to vector<8x16xf32>
    %302 = arith.select %299, %301, %263 : vector<8x16xi1>, vector<8x16xf32>
    %c7_i32_50 = arith.constant 7 : i32
    %c7_i32_51 = arith.constant 7 : i32
    %303 = arith.subi %c7_i32_51, %c7_i32_50 : i32
    %304 = arith.index_cast %c7_i32_50 : i32 to index
    %c0_52 = arith.constant 0 : index
    %305 = vector.load %arg14[%304, %c0_52] : memref<8x128xf32, #tpu.memory_space<vmem>>, vector<1x128xf32>
    %306 = arith.index_cast %303 : i32 to index
    %c0_53 = arith.constant 0 : index
    %307 = vector.load %arg14[%306, %c0_53] : memref<8x128xf32, #tpu.memory_space<vmem>>, vector<1x128xf32>
    %308 = arith.select %18, %305, %307 : vector<1x128xi1>, vector<1x128xf32>
    %cst_54 = arith.constant dense<0.000000e+00> : vector<1x128xf32>
    %309 = tpu.matmul %286, %27, %cst_54 {dimension_numbers = #tpu.dot_dimension_numbers<[1], [0], [0], [1], [0, 0, 1, 1], [], []>} : vector<1x32xf32>, vector<32x128xf32>, vector<1x128xf32> -> vector<1x128xf32>
    %310 = arith.addf %308, %309 : vector<1x128xf32>
    %311 = arith.negf %310 : vector<1x128xf32>
    %312 = math.exp %311 : vector<1x128xf32>
    %cst_55 = arith.constant 1.000000e+00 : f32
    %313 = vector.broadcast %cst_55 : f32 to vector<1x128xf32>
    %314 = arith.addf %313, %312 : vector<1x128xf32>
    %315 = arith.divf %313, %314 : vector<1x128xf32>
    %316 = vector.extract_strided_slice %315 {offsets = [0, 0], sizes = [1, 32], strides = [1, 1]} : vector<1x128xf32> to vector<1x32xf32>
    %317 = vector.extract_strided_slice %315 {offsets = [0, 32], sizes = [1, 32], strides = [1, 1]} : vector<1x128xf32> to vector<1x32xf32>
    %318 = vector.extract_strided_slice %315 {offsets = [0, 96], sizes = [1, 32], strides = [1, 1]} : vector<1x128xf32> to vector<1x32xf32>
    %319 = vector.extract_strided_slice %310 {offsets = [0, 64], sizes = [1, 32], strides = [1, 1]} : vector<1x128xf32> to vector<1x32xf32>
    %320 = math.tanh %319 : vector<1x32xf32>
    %321 = arith.mulf %317, %284 : vector<1x32xf32>
    %322 = arith.mulf %316, %320 : vector<1x32xf32>
    %323 = arith.addf %321, %322 : vector<1x32xf32>
    %324 = math.tanh %323 : vector<1x32xf32>
    %325 = arith.mulf %318, %324 : vector<1x32xf32>
    %326 = vector.broadcast %c7_i32_50 : i32 to vector<8x1xi32>
    %327 = arith.cmpi eq, %19, %326 : vector<8x1xi32>
    %328 = vector.extract_strided_slice %325 {offsets = [0, 0], sizes = [1, 16], strides = [1, 1]} : vector<1x32xf32> to vector<1x16xf32>
    %329 = vector.shape_cast %327 : vector<8x1xi1> to vector<8x1xi1>
    %330 = vector.broadcast %329 : vector<8x1xi1> to vector<8x16xi1>
    %331 = vector.shape_cast %328 : vector<1x16xf32> to vector<1x16xf32>
    %332 = vector.broadcast %331 : vector<1x16xf32> to vector<8x16xf32>
    %333 = arith.select %330, %332, %294 : vector<8x16xi1>, vector<8x16xf32>
    %334 = vector.broadcast %303 : i32 to vector<8x1xi32>
    %335 = arith.cmpi eq, %19, %334 : vector<8x1xi32>
    %336 = vector.extract_strided_slice %325 {offsets = [0, 16], sizes = [1, 16], strides = [1, 1]} : vector<1x32xf32> to vector<1x16xf32>
    %337 = vector.shape_cast %335 : vector<8x1xi1> to vector<8x1xi1>
    %338 = vector.broadcast %337 : vector<8x1xi1> to vector<8x16xi1>
    %339 = vector.shape_cast %336 : vector<1x16xf32> to vector<1x16xf32>
    %340 = vector.broadcast %339 : vector<1x16xf32> to vector<8x16xf32>
    %341 = arith.select %338, %340, %302 : vector<8x16xi1>, vector<8x16xf32>
    %c8_i32 = arith.constant 8 : i32
    %c0_56 = arith.constant 0 : index
    %c0_57 = arith.constant 0 : index
    %342 = vector.load %arg4[%c0_56, %c0_57] : memref<32x128xf32, #tpu.memory_space<vmem>>, vector<32x128xf32>
    %343 = vector.extract_strided_slice %342 {offsets = [0, 0], sizes = [16, 128], strides = [1, 1]} : vector<32x128xf32> to vector<16x128xf32>
    %cst_58 = arith.constant dense<0.000000e+00> : vector<8x128xf32>
    %344 = tpu.matmul %333, %343, %cst_58 {dimension_numbers = #tpu.dot_dimension_numbers<[1], [0], [0], [1], [0, 0, 1, 1], [], []>} : vector<8x16xf32>, vector<16x128xf32>, vector<8x128xf32> -> vector<8x128xf32>
    %345 = vector.extract_strided_slice %342 {offsets = [16, 0], sizes = [16, 128], strides = [1, 1]} : vector<32x128xf32> to vector<16x128xf32>
    %cst_59 = arith.constant dense<0.000000e+00> : vector<8x128xf32>
    %346 = tpu.matmul %341, %345, %cst_59 {dimension_numbers = #tpu.dot_dimension_numbers<[1], [0], [0], [1], [0, 0, 1, 1], [], []>} : vector<8x16xf32>, vector<16x128xf32>, vector<8x128xf32> -> vector<8x128xf32>
    %347 = arith.addf %344, %346 : vector<8x128xf32>
    %c0_60 = arith.constant 0 : index
    %c0_61 = arith.constant 0 : index
    %348 = vector.load %arg6[%c0_60, %c0_61] : memref<1x128xf32, #tpu.memory_space<vmem>>, vector<1x128xf32>
    %349 = vector.broadcast %348 : vector<1x128xf32> to vector<8x128xf32>
    %350 = arith.addf %347, %349 : vector<8x128xf32>
    %c0_62 = arith.constant 0 : index
    %c0_63 = arith.constant 0 : index
    %351 = vector.load %arg14[%c0_62, %c0_63] : memref<8x128xf32, #tpu.memory_space<vmem>>, vector<8x128xf32>
    tpu.vector_store %arg14[%c0_62, %c0_63], %350 {strides = array<i32>} : memref<8x128xf32, #tpu.memory_space<vmem>>, vector<8x128xf32>,
    %c0_64 = arith.constant 0 : index
    %c0_65 = arith.constant 0 : index
    %352 = vector.load %arg5[%c0_64, %c0_65] : memref<32x128xf32, #tpu.memory_space<vmem>>, vector<32x128xf32>
    %cst_66 = arith.constant 0.000000e+00 : f32
    %353 = vector.broadcast %cst_66 : f32 to vector<1x32xf32>
    %cst_67 = arith.constant 0.000000e+00 : f32
    %354 = vector.broadcast %cst_67 : f32 to vector<8x16xf32>
    %c0_i32_68 = arith.constant 0 : i32
    %c7_i32_69 = arith.constant 7 : i32
    %355 = arith.subi %c7_i32_69, %c0_i32_68 : i32
    %356 = arith.index_cast %c0_i32_68 : i32 to index
    %c0_70 = arith.constant 0 : index
    %357 = vector.load %arg14[%356, %c0_70] : memref<8x128xf32, #tpu.memory_space<vmem>>, vector<1x128xf32>
    %358 = arith.index_cast %355 : i32 to index
    %c0_71 = arith.constant 0 : index
    %359 = vector.load %arg14[%358, %c0_71] : memref<8x128xf32, #tpu.memory_space<vmem>>, vector<1x128xf32>
    %360 = arith.select %18, %357, %359 : vector<1x128xi1>, vector<1x128xf32>
    %cst_72 = arith.constant dense<0.000000e+00> : vector<1x128xf32>
    %361 = tpu.matmul %353, %352, %cst_72 {dimension_numbers = #tpu.dot_dimension_numbers<[1], [0], [0], [1], [0, 0, 1, 1], [], []>} : vector<1x32xf32>, vector<32x128xf32>, vector<1x128xf32> -> vector<1x128xf32>
    %362 = arith.addf %360, %361 : vector<1x128xf32>
    %363 = arith.negf %362 : vector<1x128xf32>
    %364 = math.exp %363 : vector<1x128xf32>
    %cst_73 = arith.constant 1.000000e+00 : f32
    %365 = vector.broadcast %cst_73 : f32 to vector<1x128xf32>
    %366 = arith.addf %365, %364 : vector<1x128xf32>
    %367 = arith.divf %365, %366 : vector<1x128xf32>
    %368 = vector.extract_strided_slice %367 {offsets = [0, 0], sizes = [1, 32], strides = [1, 1]} : vector<1x128xf32> to vector<1x32xf32>
    %369 = vector.extract_strided_slice %367 {offsets = [0, 32], sizes = [1, 32], strides = [1, 1]} : vector<1x128xf32> to vector<1x32xf32>
    %370 = vector.extract_strided_slice %367 {offsets = [0, 96], sizes = [1, 32], strides = [1, 1]} : vector<1x128xf32> to vector<1x32xf32>
    %371 = vector.extract_strided_slice %362 {offsets = [0, 64], sizes = [1, 32], strides = [1, 1]} : vector<1x128xf32> to vector<1x32xf32>
    %372 = math.tanh %371 : vector<1x32xf32>
    %373 = arith.mulf %369, %353 : vector<1x32xf32>
    %374 = arith.mulf %368, %372 : vector<1x32xf32>
    %375 = arith.addf %373, %374 : vector<1x32xf32>
    %376 = math.tanh %375 : vector<1x32xf32>
    %377 = arith.mulf %370, %376 : vector<1x32xf32>
    %378 = vector.broadcast %c0_i32_68 : i32 to vector<8x1xi32>
    %379 = arith.cmpi eq, %19, %378 : vector<8x1xi32>
    %380 = vector.extract_strided_slice %377 {offsets = [0, 0], sizes = [1, 16], strides = [1, 1]} : vector<1x32xf32> to vector<1x16xf32>
    %381 = vector.shape_cast %379 : vector<8x1xi1> to vector<8x1xi1>
    %382 = vector.broadcast %381 : vector<8x1xi1> to vector<8x16xi1>
    %383 = vector.shape_cast %380 : vector<1x16xf32> to vector<1x16xf32>
    %384 = vector.broadcast %383 : vector<1x16xf32> to vector<8x16xf32>
    %385 = arith.select %382, %384, %354 : vector<8x16xi1>, vector<8x16xf32>
    %386 = vector.broadcast %355 : i32 to vector<8x1xi32>
    %387 = arith.cmpi eq, %19, %386 : vector<8x1xi32>
    %388 = vector.extract_strided_slice %377 {offsets = [0, 16], sizes = [1, 16], strides = [1, 1]} : vector<1x32xf32> to vector<1x16xf32>
    %389 = vector.shape_cast %387 : vector<8x1xi1> to vector<8x1xi1>
    %390 = vector.broadcast %389 : vector<8x1xi1> to vector<8x16xi1>
    %391 = vector.shape_cast %388 : vector<1x16xf32> to vector<1x16xf32>
    %392 = vector.broadcast %391 : vector<1x16xf32> to vector<8x16xf32>
    %393 = arith.select %390, %392, %354 : vector<8x16xi1>, vector<8x16xf32>
    %c1_i32_74 = arith.constant 1 : i32
    %c7_i32_75 = arith.constant 7 : i32
    %394 = arith.subi %c7_i32_75, %c1_i32_74 : i32
    %395 = arith.index_cast %c1_i32_74 : i32 to index
    %c0_76 = arith.constant 0 : index
    %396 = vector.load %arg14[%395, %c0_76] : memref<8x128xf32, #tpu.memory_space<vmem>>, vector<1x128xf32>
    %397 = arith.index_cast %394 : i32 to index
    %c0_77 = arith.constant 0 : index
    %398 = vector.load %arg14[%397, %c0_77] : memref<8x128xf32, #tpu.memory_space<vmem>>, vector<1x128xf32>
    %399 = arith.select %18, %396, %398 : vector<1x128xi1>, vector<1x128xf32>
    %cst_78 = arith.constant dense<0.000000e+00> : vector<1x128xf32>
    %400 = tpu.matmul %377, %352, %cst_78 {dimension_numbers = #tpu.dot_dimension_numbers<[1], [0], [0], [1], [0, 0, 1, 1], [], []>} : vector<1x32xf32>, vector<32x128xf32>, vector<1x128xf32> -> vector<1x128xf32>
    %401 = arith.addf %399, %400 : vector<1x128xf32>
    %402 = arith.negf %401 : vector<1x128xf32>
    %403 = math.exp %402 : vector<1x128xf32>
    %cst_79 = arith.constant 1.000000e+00 : f32
    %404 = vector.broadcast %cst_79 : f32 to vector<1x128xf32>
    %405 = arith.addf %404, %403 : vector<1x128xf32>
    %406 = arith.divf %404, %405 : vector<1x128xf32>
    %407 = vector.extract_strided_slice %406 {offsets = [0, 0], sizes = [1, 32], strides = [1, 1]} : vector<1x128xf32> to vector<1x32xf32>
    %408 = vector.extract_strided_slice %406 {offsets = [0, 32], sizes = [1, 32], strides = [1, 1]} : vector<1x128xf32> to vector<1x32xf32>
    %409 = vector.extract_strided_slice %406 {offsets = [0, 96], sizes = [1, 32], strides = [1, 1]} : vector<1x128xf32> to vector<1x32xf32>
    %410 = vector.extract_strided_slice %401 {offsets = [0, 64], sizes = [1, 32], strides = [1, 1]} : vector<1x128xf32> to vector<1x32xf32>
    %411 = math.tanh %410 : vector<1x32xf32>
    %412 = arith.mulf %408, %375 : vector<1x32xf32>
    %413 = arith.mulf %407, %411 : vector<1x32xf32>
    %414 = arith.addf %412, %413 : vector<1x32xf32>
    %415 = math.tanh %414 : vector<1x32xf32>
    %416 = arith.mulf %409, %415 : vector<1x32xf32>
    %417 = vector.broadcast %c1_i32_74 : i32 to vector<8x1xi32>
    %418 = arith.cmpi eq, %19, %417 : vector<8x1xi32>
    %419 = vector.extract_strided_slice %416 {offsets = [0, 0], sizes = [1, 16], strides = [1, 1]} : vector<1x32xf32> to vector<1x16xf32>
    %420 = vector.shape_cast %418 : vector<8x1xi1> to vector<8x1xi1>
    %421 = vector.broadcast %420 : vector<8x1xi1> to vector<8x16xi1>
    %422 = vector.shape_cast %419 : vector<1x16xf32> to vector<1x16xf32>
    %423 = vector.broadcast %422 : vector<1x16xf32> to vector<8x16xf32>
    %424 = arith.select %421, %423, %385 : vector<8x16xi1>, vector<8x16xf32>
    %425 = vector.broadcast %394 : i32 to vector<8x1xi32>
    %426 = arith.cmpi eq, %19, %425 : vector<8x1xi32>
    %427 = vector.extract_strided_slice %416 {offsets = [0, 16], sizes = [1, 16], strides = [1, 1]} : vector<1x32xf32> to vector<1x16xf32>
    %428 = vector.shape_cast %426 : vector<8x1xi1> to vector<8x1xi1>
    %429 = vector.broadcast %428 : vector<8x1xi1> to vector<8x16xi1>
    %430 = vector.shape_cast %427 : vector<1x16xf32> to vector<1x16xf32>
    %431 = vector.broadcast %430 : vector<1x16xf32> to vector<8x16xf32>
    %432 = arith.select %429, %431, %393 : vector<8x16xi1>, vector<8x16xf32>
    %c2_i32_80 = arith.constant 2 : i32
    %c7_i32_81 = arith.constant 7 : i32
    %433 = arith.subi %c7_i32_81, %c2_i32_80 : i32
    %434 = arith.index_cast %c2_i32_80 : i32 to index
    %c0_82 = arith.constant 0 : index
    %435 = vector.load %arg14[%434, %c0_82] : memref<8x128xf32, #tpu.memory_space<vmem>>, vector<1x128xf32>
    %436 = arith.index_cast %433 : i32 to index
    %c0_83 = arith.constant 0 : index
    %437 = vector.load %arg14[%436, %c0_83] : memref<8x128xf32, #tpu.memory_space<vmem>>, vector<1x128xf32>
    %438 = arith.select %18, %435, %437 : vector<1x128xi1>, vector<1x128xf32>
    %cst_84 = arith.constant dense<0.000000e+00> : vector<1x128xf32>
    %439 = tpu.matmul %416, %352, %cst_84 {dimension_numbers = #tpu.dot_dimension_numbers<[1], [0], [0], [1], [0, 0, 1, 1], [], []>} : vector<1x32xf32>, vector<32x128xf32>, vector<1x128xf32> -> vector<1x128xf32>
    %440 = arith.addf %438, %439 : vector<1x128xf32>
    %441 = arith.negf %440 : vector<1x128xf32>
    %442 = math.exp %441 : vector<1x128xf32>
    %cst_85 = arith.constant 1.000000e+00 : f32
    %443 = vector.broadcast %cst_85 : f32 to vector<1x128xf32>
    %444 = arith.addf %443, %442 : vector<1x128xf32>
    %445 = arith.divf %443, %444 : vector<1x128xf32>
    %446 = vector.extract_strided_slice %445 {offsets = [0, 0], sizes = [1, 32], strides = [1, 1]} : vector<1x128xf32> to vector<1x32xf32>
    %447 = vector.extract_strided_slice %445 {offsets = [0, 32], sizes = [1, 32], strides = [1, 1]} : vector<1x128xf32> to vector<1x32xf32>
    %448 = vector.extract_strided_slice %445 {offsets = [0, 96], sizes = [1, 32], strides = [1, 1]} : vector<1x128xf32> to vector<1x32xf32>
    %449 = vector.extract_strided_slice %440 {offsets = [0, 64], sizes = [1, 32], strides = [1, 1]} : vector<1x128xf32> to vector<1x32xf32>
    %450 = math.tanh %449 : vector<1x32xf32>
    %451 = arith.mulf %447, %414 : vector<1x32xf32>
    %452 = arith.mulf %446, %450 : vector<1x32xf32>
    %453 = arith.addf %451, %452 : vector<1x32xf32>
    %454 = math.tanh %453 : vector<1x32xf32>
    %455 = arith.mulf %448, %454 : vector<1x32xf32>
    %456 = vector.broadcast %c2_i32_80 : i32 to vector<8x1xi32>
    %457 = arith.cmpi eq, %19, %456 : vector<8x1xi32>
    %458 = vector.extract_strided_slice %455 {offsets = [0, 0], sizes = [1, 16], strides = [1, 1]} : vector<1x32xf32> to vector<1x16xf32>
    %459 = vector.shape_cast %457 : vector<8x1xi1> to vector<8x1xi1>
    %460 = vector.broadcast %459 : vector<8x1xi1> to vector<8x16xi1>
    %461 = vector.shape_cast %458 : vector<1x16xf32> to vector<1x16xf32>
    %462 = vector.broadcast %461 : vector<1x16xf32> to vector<8x16xf32>
    %463 = arith.select %460, %462, %424 : vector<8x16xi1>, vector<8x16xf32>
    %464 = vector.broadcast %433 : i32 to vector<8x1xi32>
    %465 = arith.cmpi eq, %19, %464 : vector<8x1xi32>
    %466 = vector.extract_strided_slice %455 {offsets = [0, 16], sizes = [1, 16], strides = [1, 1]} : vector<1x32xf32> to vector<1x16xf32>
    %467 = vector.shape_cast %465 : vector<8x1xi1> to vector<8x1xi1>
    %468 = vector.broadcast %467 : vector<8x1xi1> to vector<8x16xi1>
    %469 = vector.shape_cast %466 : vector<1x16xf32> to vector<1x16xf32>
    %470 = vector.broadcast %469 : vector<1x16xf32> to vector<8x16xf32>
    %471 = arith.select %468, %470, %432 : vector<8x16xi1>, vector<8x16xf32>
    %c3_i32_86 = arith.constant 3 : i32
    %c7_i32_87 = arith.constant 7 : i32
    %472 = arith.subi %c7_i32_87, %c3_i32_86 : i32
    %473 = arith.index_cast %c3_i32_86 : i32 to index
    %c0_88 = arith.constant 0 : index
    %474 = vector.load %arg14[%473, %c0_88] : memref<8x128xf32, #tpu.memory_space<vmem>>, vector<1x128xf32>
    %475 = arith.index_cast %472 : i32 to index
    %c0_89 = arith.constant 0 : index
    %476 = vector.load %arg14[%475, %c0_89] : memref<8x128xf32, #tpu.memory_space<vmem>>, vector<1x128xf32>
    %477 = arith.select %18, %474, %476 : vector<1x128xi1>, vector<1x128xf32>
    %cst_90 = arith.constant dense<0.000000e+00> : vector<1x128xf32>
    %478 = tpu.matmul %455, %352, %cst_90 {dimension_numbers = #tpu.dot_dimension_numbers<[1], [0], [0], [1], [0, 0, 1, 1], [], []>} : vector<1x32xf32>, vector<32x128xf32>, vector<1x128xf32> -> vector<1x128xf32>
    %479 = arith.addf %477, %478 : vector<1x128xf32>
    %480 = arith.negf %479 : vector<1x128xf32>
    %481 = math.exp %480 : vector<1x128xf32>
    %cst_91 = arith.constant 1.000000e+00 : f32
    %482 = vector.broadcast %cst_91 : f32 to vector<1x128xf32>
    %483 = arith.addf %482, %481 : vector<1x128xf32>
    %484 = arith.divf %482, %483 : vector<1x128xf32>
    %485 = vector.extract_strided_slice %484 {offsets = [0, 0], sizes = [1, 32], strides = [1, 1]} : vector<1x128xf32> to vector<1x32xf32>
    %486 = vector.extract_strided_slice %484 {offsets = [0, 32], sizes = [1, 32], strides = [1, 1]} : vector<1x128xf32> to vector<1x32xf32>
    %487 = vector.extract_strided_slice %484 {offsets = [0, 96], sizes = [1, 32], strides = [1, 1]} : vector<1x128xf32> to vector<1x32xf32>
    %488 = vector.extract_strided_slice %479 {offsets = [0, 64], sizes = [1, 32], strides = [1, 1]} : vector<1x128xf32> to vector<1x32xf32>
    %489 = math.tanh %488 : vector<1x32xf32>
    %490 = arith.mulf %486, %453 : vector<1x32xf32>
    %491 = arith.mulf %485, %489 : vector<1x32xf32>
    %492 = arith.addf %490, %491 : vector<1x32xf32>
    %493 = math.tanh %492 : vector<1x32xf32>
    %494 = arith.mulf %487, %493 : vector<1x32xf32>
    %495 = vector.broadcast %c3_i32_86 : i32 to vector<8x1xi32>
    %496 = arith.cmpi eq, %19, %495 : vector<8x1xi32>
    %497 = vector.extract_strided_slice %494 {offsets = [0, 0], sizes = [1, 16], strides = [1, 1]} : vector<1x32xf32> to vector<1x16xf32>
    %498 = vector.shape_cast %496 : vector<8x1xi1> to vector<8x1xi1>
    %499 = vector.broadcast %498 : vector<8x1xi1> to vector<8x16xi1>
    %500 = vector.shape_cast %497 : vector<1x16xf32> to vector<1x16xf32>
    %501 = vector.broadcast %500 : vector<1x16xf32> to vector<8x16xf32>
    %502 = arith.select %499, %501, %463 : vector<8x16xi1>, vector<8x16xf32>
    %503 = vector.broadcast %472 : i32 to vector<8x1xi32>
    %504 = arith.cmpi eq, %19, %503 : vector<8x1xi32>
    %505 = vector.extract_strided_slice %494 {offsets = [0, 16], sizes = [1, 16], strides = [1, 1]} : vector<1x32xf32> to vector<1x16xf32>
    %506 = vector.shape_cast %504 : vector<8x1xi1> to vector<8x1xi1>
    %507 = vector.broadcast %506 : vector<8x1xi1> to vector<8x16xi1>
    %508 = vector.shape_cast %505 : vector<1x16xf32> to vector<1x16xf32>
    %509 = vector.broadcast %508 : vector<1x16xf32> to vector<8x16xf32>
    %510 = arith.select %507, %509, %471 : vector<8x16xi1>, vector<8x16xf32>
    %c4_i32_92 = arith.constant 4 : i32
    %c7_i32_93 = arith.constant 7 : i32
    %511 = arith.subi %c7_i32_93, %c4_i32_92 : i32
    %512 = arith.index_cast %c4_i32_92 : i32 to index
    %c0_94 = arith.constant 0 : index
    %513 = vector.load %arg14[%512, %c0_94] : memref<8x128xf32, #tpu.memory_space<vmem>>, vector<1x128xf32>
    %514 = arith.index_cast %511 : i32 to index
    %c0_95 = arith.constant 0 : index
    %515 = vector.load %arg14[%514, %c0_95] : memref<8x128xf32, #tpu.memory_space<vmem>>, vector<1x128xf32>
    %516 = arith.select %18, %513, %515 : vector<1x128xi1>, vector<1x128xf32>
    %cst_96 = arith.constant dense<0.000000e+00> : vector<1x128xf32>
    %517 = tpu.matmul %494, %352, %cst_96 {dimension_numbers = #tpu.dot_dimension_numbers<[1], [0], [0], [1], [0, 0, 1, 1], [], []>} : vector<1x32xf32>, vector<32x128xf32>, vector<1x128xf32> -> vector<1x128xf32>
    %518 = arith.addf %516, %517 : vector<1x128xf32>
    %519 = arith.negf %518 : vector<1x128xf32>
    %520 = math.exp %519 : vector<1x128xf32>
    %cst_97 = arith.constant 1.000000e+00 : f32
    %521 = vector.broadcast %cst_97 : f32 to vector<1x128xf32>
    %522 = arith.addf %521, %520 : vector<1x128xf32>
    %523 = arith.divf %521, %522 : vector<1x128xf32>
    %524 = vector.extract_strided_slice %523 {offsets = [0, 0], sizes = [1, 32], strides = [1, 1]} : vector<1x128xf32> to vector<1x32xf32>
    %525 = vector.extract_strided_slice %523 {offsets = [0, 32], sizes = [1, 32], strides = [1, 1]} : vector<1x128xf32> to vector<1x32xf32>
    %526 = vector.extract_strided_slice %523 {offsets = [0, 96], sizes = [1, 32], strides = [1, 1]} : vector<1x128xf32> to vector<1x32xf32>
    %527 = vector.extract_strided_slice %518 {offsets = [0, 64], sizes = [1, 32], strides = [1, 1]} : vector<1x128xf32> to vector<1x32xf32>
    %528 = math.tanh %527 : vector<1x32xf32>
    %529 = arith.mulf %525, %492 : vector<1x32xf32>
    %530 = arith.mulf %524, %528 : vector<1x32xf32>
    %531 = arith.addf %529, %530 : vector<1x32xf32>
    %532 = math.tanh %531 : vector<1x32xf32>
    %533 = arith.mulf %526, %532 : vector<1x32xf32>
    %534 = vector.broadcast %c4_i32_92 : i32 to vector<8x1xi32>
    %535 = arith.cmpi eq, %19, %534 : vector<8x1xi32>
    %536 = vector.extract_strided_slice %533 {offsets = [0, 0], sizes = [1, 16], strides = [1, 1]} : vector<1x32xf32> to vector<1x16xf32>
    %537 = vector.shape_cast %535 : vector<8x1xi1> to vector<8x1xi1>
    %538 = vector.broadcast %537 : vector<8x1xi1> to vector<8x16xi1>
    %539 = vector.shape_cast %536 : vector<1x16xf32> to vector<1x16xf32>
    %540 = vector.broadcast %539 : vector<1x16xf32> to vector<8x16xf32>
    %541 = arith.select %538, %540, %502 : vector<8x16xi1>, vector<8x16xf32>
    %542 = vector.broadcast %511 : i32 to vector<8x1xi32>
    %543 = arith.cmpi eq, %19, %542 : vector<8x1xi32>
    %544 = vector.extract_strided_slice %533 {offsets = [0, 16], sizes = [1, 16], strides = [1, 1]} : vector<1x32xf32> to vector<1x16xf32>
    %545 = vector.shape_cast %543 : vector<8x1xi1> to vector<8x1xi1>
    %546 = vector.broadcast %545 : vector<8x1xi1> to vector<8x16xi1>
    %547 = vector.shape_cast %544 : vector<1x16xf32> to vector<1x16xf32>
    %548 = vector.broadcast %547 : vector<1x16xf32> to vector<8x16xf32>
    %549 = arith.select %546, %548, %510 : vector<8x16xi1>, vector<8x16xf32>
    %c5_i32_98 = arith.constant 5 : i32
    %c7_i32_99 = arith.constant 7 : i32
    %550 = arith.subi %c7_i32_99, %c5_i32_98 : i32
    %551 = arith.index_cast %c5_i32_98 : i32 to index
    %c0_100 = arith.constant 0 : index
    %552 = vector.load %arg14[%551, %c0_100] : memref<8x128xf32, #tpu.memory_space<vmem>>, vector<1x128xf32>
    %553 = arith.index_cast %550 : i32 to index
    %c0_101 = arith.constant 0 : index
    %554 = vector.load %arg14[%553, %c0_101] : memref<8x128xf32, #tpu.memory_space<vmem>>, vector<1x128xf32>
    %555 = arith.select %18, %552, %554 : vector<1x128xi1>, vector<1x128xf32>
    %cst_102 = arith.constant dense<0.000000e+00> : vector<1x128xf32>
    %556 = tpu.matmul %533, %352, %cst_102 {dimension_numbers = #tpu.dot_dimension_numbers<[1], [0], [0], [1], [0, 0, 1, 1], [], []>} : vector<1x32xf32>, vector<32x128xf32>, vector<1x128xf32> -> vector<1x128xf32>
    %557 = arith.addf %555, %556 : vector<1x128xf32>
    %558 = arith.negf %557 : vector<1x128xf32>
    %559 = math.exp %558 : vector<1x128xf32>
    %cst_103 = arith.constant 1.000000e+00 : f32
    %560 = vector.broadcast %cst_103 : f32 to vector<1x128xf32>
    %561 = arith.addf %560, %559 : vector<1x128xf32>
    %562 = arith.divf %560, %561 : vector<1x128xf32>
    %563 = vector.extract_strided_slice %562 {offsets = [0, 0], sizes = [1, 32], strides = [1, 1]} : vector<1x128xf32> to vector<1x32xf32>
    %564 = vector.extract_strided_slice %562 {offsets = [0, 32], sizes = [1, 32], strides = [1, 1]} : vector<1x128xf32> to vector<1x32xf32>
    %565 = vector.extract_strided_slice %562 {offsets = [0, 96], sizes = [1, 32], strides = [1, 1]} : vector<1x128xf32> to vector<1x32xf32>
    %566 = vector.extract_strided_slice %557 {offsets = [0, 64], sizes = [1, 32], strides = [1, 1]} : vector<1x128xf32> to vector<1x32xf32>
    %567 = math.tanh %566 : vector<1x32xf32>
    %568 = arith.mulf %564, %531 : vector<1x32xf32>
    %569 = arith.mulf %563, %567 : vector<1x32xf32>
    %570 = arith.addf %568, %569 : vector<1x32xf32>
    %571 = math.tanh %570 : vector<1x32xf32>
    %572 = arith.mulf %565, %571 : vector<1x32xf32>
    %573 = vector.broadcast %c5_i32_98 : i32 to vector<8x1xi32>
    %574 = arith.cmpi eq, %19, %573 : vector<8x1xi32>
    %575 = vector.extract_strided_slice %572 {offsets = [0, 0], sizes = [1, 16], strides = [1, 1]} : vector<1x32xf32> to vector<1x16xf32>
    %576 = vector.shape_cast %574 : vector<8x1xi1> to vector<8x1xi1>
    %577 = vector.broadcast %576 : vector<8x1xi1> to vector<8x16xi1>
    %578 = vector.shape_cast %575 : vector<1x16xf32> to vector<1x16xf32>
    %579 = vector.broadcast %578 : vector<1x16xf32> to vector<8x16xf32>
    %580 = arith.select %577, %579, %541 : vector<8x16xi1>, vector<8x16xf32>
    %581 = vector.broadcast %550 : i32 to vector<8x1xi32>
    %582 = arith.cmpi eq, %19, %581 : vector<8x1xi32>
    %583 = vector.extract_strided_slice %572 {offsets = [0, 16], sizes = [1, 16], strides = [1, 1]} : vector<1x32xf32> to vector<1x16xf32>
    %584 = vector.shape_cast %582 : vector<8x1xi1> to vector<8x1xi1>
    %585 = vector.broadcast %584 : vector<8x1xi1> to vector<8x16xi1>
    %586 = vector.shape_cast %583 : vector<1x16xf32> to vector<1x16xf32>
    %587 = vector.broadcast %586 : vector<1x16xf32> to vector<8x16xf32>
    %588 = arith.select %585, %587, %549 : vector<8x16xi1>, vector<8x16xf32>
    %c6_i32_104 = arith.constant 6 : i32
    %c7_i32_105 = arith.constant 7 : i32
    %589 = arith.subi %c7_i32_105, %c6_i32_104 : i32
    %590 = arith.index_cast %c6_i32_104 : i32 to index
    %c0_106 = arith.constant 0 : index
    %591 = vector.load %arg14[%590, %c0_106] : memref<8x128xf32, #tpu.memory_space<vmem>>, vector<1x128xf32>
    %592 = arith.index_cast %589 : i32 to index
    %c0_107 = arith.constant 0 : index
    %593 = vector.load %arg14[%592, %c0_107] : memref<8x128xf32, #tpu.memory_space<vmem>>, vector<1x128xf32>
    %594 = arith.select %18, %591, %593 : vector<1x128xi1>, vector<1x128xf32>
    %cst_108 = arith.constant dense<0.000000e+00> : vector<1x128xf32>
    %595 = tpu.matmul %572, %352, %cst_108 {dimension_numbers = #tpu.dot_dimension_numbers<[1], [0], [0], [1], [0, 0, 1, 1], [], []>} : vector<1x32xf32>, vector<32x128xf32>, vector<1x128xf32> -> vector<1x128xf32>
    %596 = arith.addf %594, %595 : vector<1x128xf32>
    %597 = arith.negf %596 : vector<1x128xf32>
    %598 = math.exp %597 : vector<1x128xf32>
    %cst_109 = arith.constant 1.000000e+00 : f32
    %599 = vector.broadcast %cst_109 : f32 to vector<1x128xf32>
    %600 = arith.addf %599, %598 : vector<1x128xf32>
    %601 = arith.divf %599, %600 : vector<1x128xf32>
    %602 = vector.extract_strided_slice %601 {offsets = [0, 0], sizes = [1, 32], strides = [1, 1]} : vector<1x128xf32> to vector<1x32xf32>
    %603 = vector.extract_strided_slice %601 {offsets = [0, 32], sizes = [1, 32], strides = [1, 1]} : vector<1x128xf32> to vector<1x32xf32>
    %604 = vector.extract_strided_slice %601 {offsets = [0, 96], sizes = [1, 32], strides = [1, 1]} : vector<1x128xf32> to vector<1x32xf32>
    %605 = vector.extract_strided_slice %596 {offsets = [0, 64], sizes = [1, 32], strides = [1, 1]} : vector<1x128xf32> to vector<1x32xf32>
    %606 = math.tanh %605 : vector<1x32xf32>
    %607 = arith.mulf %603, %570 : vector<1x32xf32>
    %608 = arith.mulf %602, %606 : vector<1x32xf32>
    %609 = arith.addf %607, %608 : vector<1x32xf32>
    %610 = math.tanh %609 : vector<1x32xf32>
    %611 = arith.mulf %604, %610 : vector<1x32xf32>
    %612 = vector.broadcast %c6_i32_104 : i32 to vector<8x1xi32>
    %613 = arith.cmpi eq, %19, %612 : vector<8x1xi32>
    %614 = vector.extract_strided_slice %611 {offsets = [0, 0], sizes = [1, 16], strides = [1, 1]} : vector<1x32xf32> to vector<1x16xf32>
    %615 = vector.shape_cast %613 : vector<8x1xi1> to vector<8x1xi1>
    %616 = vector.broadcast %615 : vector<8x1xi1> to vector<8x16xi1>
    %617 = vector.shape_cast %614 : vector<1x16xf32> to vector<1x16xf32>
    %618 = vector.broadcast %617 : vector<1x16xf32> to vector<8x16xf32>
    %619 = arith.select %616, %618, %580 : vector<8x16xi1>, vector<8x16xf32>
    %620 = vector.broadcast %589 : i32 to vector<8x1xi32>
    %621 = arith.cmpi eq, %19, %620 : vector<8x1xi32>
    %622 = vector.extract_strided_slice %611 {offsets = [0, 16], sizes = [1, 16], strides = [1, 1]} : vector<1x32xf32> to vector<1x16xf32>
    %623 = vector.shape_cast %621 : vector<8x1xi1> to vector<8x1xi1>
    %624 = vector.broadcast %623 : vector<8x1xi1> to vector<8x16xi1>
    %625 = vector.shape_cast %622 : vector<1x16xf32> to vector<1x16xf32>
    %626 = vector.broadcast %625 : vector<1x16xf32> to vector<8x16xf32>
    %627 = arith.select %624, %626, %588 : vector<8x16xi1>, vector<8x16xf32>
    %c7_i32_110 = arith.constant 7 : i32
    %c7_i32_111 = arith.constant 7 : i32
    %628 = arith.subi %c7_i32_111, %c7_i32_110 : i32
    %629 = arith.index_cast %c7_i32_110 : i32 to index
    %c0_112 = arith.constant 0 : index
    %630 = vector.load %arg14[%629, %c0_112] : memref<8x128xf32, #tpu.memory_space<vmem>>, vector<1x128xf32>
    %631 = arith.index_cast %628 : i32 to index
    %c0_113 = arith.constant 0 : index
    %632 = vector.load %arg14[%631, %c0_113] : memref<8x128xf32, #tpu.memory_space<vmem>>, vector<1x128xf32>
    %633 = arith.select %18, %630, %632 : vector<1x128xi1>, vector<1x128xf32>
    %cst_114 = arith.constant dense<0.000000e+00> : vector<1x128xf32>
    %634 = tpu.matmul %611, %352, %cst_114 {dimension_numbers = #tpu.dot_dimension_numbers<[1], [0], [0], [1], [0, 0, 1, 1], [], []>} : vector<1x32xf32>, vector<32x128xf32>, vector<1x128xf32> -> vector<1x128xf32>
    %635 = arith.addf %633, %634 : vector<1x128xf32>
    %636 = arith.negf %635 : vector<1x128xf32>
    %637 = math.exp %636 : vector<1x128xf32>
    %cst_115 = arith.constant 1.000000e+00 : f32
    %638 = vector.broadcast %cst_115 : f32 to vector<1x128xf32>
    %639 = arith.addf %638, %637 : vector<1x128xf32>
    %640 = arith.divf %638, %639 : vector<1x128xf32>
    %641 = vector.extract_strided_slice %640 {offsets = [0, 0], sizes = [1, 32], strides = [1, 1]} : vector<1x128xf32> to vector<1x32xf32>
    %642 = vector.extract_strided_slice %640 {offsets = [0, 32], sizes = [1, 32], strides = [1, 1]} : vector<1x128xf32> to vector<1x32xf32>
    %643 = vector.extract_strided_slice %640 {offsets = [0, 96], sizes = [1, 32], strides = [1, 1]} : vector<1x128xf32> to vector<1x32xf32>
    %644 = vector.extract_strided_slice %635 {offsets = [0, 64], sizes = [1, 32], strides = [1, 1]} : vector<1x128xf32> to vector<1x32xf32>
    %645 = math.tanh %644 : vector<1x32xf32>
    %646 = arith.mulf %642, %609 : vector<1x32xf32>
    %647 = arith.mulf %641, %645 : vector<1x32xf32>
    %648 = arith.addf %646, %647 : vector<1x32xf32>
    %649 = math.tanh %648 : vector<1x32xf32>
    %650 = arith.mulf %643, %649 : vector<1x32xf32>
    %651 = vector.broadcast %c7_i32_110 : i32 to vector<8x1xi32>
    %652 = arith.cmpi eq, %19, %651 : vector<8x1xi32>
    %653 = vector.extract_strided_slice %650 {offsets = [0, 0], sizes = [1, 16], strides = [1, 1]} : vector<1x32xf32> to vector<1x16xf32>
    %654 = vector.shape_cast %652 : vector<8x1xi1> to vector<8x1xi1>
    %655 = vector.broadcast %654 : vector<8x1xi1> to vector<8x16xi1>
    %656 = vector.shape_cast %653 : vector<1x16xf32> to vector<1x16xf32>
    %657 = vector.broadcast %656 : vector<1x16xf32> to vector<8x16xf32>
    %658 = arith.select %655, %657, %619 : vector<8x16xi1>, vector<8x16xf32>
    %659 = vector.broadcast %628 : i32 to vector<8x1xi32>
    %660 = arith.cmpi eq, %19, %659 : vector<8x1xi32>
    %661 = vector.extract_strided_slice %650 {offsets = [0, 16], sizes = [1, 16], strides = [1, 1]} : vector<1x32xf32> to vector<1x16xf32>
    %662 = vector.shape_cast %660 : vector<8x1xi1> to vector<8x1xi1>
    %663 = vector.broadcast %662 : vector<8x1xi1> to vector<8x16xi1>
    %664 = vector.shape_cast %661 : vector<1x16xf32> to vector<1x16xf32>
    %665 = vector.broadcast %664 : vector<1x16xf32> to vector<8x16xf32>
    %666 = arith.select %663, %665, %627 : vector<8x16xi1>, vector<8x16xf32>
    %c8_i32_116 = arith.constant 8 : i32
    %c0_117 = arith.constant 0 : index
    %c0_118 = arith.constant 0 : index
    %667 = vector.load %arg7[%c0_117, %c0_118] : memref<32x6xf32, #tpu.memory_space<vmem>>, vector<32x6xf32>
    %668 = vector.extract_strided_slice %667 {offsets = [0, 0], sizes = [16, 6], strides = [1, 1]} : vector<32x6xf32> to vector<16x6xf32>
    %cst_119 = arith.constant dense<0.000000e+00> : vector<8x6xf32>
    %669 = tpu.matmul %658, %668, %cst_119 {dimension_numbers = #tpu.dot_dimension_numbers<[1], [0], [0], [1], [0, 0, 1, 1], [], []>} : vector<8x16xf32>, vector<16x6xf32>, vector<8x6xf32> -> vector<8x6xf32>
    %670 = vector.extract_strided_slice %667 {offsets = [16, 0], sizes = [16, 6], strides = [1, 1]} : vector<32x6xf32> to vector<16x6xf32>
    %cst_120 = arith.constant dense<0.000000e+00> : vector<8x6xf32>
    %671 = tpu.matmul %666, %670, %cst_120 {dimension_numbers = #tpu.dot_dimension_numbers<[1], [0], [0], [1], [0, 0, 1, 1], [], []>} : vector<8x16xf32>, vector<16x6xf32>, vector<8x6xf32> -> vector<8x6xf32>
    %672 = arith.addf %669, %671 : vector<8x6xf32>
    %c0_121 = arith.constant 0 : index
    %c0_122 = arith.constant 0 : index
    %673 = vector.load %arg8[%c0_121, %c0_122] : memref<1x6xf32, #tpu.memory_space<vmem>>, vector<1x6xf32>
    %674 = vector.broadcast %673 : vector<1x6xf32> to vector<8x6xf32>
    %675 = arith.addf %672, %674 : vector<8x6xf32>
    %c0_123 = arith.constant 0 : index
    %c0_124 = arith.constant 0 : index
    %676 = vector.load %arg11[%c0_123, %c0_124] : memref<8x6xf32, #tpu.memory_space<vmem>>, vector<8x6xf32>
    tpu.vector_store %arg11[%c0_123, %c0_124], %675 {strides = array<i32>} : memref<8x6xf32, #tpu.memory_space<vmem>>, vector<8x6xf32>,
    %c0_125 = arith.constant 0 : index
    %c0_126 = arith.constant 0 : index
    %677 = vector.load %arg9[%c0_125, %c0_126] : memref<6x6xf32, #tpu.memory_space<vmem>>, vector<6x6xf32>
    %678 = tpu.iota {dimensions = array<i32: 1>} : vector<1x6xi32>
    %679 = tpu.iota {dimensions = array<i32: 0>} : vector<6x6xi32>
    %680 = tpu.iota {dimensions = array<i32: 1>} : vector<6x6xi32>
    %681 = arith.cmpi eq, %679, %680 : vector<6x6xi32>
    %682 = arith.extui %681 : vector<6x6xi1> to vector<6x6xi32>
    %683 = arith.sitofp %682 : vector<6x6xi32> to vector<6x6xf32>
    %cst_127 = arith.constant 1.000000e+00 : f32
    %684 = vector.broadcast %cst_127 : f32 to vector<6x6xf32>
    %c4_i32_128 = arith.constant 4 : i32
    %685 = vector.broadcast %c4_i32_128 : i32 to vector<1x6xi32>
    %686 = arith.cmpi eq, %678, %685 : vector<1x6xi32>
    %cst_129 = arith.constant 0.000000e+00 : f32
    %cst_130 = arith.constant -1.000000e+04 : f32
    %687 = vector.broadcast %cst_129 : f32 to vector<1x6xf32>
    %688 = vector.broadcast %cst_130 : f32 to vector<1x6xf32>
    %689 = arith.select %686, %687, %688 : vector<1x6xi1>, vector<1x6xf32>
    %c0_i32_131 = arith.constant 0 : i32
    %690 = vector.broadcast %c0_i32_131 : i32 to vector<8x6xi32>
    %c0_i32_132 = arith.constant 0 : i32
    %691 = vector.broadcast %689 : vector<1x6xf32> to vector<6x6xf32>
    %692 = arith.mulf %683, %691 : vector<6x6xf32>
    %cst_133 = arith.constant dense<0.000000e+00> : vector<6x6xf32>
    %693 = tpu.matmul %692, %684, %cst_133 {dimension_numbers = #tpu.dot_dimension_numbers<[1], [0], [0], [1], [0, 0, 1, 1], [], []>} : vector<6x6xf32>, vector<6x6xf32>, vector<6x6xf32> -> vector<6x6xf32>
    %694 = arith.addf %693, %677 : vector<6x6xf32>
    %cst_134 = arith.constant dense<0xFF800000> : vector<6xf32>
    %695 = vector.multi_reduction <maximumf>, %694, %cst_134 [0] : vector<6x6xf32> to vector<6xf32>
    %696 = vector.shape_cast %695 : vector<6xf32> to vector<1x6xf32>
    %697 = vector.broadcast %696 : vector<1x6xf32> to vector<6x6xf32>
    %698 = arith.cmpf oeq, %694, %697 : vector<6x6xf32>
    %c6_i32_135 = arith.constant 6 : i32
    %699 = vector.broadcast %c6_i32_135 : i32 to vector<6x6xi32>
    %700 = arith.select %698, %679, %699 : vector<6x6xi1>, vector<6x6xi32>
    %cst_136 = arith.constant dense<2147483647> : vector<6xi32>
    %701 = vector.multi_reduction <minsi>, %700, %cst_136 [0] : vector<6x6xi32> to vector<6xi32>
    %702 = vector.shape_cast %701 : vector<6xi32> to vector<1x6xi32>
    %703 = vector.broadcast %c0_i32_132 : i32 to vector<8x1xi32>
    %704 = arith.cmpi eq, %19, %703 : vector<8x1xi32>
    %705 = vector.shape_cast %704 : vector<8x1xi1> to vector<8x1xi1>
    %706 = vector.broadcast %705 : vector<8x1xi1> to vector<8x6xi1>
    %707 = vector.shape_cast %702 : vector<1x6xi32> to vector<1x6xi32>
    %708 = vector.broadcast %707 : vector<1x6xi32> to vector<8x6xi32>
    %709 = arith.select %706, %708, %690 : vector<8x6xi1>, vector<8x6xi32>
    %710 = arith.index_cast %c0_i32_132 : i32 to index
    %c0_137 = arith.constant 0 : index
    %711 = vector.load %arg11[%710, %c0_137] : memref<8x6xf32, #tpu.memory_space<vmem>>, vector<1x6xf32>
    %712 = arith.addf %696, %711 : vector<1x6xf32>
    %c1_i32_138 = arith.constant 1 : i32
    %713 = vector.broadcast %712 : vector<1x6xf32> to vector<6x6xf32>
    %714 = arith.mulf %683, %713 : vector<6x6xf32>
    %cst_139 = arith.constant dense<0.000000e+00> : vector<6x6xf32>
    %715 = tpu.matmul %714, %684, %cst_139 {dimension_numbers = #tpu.dot_dimension_numbers<[1], [0], [0], [1], [0, 0, 1, 1], [], []>} : vector<6x6xf32>, vector<6x6xf32>, vector<6x6xf32> -> vector<6x6xf32>
    %716 = arith.addf %715, %677 : vector<6x6xf32>
    %cst_140 = arith.constant dense<0xFF800000> : vector<6xf32>
    %717 = vector.multi_reduction <maximumf>, %716, %cst_140 [0] : vector<6x6xf32> to vector<6xf32>
    %718 = vector.shape_cast %717 : vector<6xf32> to vector<1x6xf32>
    %719 = vector.broadcast %718 : vector<1x6xf32> to vector<6x6xf32>
    %720 = arith.cmpf oeq, %716, %719 : vector<6x6xf32>
    %c6_i32_141 = arith.constant 6 : i32
    %721 = vector.broadcast %c6_i32_141 : i32 to vector<6x6xi32>
    %722 = arith.select %720, %679, %721 : vector<6x6xi1>, vector<6x6xi32>
    %cst_142 = arith.constant dense<2147483647> : vector<6xi32>
    %723 = vector.multi_reduction <minsi>, %722, %cst_142 [0] : vector<6x6xi32> to vector<6xi32>
    %724 = vector.shape_cast %723 : vector<6xi32> to vector<1x6xi32>
    %725 = vector.broadcast %c1_i32_138 : i32 to vector<8x1xi32>
    %726 = arith.cmpi eq, %19, %725 : vector<8x1xi32>
    %727 = vector.shape_cast %726 : vector<8x1xi1> to vector<8x1xi1>
    %728 = vector.broadcast %727 : vector<8x1xi1> to vector<8x6xi1>
    %729 = vector.shape_cast %724 : vector<1x6xi32> to vector<1x6xi32>
    %730 = vector.broadcast %729 : vector<1x6xi32> to vector<8x6xi32>
    %731 = arith.select %728, %730, %709 : vector<8x6xi1>, vector<8x6xi32>
    %732 = arith.index_cast %c1_i32_138 : i32 to index
    %c0_143 = arith.constant 0 : index
    %733 = vector.load %arg11[%732, %c0_143] : memref<8x6xf32, #tpu.memory_space<vmem>>, vector<1x6xf32>
    %734 = arith.addf %718, %733 : vector<1x6xf32>
    %c2_i32_144 = arith.constant 2 : i32
    %735 = vector.broadcast %734 : vector<1x6xf32> to vector<6x6xf32>
    %736 = arith.mulf %683, %735 : vector<6x6xf32>
    %cst_145 = arith.constant dense<0.000000e+00> : vector<6x6xf32>
    %737 = tpu.matmul %736, %684, %cst_145 {dimension_numbers = #tpu.dot_dimension_numbers<[1], [0], [0], [1], [0, 0, 1, 1], [], []>} : vector<6x6xf32>, vector<6x6xf32>, vector<6x6xf32> -> vector<6x6xf32>
    %738 = arith.addf %737, %677 : vector<6x6xf32>
    %cst_146 = arith.constant dense<0xFF800000> : vector<6xf32>
    %739 = vector.multi_reduction <maximumf>, %738, %cst_146 [0] : vector<6x6xf32> to vector<6xf32>
    %740 = vector.shape_cast %739 : vector<6xf32> to vector<1x6xf32>
    %741 = vector.broadcast %740 : vector<1x6xf32> to vector<6x6xf32>
    %742 = arith.cmpf oeq, %738, %741 : vector<6x6xf32>
    %c6_i32_147 = arith.constant 6 : i32
    %743 = vector.broadcast %c6_i32_147 : i32 to vector<6x6xi32>
    %744 = arith.select %742, %679, %743 : vector<6x6xi1>, vector<6x6xi32>
    %cst_148 = arith.constant dense<2147483647> : vector<6xi32>
    %745 = vector.multi_reduction <minsi>, %744, %cst_148 [0] : vector<6x6xi32> to vector<6xi32>
    %746 = vector.shape_cast %745 : vector<6xi32> to vector<1x6xi32>
    %747 = vector.broadcast %c2_i32_144 : i32 to vector<8x1xi32>
    %748 = arith.cmpi eq, %19, %747 : vector<8x1xi32>
    %749 = vector.shape_cast %748 : vector<8x1xi1> to vector<8x1xi1>
    %750 = vector.broadcast %749 : vector<8x1xi1> to vector<8x6xi1>
    %751 = vector.shape_cast %746 : vector<1x6xi32> to vector<1x6xi32>
    %752 = vector.broadcast %751 : vector<1x6xi32> to vector<8x6xi32>
    %753 = arith.select %750, %752, %731 : vector<8x6xi1>, vector<8x6xi32>
    %754 = arith.index_cast %c2_i32_144 : i32 to index
    %c0_149 = arith.constant 0 : index
    %755 = vector.load %arg11[%754, %c0_149] : memref<8x6xf32, #tpu.memory_space<vmem>>, vector<1x6xf32>
    %756 = arith.addf %740, %755 : vector<1x6xf32>
    %c3_i32_150 = arith.constant 3 : i32
    %757 = vector.broadcast %756 : vector<1x6xf32> to vector<6x6xf32>
    %758 = arith.mulf %683, %757 : vector<6x6xf32>
    %cst_151 = arith.constant dense<0.000000e+00> : vector<6x6xf32>
    %759 = tpu.matmul %758, %684, %cst_151 {dimension_numbers = #tpu.dot_dimension_numbers<[1], [0], [0], [1], [0, 0, 1, 1], [], []>} : vector<6x6xf32>, vector<6x6xf32>, vector<6x6xf32> -> vector<6x6xf32>
    %760 = arith.addf %759, %677 : vector<6x6xf32>
    %cst_152 = arith.constant dense<0xFF800000> : vector<6xf32>
    %761 = vector.multi_reduction <maximumf>, %760, %cst_152 [0] : vector<6x6xf32> to vector<6xf32>
    %762 = vector.shape_cast %761 : vector<6xf32> to vector<1x6xf32>
    %763 = vector.broadcast %762 : vector<1x6xf32> to vector<6x6xf32>
    %764 = arith.cmpf oeq, %760, %763 : vector<6x6xf32>
    %c6_i32_153 = arith.constant 6 : i32
    %765 = vector.broadcast %c6_i32_153 : i32 to vector<6x6xi32>
    %766 = arith.select %764, %679, %765 : vector<6x6xi1>, vector<6x6xi32>
    %cst_154 = arith.constant dense<2147483647> : vector<6xi32>
    %767 = vector.multi_reduction <minsi>, %766, %cst_154 [0] : vector<6x6xi32> to vector<6xi32>
    %768 = vector.shape_cast %767 : vector<6xi32> to vector<1x6xi32>
    %769 = vector.broadcast %c3_i32_150 : i32 to vector<8x1xi32>
    %770 = arith.cmpi eq, %19, %769 : vector<8x1xi32>
    %771 = vector.shape_cast %770 : vector<8x1xi1> to vector<8x1xi1>
    %772 = vector.broadcast %771 : vector<8x1xi1> to vector<8x6xi1>
    %773 = vector.shape_cast %768 : vector<1x6xi32> to vector<1x6xi32>
    %774 = vector.broadcast %773 : vector<1x6xi32> to vector<8x6xi32>
    %775 = arith.select %772, %774, %753 : vector<8x6xi1>, vector<8x6xi32>
    %776 = arith.index_cast %c3_i32_150 : i32 to index
    %c0_155 = arith.constant 0 : index
    %777 = vector.load %arg11[%776, %c0_155] : memref<8x6xf32, #tpu.memory_space<vmem>>, vector<1x6xf32>
    %778 = arith.addf %762, %777 : vector<1x6xf32>
    %c4_i32_156 = arith.constant 4 : i32
    %779 = vector.broadcast %778 : vector<1x6xf32> to vector<6x6xf32>
    %780 = arith.mulf %683, %779 : vector<6x6xf32>
    %cst_157 = arith.constant dense<0.000000e+00> : vector<6x6xf32>
    %781 = tpu.matmul %780, %684, %cst_157 {dimension_numbers = #tpu.dot_dimension_numbers<[1], [0], [0], [1], [0, 0, 1, 1], [], []>} : vector<6x6xf32>, vector<6x6xf32>, vector<6x6xf32> -> vector<6x6xf32>
    %782 = arith.addf %781, %677 : vector<6x6xf32>
    %cst_158 = arith.constant dense<0xFF800000> : vector<6xf32>
    %783 = vector.multi_reduction <maximumf>, %782, %cst_158 [0] : vector<6x6xf32> to vector<6xf32>
    %784 = vector.shape_cast %783 : vector<6xf32> to vector<1x6xf32>
    %785 = vector.broadcast %784 : vector<1x6xf32> to vector<6x6xf32>
    %786 = arith.cmpf oeq, %782, %785 : vector<6x6xf32>
    %c6_i32_159 = arith.constant 6 : i32
    %787 = vector.broadcast %c6_i32_159 : i32 to vector<6x6xi32>
    %788 = arith.select %786, %679, %787 : vector<6x6xi1>, vector<6x6xi32>
    %cst_160 = arith.constant dense<2147483647> : vector<6xi32>
    %789 = vector.multi_reduction <minsi>, %788, %cst_160 [0] : vector<6x6xi32> to vector<6xi32>
    %790 = vector.shape_cast %789 : vector<6xi32> to vector<1x6xi32>
    %791 = vector.broadcast %c4_i32_156 : i32 to vector<8x1xi32>
    %792 = arith.cmpi eq, %19, %791 : vector<8x1xi32>
    %793 = vector.shape_cast %792 : vector<8x1xi1> to vector<8x1xi1>
    %794 = vector.broadcast %793 : vector<8x1xi1> to vector<8x6xi1>
    %795 = vector.shape_cast %790 : vector<1x6xi32> to vector<1x6xi32>
    %796 = vector.broadcast %795 : vector<1x6xi32> to vector<8x6xi32>
    %797 = arith.select %794, %796, %775 : vector<8x6xi1>, vector<8x6xi32>
    %798 = arith.index_cast %c4_i32_156 : i32 to index
    %c0_161 = arith.constant 0 : index
    %799 = vector.load %arg11[%798, %c0_161] : memref<8x6xf32, #tpu.memory_space<vmem>>, vector<1x6xf32>
    %800 = arith.addf %784, %799 : vector<1x6xf32>
    %c5_i32_162 = arith.constant 5 : i32
    %801 = vector.broadcast %800 : vector<1x6xf32> to vector<6x6xf32>
    %802 = arith.mulf %683, %801 : vector<6x6xf32>
    %cst_163 = arith.constant dense<0.000000e+00> : vector<6x6xf32>
    %803 = tpu.matmul %802, %684, %cst_163 {dimension_numbers = #tpu.dot_dimension_numbers<[1], [0], [0], [1], [0, 0, 1, 1], [], []>} : vector<6x6xf32>, vector<6x6xf32>, vector<6x6xf32> -> vector<6x6xf32>
    %804 = arith.addf %803, %677 : vector<6x6xf32>
    %cst_164 = arith.constant dense<0xFF800000> : vector<6xf32>
    %805 = vector.multi_reduction <maximumf>, %804, %cst_164 [0] : vector<6x6xf32> to vector<6xf32>
    %806 = vector.shape_cast %805 : vector<6xf32> to vector<1x6xf32>
    %807 = vector.broadcast %806 : vector<1x6xf32> to vector<6x6xf32>
    %808 = arith.cmpf oeq, %804, %807 : vector<6x6xf32>
    %c6_i32_165 = arith.constant 6 : i32
    %809 = vector.broadcast %c6_i32_165 : i32 to vector<6x6xi32>
    %810 = arith.select %808, %679, %809 : vector<6x6xi1>, vector<6x6xi32>
    %cst_166 = arith.constant dense<2147483647> : vector<6xi32>
    %811 = vector.multi_reduction <minsi>, %810, %cst_166 [0] : vector<6x6xi32> to vector<6xi32>
    %812 = vector.shape_cast %811 : vector<6xi32> to vector<1x6xi32>
    %813 = vector.broadcast %c5_i32_162 : i32 to vector<8x1xi32>
    %814 = arith.cmpi eq, %19, %813 : vector<8x1xi32>
    %815 = vector.shape_cast %814 : vector<8x1xi1> to vector<8x1xi1>
    %816 = vector.broadcast %815 : vector<8x1xi1> to vector<8x6xi1>
    %817 = vector.shape_cast %812 : vector<1x6xi32> to vector<1x6xi32>
    %818 = vector.broadcast %817 : vector<1x6xi32> to vector<8x6xi32>
    %819 = arith.select %816, %818, %797 : vector<8x6xi1>, vector<8x6xi32>
    %820 = arith.index_cast %c5_i32_162 : i32 to index
    %c0_167 = arith.constant 0 : index
    %821 = vector.load %arg11[%820, %c0_167] : memref<8x6xf32, #tpu.memory_space<vmem>>, vector<1x6xf32>
    %822 = arith.addf %806, %821 : vector<1x6xf32>
    %c6_i32_168 = arith.constant 6 : i32
    %823 = vector.broadcast %822 : vector<1x6xf32> to vector<6x6xf32>
    %824 = arith.mulf %683, %823 : vector<6x6xf32>
    %cst_169 = arith.constant dense<0.000000e+00> : vector<6x6xf32>
    %825 = tpu.matmul %824, %684, %cst_169 {dimension_numbers = #tpu.dot_dimension_numbers<[1], [0], [0], [1], [0, 0, 1, 1], [], []>} : vector<6x6xf32>, vector<6x6xf32>, vector<6x6xf32> -> vector<6x6xf32>
    %826 = arith.addf %825, %677 : vector<6x6xf32>
    %cst_170 = arith.constant dense<0xFF800000> : vector<6xf32>
    %827 = vector.multi_reduction <maximumf>, %826, %cst_170 [0] : vector<6x6xf32> to vector<6xf32>
    %828 = vector.shape_cast %827 : vector<6xf32> to vector<1x6xf32>
    %829 = vector.broadcast %828 : vector<1x6xf32> to vector<6x6xf32>
    %830 = arith.cmpf oeq, %826, %829 : vector<6x6xf32>
    %c6_i32_171 = arith.constant 6 : i32
    %831 = vector.broadcast %c6_i32_171 : i32 to vector<6x6xi32>
    %832 = arith.select %830, %679, %831 : vector<6x6xi1>, vector<6x6xi32>
    %cst_172 = arith.constant dense<2147483647> : vector<6xi32>
    %833 = vector.multi_reduction <minsi>, %832, %cst_172 [0] : vector<6x6xi32> to vector<6xi32>
    %834 = vector.shape_cast %833 : vector<6xi32> to vector<1x6xi32>
    %835 = vector.broadcast %c6_i32_168 : i32 to vector<8x1xi32>
    %836 = arith.cmpi eq, %19, %835 : vector<8x1xi32>
    %837 = vector.shape_cast %836 : vector<8x1xi1> to vector<8x1xi1>
    %838 = vector.broadcast %837 : vector<8x1xi1> to vector<8x6xi1>
    %839 = vector.shape_cast %834 : vector<1x6xi32> to vector<1x6xi32>
    %840 = vector.broadcast %839 : vector<1x6xi32> to vector<8x6xi32>
    %841 = arith.select %838, %840, %819 : vector<8x6xi1>, vector<8x6xi32>
    %842 = arith.index_cast %c6_i32_168 : i32 to index
    %c0_173 = arith.constant 0 : index
    %843 = vector.load %arg11[%842, %c0_173] : memref<8x6xf32, #tpu.memory_space<vmem>>, vector<1x6xf32>
    %844 = arith.addf %828, %843 : vector<1x6xf32>
    %c7_i32_174 = arith.constant 7 : i32
    %845 = vector.broadcast %844 : vector<1x6xf32> to vector<6x6xf32>
    %846 = arith.mulf %683, %845 : vector<6x6xf32>
    %cst_175 = arith.constant dense<0.000000e+00> : vector<6x6xf32>
    %847 = tpu.matmul %846, %684, %cst_175 {dimension_numbers = #tpu.dot_dimension_numbers<[1], [0], [0], [1], [0, 0, 1, 1], [], []>} : vector<6x6xf32>, vector<6x6xf32>, vector<6x6xf32> -> vector<6x6xf32>
    %848 = arith.addf %847, %677 : vector<6x6xf32>
    %cst_176 = arith.constant dense<0xFF800000> : vector<6xf32>
    %849 = vector.multi_reduction <maximumf>, %848, %cst_176 [0] : vector<6x6xf32> to vector<6xf32>
    %850 = vector.shape_cast %849 : vector<6xf32> to vector<1x6xf32>
    %851 = vector.broadcast %850 : vector<1x6xf32> to vector<6x6xf32>
    %852 = arith.cmpf oeq, %848, %851 : vector<6x6xf32>
    %c6_i32_177 = arith.constant 6 : i32
    %853 = vector.broadcast %c6_i32_177 : i32 to vector<6x6xi32>
    %854 = arith.select %852, %679, %853 : vector<6x6xi1>, vector<6x6xi32>
    %cst_178 = arith.constant dense<2147483647> : vector<6xi32>
    %855 = vector.multi_reduction <minsi>, %854, %cst_178 [0] : vector<6x6xi32> to vector<6xi32>
    %856 = vector.shape_cast %855 : vector<6xi32> to vector<1x6xi32>
    %857 = vector.broadcast %c7_i32_174 : i32 to vector<8x1xi32>
    %858 = arith.cmpi eq, %19, %857 : vector<8x1xi32>
    %859 = vector.shape_cast %858 : vector<8x1xi1> to vector<8x1xi1>
    %860 = vector.broadcast %859 : vector<8x1xi1> to vector<8x6xi1>
    %861 = vector.shape_cast %856 : vector<1x6xi32> to vector<1x6xi32>
    %862 = vector.broadcast %861 : vector<1x6xi32> to vector<8x6xi32>
    %863 = arith.select %860, %862, %841 : vector<8x6xi1>, vector<8x6xi32>
    %864 = arith.index_cast %c7_i32_174 : i32 to index
    %c0_179 = arith.constant 0 : index
    %865 = vector.load %arg11[%864, %c0_179] : memref<8x6xf32, #tpu.memory_space<vmem>>, vector<1x6xf32>
    %866 = arith.addf %850, %865 : vector<1x6xf32>
    %c8_i32_180 = arith.constant 8 : i32
    %c0_181 = arith.constant 0 : index
    %c0_182 = arith.constant 0 : index
    %867 = vector.load %arg12[%c0_181, %c0_182] : memref<8x6xi32, #tpu.memory_space<vmem>>, vector<8x6xi32>
    tpu.vector_store %arg12[%c0_181, %c0_182], %863 {strides = array<i32>} : memref<8x6xi32, #tpu.memory_space<vmem>>, vector<8x6xi32>,
    %c0_183 = arith.constant 0 : index
    %c0_184 = arith.constant 0 : index
    %868 = vector.load %arg10[%c0_183, %c0_184] : memref<1x6xf32, #tpu.memory_space<vmem>>, vector<1x6xf32>
    %869 = arith.addf %866, %868 : vector<1x6xf32>
    %c0_185 = arith.constant 0 : index
    %c0_186 = arith.constant 0 : index
    %870 = vector.load %arg13[%c0_185, %c0_186] : memref<1x6xf32, #tpu.memory_space<vmem>>, vector<1x6xf32>
    tpu.vector_store %arg13[%c0_185, %c0_186], %869 {strides = array<i32>} : memref<1x6xf32, #tpu.memory_space<vmem>>, vector<1x6xf32>,
    return
  }
}

</mosaic_0001>

<bundles_post_ra>
// kernel: tpu_custom_call.1
= control target key start
LH: loop header
LB: loop body
LE: loop exit
PB: predicated region body
PF: predicated region fallthrough
CT: control target
= control target key end

     0   :  { %19 = vsyncpa [#allocation4], 0  ;;  %s2794_s0 = inlined_call_operand.vmem [shape: f32[8,32], index: 0, kind: input, shape index: {}]   ;;  %s2795_s1 = inlined_call_operand.vmem [shape: f32[32,128], index: 1, kind: input, shape index: {}]   ;;  %s2796_s2 = inlined_call_operand.hbm [shape: f32[32,128], index: 2, kind: input, shape index: {}]   ;;  %s2797_s3 = inlined_call_operand.hbm [shape: f32[1,128], index: 3, kind: input, shape index: {}]   ;;  %s2798_s4 = inlined_call_operand.hbm [shape: f32[32,128], index: 4, kind: input, shape index: {}]   ;;  %s2799_s5 = inlined_call_operand.hbm [shape: f32[32,128], index: 5, kind: input, shape index: {}]   ;;  %s2800_s6 = inlined_call_operand.hbm [shape: f32[1,128], index: 6, kind: input, shape index: {}]   ;;  %s2801_s7 = inlined_call_operand.vmem [shape: f32[32,6], index: 7, kind: input, shape index: {}]   ;;  %s2802_s8 = inlined_call_operand.hbm [shape: f32[1,6], index: 8, kind: input, shape index: {}]   ;;  %s2803_s9 = inlined_call_operand.vmem [shape: f32[6,6], index: 9, kind: input, shape index: {}]   ;;  %s2804_s10 = inlined_call_operand.vmem [shape: f32[1,6], index: 10, kind: input, shape index: {}]   ;;  %s2805_s11 = inlined_call_operand.hbm [shape: f32[8,6], index: 11, kind: output, shape index: {0}]   ;;  %s2806_s12 = inlined_call_operand.hbm [shape: s32[8,6], index: 12, kind: output, shape index: {1}]   ;;  %s2807_s13 = inlined_call_operand.hbm [shape: f32[1,6], index: 13, kind: output, shape index: {2}]  }
   0x1   :  { %20 = vsyncpa [#allocation7], 0 }
   0x2   :  { %21 = vsyncpa [#allocation10], 0 }
   0x3   :  { %22 = vsyncpa [#allocation13], 0 }
   0x4   :  { %23 = vsyncpa [#allocation5], 0  ;;  %s47_s27 = sshll.u32 %s2797_s3, 4  ;;  %s48_s27 = int_to_ptr.hbm [resolvable:$true] %s47_s27 }
   0x5   :  { %24 = vsyncpa [#allocation16], 0  ;;  %s2287_s28 = smov [#allocation6]   ;;  %s70_s15 = sshll.u32 %s2799_s5, 4  ;;  %s71_s15 = int_to_ptr.hbm [resolvable:$true] %s70_s15 }
   0x6   :  { %s49_s29 = sshll.u32 %s2287_s28, 4  ;;  %s2288_s16 = smov [#allocation9]   ;;  %s50_s29 = int_to_ptr.vmem [resolvable:$true] %s49_s29 }
   0x7   :  { %52 = dma.hbm_to_vmem [thread:$0]  %s48_s27, 16, %s50_s29, [#allocation7]  }
   0x8   :  { %s72_s17 = sshll.u32 %s2288_s16, 4  ;;  %s33_s20 = sshll.u32 %s2796_s2, 4  ;;  %s73_s17 = int_to_ptr.vmem [resolvable:$true] %s72_s17  ;;  %s34_s20 = int_to_ptr.hbm [resolvable:$true] %s33_s20 }
   0x9   :  { %s2289_s3 = smov 128   ;;  %s2290_s21 = smov 8  }
   0xa   :  { %78 = dma.hbm_to_vmem [thread:$0]  %s71_s15, 512, %s73_s17, [#allocation10], %s2289_s3, %s2289_s3, %s2290_s21  }
   0xb   :  { %s57_s24 = sshll.u32 %s2798_s4, 4  ;;  %s2291_s25 = smov [#allocation3]   ;;  %s58_s24 = int_to_ptr.hbm [resolvable:$true] %s57_s24 }
   0xc   :  { %s35_s26 = sshll.u32 %s2291_s25, 4  ;;  %s2292_s5 = smov [#allocation8]   ;;  %s36_s26 = int_to_ptr.vmem [resolvable:$true] %s35_s26 }
   0xd   :  { %41 = dma.hbm_to_vmem [thread:$0]  %s34_s20, 512, %s36_s26, [#allocation4], %s2289_s3, %s2289_s3, %s2290_s21  }
   0xe   :  { %s59_s27 = sshll.u32 %s2292_s5, 4  ;;  %s84_s2 = sshll.u32 %s2800_s6, 4  ;;  %s60_s27 = int_to_ptr.vmem [resolvable:$true] %s59_s27  ;;  %s85_s2 = int_to_ptr.hbm [resolvable:$true] %s84_s2 }
   0xf   :  { %65 = dma.hbm_to_vmem [thread:$0]  %s58_s24, 512, %s60_s27, [#allocation7], %s2289_s3, %s2289_s3, %s2290_s21  }
  0x10   :  { %s97_s15 = sshll.u32 %s2802_s8, 4  ;;  %s2293_s16 = smov [#allocation11]   ;;  %s98_s15 = int_to_ptr.hbm [resolvable:$true] %s97_s15 }
  0x11   :  { %s86_s4 = sshll.u32 %s2293_s16, 4  ;;  %s2294_s17 = smov [#allocation12]   ;;  %s87_s4 = int_to_ptr.vmem [resolvable:$true] %s86_s4 }
  0x12   :  { %89 = dma.hbm_to_vmem [thread:$0]  %s85_s2, 16, %s87_s4, [#allocation10]  }
  0x13   :  { %s99_s18 = sshll.u32 %s2294_s17, 4  ;;  %s100_s18 = int_to_ptr.vmem [resolvable:$true] %s99_s18 }
  0x14   :  { %102 = dma.hbm_to_vmem [thread:$0]  %s98_s15, 16, %s100_s18, [#allocation13]  }
  0x15   :  { %2275 = dma.done.wait [#allocation4], 512  }
  0x16   :  { %2276 = vsyncadd [#allocation4], 4294966784 }
  0x17   :  { %2277 = dma.done.wait [#allocation7], 528  }
  0x18   :  { %2278 = vsyncadd [#allocation7], 4294966768 }
  0x19   :  { %2279 = dma.done.wait [#allocation10], 528  }
  0x1a   :  { %2280 = vsyncadd [#allocation10], 4294966768 }
  0x1b   :  { %2281 = dma.done.wait [#allocation13], 16  }
  0x1c   :  { %2282 = vsyncadd [#allocation13], 4294967280  ;;  %v151_v0 = vld [vmem:[%s2795_s1 + $0x18] sm:$0xff]  ;;  %v150_v1 = vld [vmem:[%s2795_s1 + $0x10] sm:$0xff]  ;;  %vm157_vm0 = vcmask 261120   ;;  %v2295_v9 = vmov 0.0   ;;  %v131_v10 = vlaneseq }
  0x1d   :  { %173 = vmatpush.msra.mxu0 %v151_v0  ;;  %v185_v2 = vld [vmem:[#allocation3 + $0x18] sm:$0xff]  ;;  %v149_v3 = vld [vmem:[%s2795_s1 + $0x8] sm:$0xff]  ;;  %v184_v4 = vld [vmem:[#allocation3 + $0x10] sm:$0xff]  ;;  %s2298_s26 = smov 16   ;;  %s1815_s6 = sshll.u32 %s2805_s11, 4  ;;  %s1816_s6 = int_to_ptr.hbm [resolvable:$true] %s1815_s6 }
  0x1e   :  { %204 = vmatpush.msra.mxu1 %v185_v2  ;;  %279 = vmatpush.msra.mxu2 %v185_v2  ;;  %v183_v5 = vld [vmem:[#allocation3 + $0x8] sm:$0xff]  ;;  %v148_v6 = vld [vmem:[%s2795_s1] sm:$0xff]  ;;  %v182_v8 = vld [vmem:[#allocation3] sm:$0xff]  ;;  %v2410_v12 = vand.u32 127, %v131_v10  ;;  %s2297_s1 = smov 32   ;;  %s2302_s11 = smov [#allocation15]  }
  0x1f   :  { %174 = vmatpush.msra.mxu0 %v150_v1  ;;  %354 = vmatpush.msra.mxu3 %v185_v2  ;;  %v152_v7 = vld [vmem:[%s2794_s0] sm:$0xff]  ;;  %v1928_v11 = vld [vmem:[#allocation6] ss:$0 sm:$0xff]  ;;  %s2296_s0 = smov 64   ;;  %s1824_s20 = sshll.u32 %s2302_s11, 4  ;;  %s1825_s20 = int_to_ptr.vmem [resolvable:$true] %s1824_s20 }
  0x20   :  { %205 = vmatpush.msra.mxu1 %v184_v4  ;;  %280 = vmatpush.msra.mxu2 %v184_v4  ;;  %v137_v15 = vand.u32 31, %v2410_v12  ;;  %s1826_s21 = sshll.u32 %s2806_s12, 4  ;;  %s2303_s22 = smov [#allocation17]   ;;  %s1827_s21 = int_to_ptr.hbm [resolvable:$true] %s1826_s21 }
  0x21   :  { %175 = vmatpush.msra.mxu0 %v149_v3  ;;  %355 = vmatpush.msra.mxu3 %v184_v4  ;;  %s1835_s23 = sshll.u32 %s2303_s22, 4  ;;  %s1836_s23 = int_to_ptr.vmem [resolvable:$true] %s1835_s23 }
  0x22   :  { %206 = vmatpush.msra.mxu1 %v183_v5  ;;  %281 = vmatpush.msra.mxu2 %v183_v5  ;;  %vm2413_vm1 = vcmp.lt.s32.totalorder %v137_v15, 16 }
  0x23   :  { %176 = vmatpush.msra.mxu0 %v148_v6  ;;  %356 = vmatpush.msra.mxu3 %v183_v5  ;;  %v2442_v6 = vshrl.u32 %v131_v10, 7 }
  0x24   :  { %1859 = vmatmul.msk.f32.vlgmr.msra.gmra.mxu0 %vm157_vm0, %v152_v7  ;;  %207 = vmatpush.msra.mxu1 %v182_v8 }
  0x25   :  { %208 = vmatmul.f32.vlgmr.msra.gmra.mxu1 %v2295_v9  ;;  %282 = vmatpush.msra.mxu2 %v182_v8  ;;  %vm250_vm10 = vcmp.eq.s32.totalorder %v2442_v6, 0  ;;  %vm255_vm11 = vcmp.eq.s32.totalorder %v2442_v6, 7  ;;  %vm325_vm12 = vcmp.eq.s32.totalorder %v2442_v6, 1  ;;  %vm330_vm13 = vcmp.eq.s32.totalorder %v2442_v6, 6 }
  0x26   :  { %357 = vmatpush.msra.mxu3 %v182_v8  ;;  %429 = vmatpush.msrb.mxu0 %v185_v2 }
  0x27   :  { %502 = vmatpush.msrb.mxu1 %v185_v2  ;;  %569 = vmatpush.msrb.mxu2 %v185_v2 }
  0x28   :  { %430 = vmatpush.msrb.mxu0 %v184_v4  ;;  %636 = vmatpush.msrb.mxu3 %v185_v2 }
  0x29   :  { %503 = vmatpush.msrb.mxu1 %v184_v4  ;;  %570 = vmatpush.msrb.mxu2 %v184_v4 }
  0x2a   :  { %431 = vmatpush.msrb.mxu0 %v183_v5  ;;  %637 = vmatpush.msrb.mxu3 %v184_v4 }
  0x2b   :  { %504 = vmatpush.msrb.mxu1 %v183_v5  ;;  %571 = vmatpush.msrb.mxu2 %v183_v5 }
  0x2c   :  { %432 = vmatpush.msrb.mxu0 %v182_v8  ;;  %638 = vmatpush.msrb.mxu3 %v183_v5 }
  0x2d   :  { %505 = vmatpush.msrb.mxu1 %v182_v8  ;;  %572 = vmatpush.msrb.mxu2 %v182_v8 }
  0x2e   :  { %639 = vmatpush.msrb.mxu3 %v182_v8  ;;  %703 = vmatpush.msra.mxu0 %v185_v2 }
  0x30   :  { %704 = vmatpush.msra.mxu0 %v184_v4 }
  0x32   :  { %705 = vmatpush.msra.mxu0 %v183_v5 }
  0x34   :  { %706 = vmatpush.msra.mxu0 %v182_v8 }
  0xa1   :  { %v178_v13 = vpop.f32.mrf.mxu0 }
  0xa2   :  { %v179_v14 = vadd.f32 %v1928_v11, %v178_v13  ;;  %v209_v17 = vpop.f32.mrf.mxu1 }
  0xa4   :  { %181 = vst [vmem:[#allocation2] sm:$0xff] %v179_v14 }
  0xab   :  { %v2417_v18 = vld [vmem:[#allocation2] sm:$0x1]  ;;  %v2419_v19 = vld [vmem:[#allocation2 + $0x7] sm:$0x1]  ;;  %v2430_v45 = vld [vmem:[#allocation2 + $0x1] sm:$0x1] }
  0xac   :  { %v188_v20 = vsel %vm2413_vm1, %v2417_v18, %v2419_v19  ;;  %v2432_v46 = vld [vmem:[#allocation2 + $0x6] sm:$0x1] }
  0xad   :  { %v212_v21 = vadd.f32 %v209_v17, %v188_v20  ;;  %v261_v47 = vsel %vm2413_vm1, %v2430_v45, %v2432_v46 }
  0xaf   :  { %1931 = vtanh.f32 %v212_v21  ;;  %v1860_v23 = vmul.f32 -1.442695, %v212_v21  ;;  %v2458_v21 = vld [vmem:[#allocation2 + $0x2] sm:$0x1] }
  0xb1   :  { %1933 = vpow2.f32 %v1860_v23 }
  0xb5   :  { %v1932_v22 = vpop.eup %1931 }
  0xb6   :  { %235 = vrot.lane.b32.xlu0 %v1932_v22, %s2296_s0  ;;  %v2460_v22 = vld [vmem:[#allocation2 + $0x5] sm:$0x1] }
  0xb7   :  { %v1934_v24 = vpop.eup %1933  ;;  %v336_v23 = vsel %vm2413_vm1, %v2458_v21, %v2460_v22 }
  0xb8   :  { %v216_v25 = vadd.f32 1.0, %v1934_v24 }
  0xba   :  { %1935 = vrcp.f32 %v216_v25  ;;  %v228_v31 = vand.u32 2147483648, %v216_v25  ;;  %vm222_vm3 = vweird.f32 %v216_v25  ;;  %v226_v32 = vand.u32 2147483647, %v216_v25 }
  0xbc   :  { %v229_v34 = vor.u32 1.1754944e-38, %v228_v31  ;;  %vm227_vm5 = vcmp.eq.f32.partialorder %v226_v32, 8.507059e+37 }
  0xc0   :  { %v1936_v26 = vpop.eup %1935 }
  0xc1   :  { %v218_v27 = vmul.f32 %v1936_v26, %v216_v25  ;;  %vm223_vm2 = vweird.f32 %v1936_v26 }
  0xc2   :  { %vm224_vm4 = vmor %vm222_vm3, %vm223_vm2 }
  0xc3   :  { %v219_v28 = vsub.f32 1.0, %v218_v27 }
  0xc5   :  { %v220_v29 = vmul.f32 %v1936_v26, %v219_v28 }
  0xc7   :  { %v221_v30 = vadd.f32 %v1936_v26, %v220_v29 }
  0xc9   :  { %v225_v33 = vsel %vm224_vm4, %v1936_v26, %v221_v30  ;;  %vm400_vm4 = vcmp.eq.s32.totalorder %v2442_v6, 2 }
  0xca   :  { %v230_v36 = vsel %vm227_vm5, %v229_v34, %v225_v33  ;;  %vm405_vm5 = vcmp.eq.s32.totalorder %v2442_v6, 5 }
  0xcb   :  { %v233_v38 = vmul.f32 0.0, %v230_v36 }
 0x128   :  { %v236_v35 = vpop.permute.xlu0 %235 }
 0x129   :  { %v238_v37 = vmul.f32 %v236_v35, %v230_v36 }
 0x12b   :  { %240 = vrot.lane.b32.xlu0 %v238_v37, %s2297_s1 }
 0x19d   :  { %v241_v39 = vpop.permute.xlu0 %240 }
 0x19e   :  { %v243_v40 = vadd.f32 %v241_v39, %v233_v38 }
 0x1a0   :  { %1937 = vtanh.f32 %v243_v40 }
 0x1a6   :  { %v1938_v41 = vpop.eup %1937 }
 0x1a7   :  { %246 = vrot.lane.b32.xlu1 %v1938_v41, %s2296_s0 }
 0x219   :  { %v247_v42 = vpop.permute.xlu1 %246 }
 0x21a   :  { %v249_v43 = vmul.f32 %v247_v42, %v230_v36 }
 0x21c   :  { %263 = vrot.lane.b32.xlu1 %v249_v43, %s2297_s1  ;;  %v253_v7 = vperm.slane %v249_v43, 0 }
 0x21e   :  { %v254_v14 = vsel %vm250_vm10, %v253_v7, 0.0  ;;  %v258_v10 = vsel %vm255_vm11, %v253_v7, 0.0 }
 0x28e   :  { %v264_v44 = vpop.permute.xlu1 %263 }
 0x28f   :  { %1861 = vmatmul.msk.f32.vlgmr.msra.gmra.mxu2 %vm157_vm0, %v264_v44 }
 0x312   :  { %v284_v48 = vpop.f32.mrf.mxu2 }
 0x313   :  { %v287_v49 = vadd.f32 %v284_v48, %v261_v47 }
 0x315   :  { %1939 = vtanh.f32 %v287_v49  ;;  %v1862_v51 = vmul.f32 -1.442695, %v287_v49 }
 0x317   :  { %1941 = vpow2.f32 %v1862_v51 }
 0x31b   :  { %v1940_v50 = vpop.eup %1939 }
 0x31c   :  { %310 = vrot.lane.b32.xlu2 %v1940_v50, %s2296_s0 }
 0x31d   :  { %v1942_v52 = vpop.eup %1941 }
 0x31e   :  { %v291_v53 = vadd.f32 1.0, %v1942_v52 }
 0x320   :  { %1943 = vrcp.f32 %v291_v53  ;;  %v303_v59 = vand.u32 2147483648, %v291_v53  ;;  %vm297_vm7 = vweird.f32 %v291_v53  ;;  %v301_v60 = vand.u32 2147483647, %v291_v53 }
 0x322   :  { %v304_v62 = vor.u32 1.1754944e-38, %v303_v59  ;;  %vm302_vm9 = vcmp.eq.f32.partialorder %v301_v60, 8.507059e+37 }
 0x326   :  { %v1944_v54 = vpop.eup %1943 }
 0x327   :  { %v293_v55 = vmul.f32 %v1944_v54, %v291_v53  ;;  %vm298_vm6 = vweird.f32 %v1944_v54 }
 0x328   :  { %vm299_vm8 = vmor %vm297_vm7, %vm298_vm6 }
 0x329   :  { %v294_v56 = vsub.f32 1.0, %v293_v55  ;;  %v410_v55 = vld [vmem:[#allocation2 + $0x4] sm:$0x1] }
 0x32b   :  { %v295_v57 = vmul.f32 %v1944_v54, %v294_v56 }
 0x32d   :  { %v296_v58 = vadd.f32 %v1944_v54, %v295_v57 }
 0x32f   :  { %v300_v61 = vsel %vm299_vm8, %v1944_v54, %v296_v58  ;;  %v409_v54 = vld [vmem:[#allocation2 + $0x3] sm:$0x1] }
 0x330   :  { %v305_v0 = vsel %vm302_vm9, %v304_v62, %v300_v61  ;;  %v411_v56 = vsel %vm2413_vm1, %v409_v54, %v410_v55 }
 0x331   :  { %v308_v2 = vmul.f32 %v305_v0, %v243_v40 }
 0x376   :  { %v311_v63 = vpop.permute.xlu2 %310 }
 0x377   :  { %v313_v1 = vmul.f32 %v311_v63, %v305_v0 }
 0x379   :  { %315 = vrot.lane.b32.xlu2 %v313_v1, %s2297_s1 }
 0x3d3   :  { %v316_v3 = vpop.permute.xlu2 %315 }
 0x3d4   :  { %v318_v4 = vadd.f32 %v316_v3, %v308_v2 }
 0x3d6   :  { %1945 = vtanh.f32 %v318_v4 }
 0x3dc   :  { %v1946_v5 = vpop.eup %1945 }
 0x3dd   :  { %321 = vrot.lane.b32.xlu0 %v1946_v5, %s2296_s0 }
 0x44f   :  { %v322_v8 = vpop.permute.xlu0 %321 }
 0x450   :  { %v324_v11 = vmul.f32 %v322_v8, %v305_v0 }
 0x452   :  { %v328_v13 = vperm.slane %v324_v11, 0  ;;  %338 = vrot.lane.b32.xlu1 %v324_v11, %s2297_s1 }
 0x454   :  { %v329_v15 = vsel %vm325_vm12, %v328_v13, %v254_v14  ;;  %v333_v17 = vsel %vm330_vm13, %v328_v13, %v258_v10 }
 0x4c4   :  { %v339_v20 = vpop.permute.xlu1 %338 }
 0x4c5   :  { %1863 = vmatmul.msk.f32.vlgmr.msra.gmra.mxu3 %vm157_vm0, %v339_v20 }
 0x548   :  { %v359_v24 = vpop.f32.mrf.mxu3 }
 0x549   :  { %v362_v25 = vadd.f32 %v359_v24, %v336_v23 }
 0x54b   :  { %1947 = vtanh.f32 %v362_v25  ;;  %v1864_v27 = vmul.f32 -1.442695, %v362_v25 }
 0x54d   :  { %1949 = vpow2.f32 %v1864_v27 }
 0x551   :  { %v1948_v26 = vpop.eup %1947 }
 0x552   :  { %385 = vrot.lane.b32.xlu2 %v1948_v26, %s2296_s0 }
 0x553   :  { %v1950_v28 = vpop.eup %1949 }
 0x554   :  { %v366_v29 = vadd.f32 1.0, %v1950_v28 }
 0x556   :  { %1951 = vrcp.f32 %v366_v29  ;;  %v378_v35 = vand.u32 2147483648, %v366_v29  ;;  %vm372_vm15 = vweird.f32 %v366_v29  ;;  %v376_v36 = vand.u32 2147483647, %v366_v29 }
 0x558   :  { %v379_v38 = vor.u32 1.1754944e-38, %v378_v35  ;;  %vm377_vm3 = vcmp.eq.f32.partialorder %v376_v36, 8.507059e+37 }
 0x55c   :  { %v1952_v30 = vpop.eup %1951 }
 0x55d   :  { %v368_v31 = vmul.f32 %v1952_v30, %v366_v29  ;;  %vm373_vm14 = vweird.f32 %v1952_v30  ;;  %v484_v29 = vsel %vm2413_vm1, %v410_v55, %v409_v54 }
 0x55e   :  { %vm374_vm2 = vmor %vm372_vm15, %vm373_vm14  ;;  %vm475_vm14 = vcmp.eq.s32.totalorder %v2442_v6, 3  ;;  %vm480_vm15 = vcmp.eq.s32.totalorder %v2442_v6, 4 }
 0x55f   :  { %v369_v32 = vsub.f32 1.0, %v368_v31 }
 0x561   :  { %v370_v33 = vmul.f32 %v1952_v30, %v369_v32 }
 0x563   :  { %v371_v34 = vadd.f32 %v1952_v30, %v370_v33 }
 0x565   :  { %v375_v37 = vsel %vm374_vm2, %v1952_v30, %v371_v34 }
 0x566   :  { %v380_v40 = vsel %vm377_vm3, %v379_v38, %v375_v37 }
 0x567   :  { %v383_v42 = vmul.f32 %v380_v40, %v318_v4 }
 0x5ac   :  { %v386_v39 = vpop.permute.xlu2 %385 }
 0x5ad   :  { %v388_v41 = vmul.f32 %v386_v39, %v380_v40 }
 0x5af   :  { %390 = vrot.lane.b32.xlu0 %v388_v41, %s2297_s1 }
 0x621   :  { %v391_v43 = vpop.permute.xlu0 %390 }
 0x622   :  { %v393_v44 = vadd.f32 %v391_v43, %v383_v42 }
 0x624   :  { %1953 = vtanh.f32 %v393_v44 }
 0x62a   :  { %v1954_v47 = vpop.eup %1953 }
 0x62b   :  { %396 = vrot.lane.b32.xlu1 %v1954_v47, %s2296_s0 }
 0x69d   :  { %v397_v48 = vpop.permute.xlu1 %396 }
 0x69e   :  { %v399_v49 = vmul.f32 %v397_v48, %v380_v40 }
 0x6a0   :  { %v403_v50 = vperm.slane %v399_v49, 0  ;;  %413 = vrot.lane.b32.xlu2 %v399_v49, %s2297_s1 }
 0x6a2   :  { %v404_v51 = vsel %vm400_vm4, %v403_v50, %v329_v15  ;;  %v408_v52 = vsel %vm405_vm5, %v403_v50, %v333_v17 }
 0x6fa   :  { %v414_v53 = vpop.permute.xlu2 %413 }
 0x6fb   :  { %1865 = vmatmul.msk.f32.vlgmr.msrb.gmra.mxu0 %vm157_vm0, %v414_v53 }
 0x778   :  { %v434_v57 = vpop.f32.mrf.mxu0 }
 0x779   :  { %v437_v58 = vadd.f32 %v434_v57, %v411_v56 }
 0x77b   :  { %1955 = vtanh.f32 %v437_v58  ;;  %v1866_v60 = vmul.f32 -1.442695, %v437_v58 }
 0x77d   :  { %1957 = vpow2.f32 %v1866_v60  ;;  %v551_v60 = vsel %vm2413_vm1, %v2460_v22, %v2458_v21 }
 0x781   :  { %v1956_v59 = vpop.eup %1955 }
 0x782   :  { %460 = vrot.lane.b32.xlu0 %v1956_v59, %s2296_s0 }
 0x783   :  { %v1958_v61 = vpop.eup %1957 }
 0x784   :  { %v441_v62 = vadd.f32 1.0, %v1958_v61 }
 0x786   :  { %1959 = vrcp.f32 %v441_v62  ;;  %v453_v4 = vand.u32 2147483648, %v441_v62  ;;  %vm447_vm7 = vweird.f32 %v441_v62  ;;  %v451_v5 = vand.u32 2147483647, %v441_v62 }
 0x788   :  { %v454_v8 = vor.u32 1.1754944e-38, %v453_v4  ;;  %vm452_vm9 = vcmp.eq.f32.partialorder %v451_v5, 8.507059e+37 }
 0x78c   :  { %v1960_v63 = vpop.eup %1959 }
 0x78d   :  { %v443_v0 = vmul.f32 %v1960_v63, %v441_v62  ;;  %vm448_vm6 = vweird.f32 %v1960_v63 }
 0x78e   :  { %vm449_vm8 = vmor %vm447_vm7, %vm448_vm6 }
 0x78f   :  { %v444_v1 = vsub.f32 1.0, %v443_v0 }
 0x791   :  { %v445_v2 = vmul.f32 %v1960_v63, %v444_v1 }
 0x793   :  { %v446_v3 = vadd.f32 %v1960_v63, %v445_v2 }
 0x795   :  { %v450_v7 = vsel %vm449_vm8, %v1960_v63, %v446_v3 }
 0x796   :  { %v455_v13 = vsel %vm452_vm9, %v454_v8, %v450_v7 }
 0x797   :  { %v458_v10 = vmul.f32 %v455_v13, %v393_v44 }
 0x7f4   :  { %v461_v11 = vpop.permute.xlu0 %460 }
 0x7f5   :  { %v463_v14 = vmul.f32 %v461_v11, %v455_v13 }
 0x7f7   :  { %465 = vrot.lane.b32.xlu1 %v463_v14, %s2297_s1 }
 0x869   :  { %v466_v15 = vpop.permute.xlu1 %465 }
 0x86a   :  { %v468_v17 = vadd.f32 %v466_v15, %v458_v10 }
 0x86c   :  { %1961 = vtanh.f32 %v468_v17 }
 0x872   :  { %v1962_v20 = vpop.eup %1961 }
 0x873   :  { %471 = vrot.lane.b32.xlu2 %v1962_v20, %s2296_s0 }
 0x8cd   :  { %v472_v23 = vpop.permute.xlu2 %471 }
 0x8ce   :  { %v474_v24 = vmul.f32 %v472_v23, %v455_v13 }
 0x8d0   :  { %v478_v25 = vperm.slane %v474_v24, 0  ;;  %486 = vrot.lane.b32.xlu0 %v474_v24, %s2297_s1 }
 0x8d2   :  { %v479_v26 = vsel %vm475_vm14, %v478_v25, %v404_v51  ;;  %v483_v27 = vsel %vm480_vm15, %v478_v25, %v408_v52 }
 0x942   :  { %v487_v28 = vpop.permute.xlu0 %486 }
 0x943   :  { %1867 = vmatmul.msk.f32.vlgmr.msrb.gmra.mxu1 %vm157_vm0, %v487_v28 }
 0x9c0   :  { %v507_v30 = vpop.f32.mrf.mxu1 }
 0x9c1   :  { %v510_v31 = vadd.f32 %v507_v30, %v484_v29 }
 0x9c3   :  { %1963 = vtanh.f32 %v510_v31  ;;  %v1868_v33 = vmul.f32 -1.442695, %v510_v31  ;;  %v618_v31 = vsel %vm2413_vm1, %v2432_v46, %v2430_v45 }
 0x9c5   :  { %1965 = vpow2.f32 %v1868_v33 }
 0x9c9   :  { %v1964_v32 = vpop.eup %1963 }
 0x9ca   :  { %533 = vrot.lane.b32.xlu1 %v1964_v32, %s2296_s0 }
 0x9cb   :  { %v1966_v34 = vpop.eup %1965 }
 0x9cc   :  { %v514_v35 = vadd.f32 1.0, %v1966_v34 }
 0x9ce   :  { %1967 = vrcp.f32 %v514_v35  ;;  %v526_v41 = vand.u32 2147483648, %v514_v35  ;;  %vm520_vm3 = vweird.f32 %v514_v35  ;;  %v524_v42 = vand.u32 2147483647, %v514_v35 }
 0x9d0   :  { %v527_v44 = vor.u32 1.1754944e-38, %v526_v41  ;;  %vm525_vm7 = vcmp.eq.f32.partialorder %v524_v42, 8.507059e+37 }
 0x9d4   :  { %v1968_v36 = vpop.eup %1967 }
 0x9d5   :  { %v516_v37 = vmul.f32 %v1968_v36, %v514_v35  ;;  %vm521_vm2 = vweird.f32 %v1968_v36 }
 0x9d6   :  { %vm522_vm6 = vmor %vm520_vm3, %vm521_vm2 }
 0x9d7   :  { %v517_v38 = vsub.f32 1.0, %v516_v37 }
 0x9d9   :  { %v518_v39 = vmul.f32 %v1968_v36, %v517_v38 }
 0x9db   :  { %v519_v40 = vadd.f32 %v1968_v36, %v518_v39 }
 0x9dd   :  { %v523_v43 = vsel %vm522_vm6, %v1968_v36, %v519_v40 }
 0x9de   :  { %v528_v48 = vsel %vm525_vm7, %v527_v44, %v523_v43 }
 0x9df   :  { %v531_v50 = vmul.f32 %v528_v48, %v468_v17 }
 0xa3c   :  { %v534_v47 = vpop.permute.xlu1 %533 }
 0xa3d   :  { %v536_v49 = vmul.f32 %v534_v47, %v528_v48 }
 0xa3f   :  { %538 = vrot.lane.b32.xlu2 %v536_v49, %s2297_s1 }
 0xa99   :  { %v539_v51 = vpop.permute.xlu2 %538 }
 0xa9a   :  { %v541_v52 = vadd.f32 %v539_v51, %v531_v50 }
 0xa9c   :  { %1969 = vtanh.f32 %v541_v52 }
 0xaa2   :  { %v1970_v53 = vpop.eup %1969 }
 0xaa3   :  { %544 = vrot.lane.b32.xlu0 %v1970_v53, %s2296_s0 }
 0xb15   :  { %v545_v54 = vpop.permute.xlu0 %544 }
 0xb16   :  { %v547_v55 = vmul.f32 %v545_v54, %v528_v48 }
 0xb18   :  { %v548_v56 = vperm.slane %v547_v55, 0  ;;  %553 = vrot.lane.b32.xlu1 %v547_v55, %s2297_s1 }
 0xb1a   :  { %v549_v57 = vsel %vm480_vm15, %v548_v56, %v479_v26  ;;  %v550_v58 = vsel %vm475_vm14, %v548_v56, %v483_v27 }
 0xb8a   :  { %v554_v59 = vpop.permute.xlu1 %553 }
 0xb8b   :  { %1869 = vmatmul.msk.f32.vlgmr.msrb.gmra.mxu2 %vm157_vm0, %v554_v59 }
 0xc0e   :  { %v574_v61 = vpop.f32.mrf.mxu2 }
 0xc0f   :  { %v577_v62 = vadd.f32 %v574_v61, %v551_v60  ;;  %v685_v60 = vsel %vm2413_vm1, %v2419_v19, %v2417_v18 }
 0xc11   :  { %1971 = vtanh.f32 %v577_v62  ;;  %v1870_v0 = vmul.f32 -1.442695, %v577_v62 }
 0xc13   :  { %1973 = vpow2.f32 %v1870_v0 }
 0xc17   :  { %v1972_v63 = vpop.eup %1971 }
 0xc18   :  { %600 = vrot.lane.b32.xlu2 %v1972_v63, %s2296_s0 }
 0xc19   :  { %v1974_v1 = vpop.eup %1973 }
 0xc1a   :  { %v581_v2 = vadd.f32 1.0, %v1974_v1 }
 0xc1c   :  { %1975 = vrcp.f32 %v581_v2  ;;  %v593_v11 = vand.u32 2147483648, %v581_v2  ;;  %vm587_vm9 = vweird.f32 %v581_v2  ;;  %v591_v21 = vand.u32 2147483647, %v581_v2 }
 0xc1e   :  { %v594_v13 = vor.u32 1.1754944e-38, %v593_v11  ;;  %vm592_vm3 = vcmp.eq.f32.partialorder %v591_v21, 8.507059e+37 }
 0xc22   :  { %v1976_v3 = vpop.eup %1975 }
 0xc23   :  { %v583_v4 = vmul.f32 %v1976_v3, %v581_v2  ;;  %vm588_vm8 = vweird.f32 %v1976_v3 }
 0xc24   :  { %vm589_vm2 = vmor %vm587_vm9, %vm588_vm8 }
 0xc25   :  { %v584_v5 = vsub.f32 1.0, %v583_v4 }
 0xc27   :  { %v585_v7 = vmul.f32 %v1976_v3, %v584_v5 }
 0xc29   :  { %v586_v8 = vadd.f32 %v1976_v3, %v585_v7 }
 0xc2b   :  { %v590_v22 = vsel %vm589_vm2, %v1976_v3, %v586_v8 }
 0xc2c   :  { %v595_v10 = vsel %vm592_vm3, %v594_v13, %v590_v22 }
 0xc2d   :  { %v598_v17 = vmul.f32 %v595_v10, %v541_v52 }
 0xc72   :  { %v601_v14 = vpop.permute.xlu2 %600 }
 0xc73   :  { %v603_v15 = vmul.f32 %v601_v14, %v595_v10 }
 0xc75   :  { %605 = vrot.lane.b32.xlu0 %v603_v15, %s2297_s1 }
 0xce7   :  { %v606_v20 = vpop.permute.xlu0 %605 }
 0xce8   :  { %v608_v23 = vadd.f32 %v606_v20, %v598_v17 }
 0xcea   :  { %1977 = vtanh.f32 %v608_v23 }
 0xcf0   :  { %v1978_v24 = vpop.eup %1977 }
 0xcf1   :  { %611 = vrot.lane.b32.xlu1 %v1978_v24, %s2296_s0  ;;  %v754_v24 = vld [vmem:[#allocation8 + $0x10] sm:$0xff] }
 0xd63   :  { %v612_v25 = vpop.permute.xlu1 %611 }
 0xd64   :  { %v614_v26 = vmul.f32 %v612_v25, %v595_v10 }
 0xd66   :  { %v615_v27 = vperm.slane %v614_v26, 0  ;;  %620 = vrot.lane.b32.xlu2 %v614_v26, %s2297_s1 }
 0xd68   :  { %v617_v28 = vsel %vm400_vm4, %v615_v27, %v550_v58  ;;  %v616_v29 = vsel %vm405_vm5, %v615_v27, %v549_v57 }
 0xdc0   :  { %v621_v30 = vpop.permute.xlu2 %620 }
 0xdc1   :  { %1871 = vmatmul.msk.f32.vlgmr.msrb.gmra.mxu3 %vm157_vm0, %v621_v30  ;;  %v753_v30 = vld [vmem:[#allocation8 + $0x8] sm:$0xff] }
 0xdc2   :  { %801 = vmatpush.msra.mxu2 %v753_v30 }
 0xe44   :  { %v641_v32 = vpop.f32.mrf.mxu3 }
 0xe45   :  { %v644_v33 = vadd.f32 %v641_v32, %v618_v31  ;;  %v752_v31 = vld [vmem:[#allocation8] sm:$0xff]  ;;  %v816_v32 = vld [vmem:[#allocation9 + $0x18] sm:$0xff] }
 0xe46   :  { %802 = vmatpush.msra.mxu2 %v752_v31  ;;  %832 = vmatpush.msra.mxu3 %v816_v32 }
 0xe47   :  { %1979 = vtanh.f32 %v644_v33  ;;  %v1872_v35 = vmul.f32 -1.442695, %v644_v33  ;;  %v815_v33 = vld [vmem:[#allocation9 + $0x10] sm:$0xff]  ;;  %901 = vmatpush.msrb.mxu0 %v816_v32 }
 0xe48   :  { %1039 = vmatpush.msrb.mxu2 %v816_v32  ;;  %833 = vmatpush.msra.mxu3 %v815_v33 }
 0xe49   :  { %1981 = vpow2.f32 %v1872_v35  ;;  %902 = vmatpush.msrb.mxu0 %v815_v33  ;;  %v813_v35 = vld [vmem:[#allocation9] sm:$0xff] }
 0xe4a   :  { %1040 = vmatpush.msrb.mxu2 %v815_v33 }
 0xe4d   :  { %v1980_v34 = vpop.eup %1979 }
 0xe4e   :  { %667 = vrot.lane.b32.xlu0 %v1980_v34, %s2296_s0  ;;  %v814_v34 = vld [vmem:[#allocation9 + $0x8] sm:$0xff] }
 0xe4f   :  { %v1982_v36 = vpop.eup %1981  ;;  %834 = vmatpush.msra.mxu3 %v814_v34  ;;  %903 = vmatpush.msrb.mxu0 %v814_v34 }
 0xe50   :  { %v648_v37 = vadd.f32 1.0, %v1982_v36  ;;  %1041 = vmatpush.msrb.mxu2 %v814_v34 }
 0xe51   :  { %835 = vmatpush.msra.mxu3 %v813_v35  ;;  %904 = vmatpush.msrb.mxu0 %v813_v35 }
 0xe52   :  { %1983 = vrcp.f32 %v648_v37  ;;  %v660_v43 = vand.u32 2147483648, %v648_v37  ;;  %vm654_vm7 = vweird.f32 %v648_v37  ;;  %v658_v45 = vand.u32 2147483647, %v648_v37  ;;  %836 = vmatmul.f32.vlgmr.msra.gmra.mxu3 %v2295_v9  ;;  %1042 = vmatpush.msrb.mxu2 %v813_v35 }
 0xe53   :  { %1106 = vmatpush.msrb.mxu3 %v816_v32 }
 0xe54   :  { %v661_v44 = vor.u32 1.1754944e-38, %v660_v43  ;;  %vm659_vm9 = vcmp.eq.f32.partialorder %v658_v45, 8.507059e+37 }
 0xe55   :  { %1107 = vmatpush.msrb.mxu3 %v815_v33 }
 0xe57   :  { %1108 = vmatpush.msrb.mxu3 %v814_v34 }
 0xe58   :  { %v1984_v38 = vpop.eup %1983 }
 0xe59   :  { %v650_v39 = vmul.f32 %v1984_v38, %v648_v37  ;;  %vm655_vm6 = vweird.f32 %v1984_v38  ;;  %1109 = vmatpush.msrb.mxu3 %v813_v35 }
 0xe5a   :  { %vm656_vm8 = vmor %vm654_vm7, %vm655_vm6 }
 0xe5b   :  { %v651_v40 = vsub.f32 1.0, %v650_v39 }
 0xe5d   :  { %v652_v41 = vmul.f32 %v1984_v38, %v651_v40 }
 0xe5f   :  { %v653_v42 = vadd.f32 %v1984_v38, %v652_v41 }
 0xe61   :  { %v657_v46 = vsel %vm656_vm8, %v1984_v38, %v653_v42  ;;  %vm759_vm8 = vcmask 130048   ;;  %v1929_v38 = vld [vmem:[#allocation11] ss:$0 sm:$0xff] }
 0xe62   :  { %v662_v48 = vsel %vm659_vm9, %v661_v44, %v657_v46 }
 0xe63   :  { %v665_v50 = vmul.f32 %v662_v48, %v608_v23  ;;  %v755_v23 = vld [vmem:[#allocation8 + $0x18] sm:$0xff] }
 0xe64   :  { %776 = vmatpush.msra.mxu1 %v755_v23 }
 0xe66   :  { %777 = vmatpush.msra.mxu1 %v754_v24 }
 0xe68   :  { %970 = vmatpush.msrb.mxu1 %v816_v32 }
 0xe6a   :  { %971 = vmatpush.msrb.mxu1 %v815_v33 }
 0xe6c   :  { %972 = vmatpush.msrb.mxu1 %v814_v34 }
 0xe6e   :  { %973 = vmatpush.msrb.mxu1 %v813_v35 }
 0xec0   :  { %v668_v47 = vpop.permute.xlu0 %667 }
 0xec1   :  { %v670_v49 = vmul.f32 %v668_v47, %v662_v48 }
 0xec3   :  { %672 = vrot.lane.b32.xlu1 %v670_v49, %s2297_s1 }
 0xed5   :  { %v837_v43 = vpop.f32.mrf.mxu3 }
 0xf35   :  { %v673_v51 = vpop.permute.xlu1 %672 }
 0xf36   :  { %v675_v52 = vadd.f32 %v673_v51, %v665_v50 }
 0xf38   :  { %1985 = vtanh.f32 %v675_v52 }
 0xf3e   :  { %v1986_v53 = vpop.eup %1985 }
 0xf3f   :  { %678 = vrot.lane.b32.xlu2 %v1986_v53, %s2296_s0 }
 0xf99   :  { %v679_v54 = vpop.permute.xlu2 %678 }
 0xf9a   :  { %v681_v55 = vmul.f32 %v679_v54, %v662_v48 }
 0xf9c   :  { %v682_v56 = vperm.slane %v681_v55, 0  ;;  %687 = vrot.lane.b32.xlu0 %v681_v55, %s2297_s1 }
 0xf9e   :  { %v684_v57 = vsel %vm325_vm12, %v682_v56, %v617_v28  ;;  %v683_v58 = vsel %vm330_vm13, %v682_v56, %v616_v29 }
0x100e   :  { %v688_v59 = vpop.permute.xlu0 %687 }
0x100f   :  { %1873 = vmatmul.msk.f32.vlgmr.msra.gmra.mxu0 %vm157_vm0, %v688_v59 }
0x1010   :  { %1173 = vmatpush.msra.mxu0 %v816_v32 }
0x1012   :  { %1174 = vmatpush.msra.mxu0 %v815_v33 }
0x1014   :  { %1175 = vmatpush.msra.mxu0 %v814_v34 }
0x1016   :  { %1176 = vmatpush.msra.mxu0 %v813_v35 }
0x108c   :  { %v708_v61 = vpop.f32.mrf.mxu0 }
0x108d   :  { %v711_v62 = vadd.f32 %v708_v61, %v685_v60 }
0x108f   :  { %1987 = vtanh.f32 %v711_v62  ;;  %v1874_v0 = vmul.f32 -1.442695, %v711_v62 }
0x1091   :  { %1989 = vpow2.f32 %v1874_v0 }
0x1095   :  { %v1988_v63 = vpop.eup %1987 }
0x1096   :  { %734 = vrot.lane.b32.xlu1 %v1988_v63, %s2296_s0 }
0x1097   :  { %v1990_v1 = vpop.eup %1989 }
0x1098   :  { %v715_v2 = vadd.f32 1.0, %v1990_v1 }
0x109a   :  { %1991 = vrcp.f32 %v715_v2  ;;  %v727_v11 = vand.u32 2147483648, %v715_v2  ;;  %vm721_vm3 = vweird.f32 %v715_v2  ;;  %v725_v18 = vand.u32 2147483647, %v715_v2 }
0x109c   :  { %v728_v21 = vor.u32 1.1754944e-38, %v727_v11  ;;  %vm726_vm7 = vcmp.eq.f32.partialorder %v725_v18, 8.507059e+37 }
0x10a0   :  { %v1992_v3 = vpop.eup %1991 }
0x10a1   :  { %v717_v4 = vmul.f32 %v1992_v3, %v715_v2  ;;  %vm722_vm2 = vweird.f32 %v1992_v3 }
0x10a2   :  { %vm723_vm6 = vmor %vm721_vm3, %vm722_vm2 }
0x10a3   :  { %v718_v5 = vsub.f32 1.0, %v717_v4 }
0x10a5   :  { %v719_v7 = vmul.f32 %v1992_v3, %v718_v5 }
0x10a7   :  { %v720_v8 = vadd.f32 %v1992_v3, %v719_v7 }
0x10a9   :  { %v724_v19 = vsel %vm723_vm6, %v1992_v3, %v720_v8 }
0x10aa   :  { %v729_v13 = vsel %vm726_vm7, %v728_v21, %v724_v19 }
0x10ab   :  { %v732_v10 = vmul.f32 %v729_v13, %v675_v52 }
0x1108   :  { %v735_v22 = vpop.permute.xlu1 %734 }
0x1109   :  { %v737_v14 = vmul.f32 %v735_v22, %v729_v13 }
0x110b   :  { %739 = vrot.lane.b32.xlu2 %v737_v14, %s2297_s1 }
0x1165   :  { %v740_v15 = vpop.permute.xlu2 %739 }
0x1166   :  { %v742_v17 = vadd.f32 %v740_v15, %v732_v10 }
0x1168   :  { %1993 = vtanh.f32 %v742_v17 }
0x116e   :  { %v1994_v20 = vpop.eup %1993 }
0x116f   :  { %745 = vrot.lane.b32.xlu0 %v1994_v20, %s2296_s0 }
0x11e1   :  { %v746_v25 = vpop.permute.xlu0 %745 }
0x11e2   :  { %v748_v26 = vmul.f32 %v746_v25, %v729_v13 }
0x11e4   :  { %v749_v27 = vperm.slane %v748_v26, 0 }
0x11e6   :  { %v751_v28 = vsel %vm250_vm10, %v749_v27, %v684_v57  ;;  %v750_v29 = vsel %vm255_vm11, %v749_v27, %v683_v58 }
0x11e7   :  { %757 = vrot.lane.b32.xlu2 %v751_v28, %s2298_s26  ;;  %783 = vrot.lane.b32.xlu1 %v750_v29, %s2297_s1 }
0x1241   :  { %v758_v36 = vpop.permute.xlu2 %757 }
0x1242   :  { %1875 = vmatmul.msk.f32.vlgmr.msra.gmra.mxu1 %vm759_vm8, %v758_v36 }
0x1243   :  { %1240 = vmatpush.msra.mxu1 %v816_v32 }
0x1245   :  { %1241 = vmatpush.msra.mxu1 %v815_v33 }
0x1247   :  { %1242 = vmatpush.msra.mxu1 %v814_v34 }
0x1249   :  { %1243 = vmatpush.msra.mxu1 %v813_v35 }
0x1259   :  { %v784_v37 = vpop.permute.xlu1 %783 }
0x125a   :  { %1876 = vmatmul.msk.f32.vlgmr.msra.gmra.mxu2 %vm759_vm8, %v784_v37 }
0x125b   :  { %1307 = vmatpush.msra.mxu2 %v816_v32 }
0x125d   :  { %1308 = vmatpush.msra.mxu2 %v815_v33 }
0x125f   :  { %1309 = vmatpush.msra.mxu2 %v814_v34 }
0x1261   :  { %1310 = vmatpush.msra.mxu2 %v813_v35 }
0x12bf   :  { %v779_v39 = vpop.f32.mrf.mxu1 }
0x12dd   :  { %v804_v40 = vpop.f32.mrf.mxu2 }
0x12de   :  { %v805_v41 = vadd.f32 %v804_v40, %v779_v39 }
0x12e0   :  { %v811_v42 = vadd.f32 %v1929_v38, %v805_v41 }
0x12e2   :  { %812 = vst [vmem:[#allocation2] sm:$0xff] %v811_v42 }
0x12e9   :  { %v2543_v45 = vld [vmem:[#allocation2] sm:$0x1]  ;;  %v2545_v46 = vld [vmem:[#allocation2 + $0x7] sm:$0x1]  ;;  %v2547_v44 = vld [vmem:[#allocation2 + $0x1] sm:$0x1] }
0x12ea   :  { %v819_v47 = vsel %vm2413_vm1, %v2543_v45, %v2545_v46  ;;  %v2553_v48 = vld [vmem:[#allocation2 + $0x6] sm:$0x1]  ;;  %v2555_v49 = vld [vmem:[#allocation2 + $0x2] sm:$0x1]  ;;  %v2557_v50 = vld [vmem:[#allocation2 + $0x5] sm:$0x1]  ;;  %v1289_v51 = vsel %vm2413_vm1, %v2545_v46, %v2543_v45 }
0x12eb   :  { %v840_v52 = vadd.f32 %v837_v43, %v819_v47  ;;  %v2563_v53 = vld [vmem:[#allocation2 + $0x3] sm:$0x1]  ;;  %v2565_v54 = vld [vmem:[#allocation2 + $0x4] sm:$0x1]  ;;  %v1155_v55 = vsel %vm2413_vm1, %v2557_v50, %v2555_v49  ;;  %v1222_v57 = vsel %vm2413_vm1, %v2553_v48, %v2547_v44  ;;  %v883_v17 = vsel %vm2413_vm1, %v2547_v44, %v2553_v48 }
0x12ec   :  { %v1088_v56 = vsel %vm2413_vm1, %v2565_v54, %v2563_v53 }
0x12ed   :  { %1995 = vtanh.f32 %v840_v52  ;;  %v1877_v59 = vmul.f32 -1.442695, %v840_v52 }
0x12ef   :  { %1997 = vpow2.f32 %v1877_v59 }
0x12f3   :  { %v1996_v58 = vpop.eup %1995 }
0x12f4   :  { %863 = vrot.lane.b32.xlu0 %v1996_v58, %s2296_s0 }
0x12f5   :  { %v1998_v60 = vpop.eup %1997 }
0x12f6   :  { %v844_v61 = vadd.f32 1.0, %v1998_v60 }
0x12f8   :  { %1999 = vrcp.f32 %v844_v61  ;;  %v856_v3 = vand.u32 2147483648, %v844_v61  ;;  %vm850_vm2 = vweird.f32 %v844_v61  ;;  %v854_v4 = vand.u32 2147483647, %v844_v61 }
0x12fa   :  { %v857_v7 = vor.u32 1.1754944e-38, %v856_v3  ;;  %vm855_vm6 = vcmp.eq.f32.partialorder %v854_v4, 8.507059e+37 }
0x12fe   :  { %v2000_v62 = vpop.eup %1999 }
0x12ff   :  { %v846_v63 = vmul.f32 %v2000_v62, %v844_v61  ;;  %vm851_vm9 = vweird.f32 %v2000_v62 }
0x1300   :  { %vm852_vm3 = vmor %vm850_vm2, %vm851_vm9 }
0x1301   :  { %v847_v0 = vsub.f32 1.0, %v846_v63 }
0x1303   :  { %v848_v1 = vmul.f32 %v2000_v62, %v847_v0 }
0x1305   :  { %v849_v2 = vadd.f32 %v2000_v62, %v848_v1  ;;  %v952_v1 = vsel %vm2413_vm1, %v2555_v49, %v2557_v50 }
0x1307   :  { %v853_v5 = vsel %vm852_vm3, %v2000_v62, %v849_v2 }
0x1308   :  { %v858_v11 = vsel %vm855_vm6, %v857_v7, %v853_v5 }
0x1309   :  { %v861_v19 = vmul.f32 0.0, %v858_v11 }
0x1366   :  { %v864_v8 = vpop.permute.xlu0 %863 }
0x1367   :  { %v866_v18 = vmul.f32 %v864_v8, %v858_v11 }
0x1369   :  { %868 = vrot.lane.b32.xlu1 %v866_v18, %s2297_s1 }
0x13db   :  { %v869_v21 = vpop.permute.xlu1 %868 }
0x13dc   :  { %v871_v22 = vadd.f32 %v869_v21, %v861_v19 }
0x13de   :  { %2001 = vtanh.f32 %v871_v22 }
0x13e4   :  { %v2002_v13 = vpop.eup %2001 }
0x13e5   :  { %874 = vrot.lane.b32.xlu2 %v2002_v13, %s2296_s0 }
0x143f   :  { %v875_v14 = vpop.permute.xlu2 %874 }
0x1440   :  { %v877_v10 = vmul.f32 %v875_v14, %v858_v11 }
0x1442   :  { %885 = vrot.lane.b32.xlu0 %v877_v10, %s2297_s1  ;;  %v878_v47 = vperm.slane %v877_v10, 0 }
0x1444   :  { %v879_v60 = vsel %vm250_vm10, %v878_v47, 0.0  ;;  %v880_v61 = vsel %vm255_vm11, %v878_v47, 0.0 }
0x14b4   :  { %v886_v15 = vpop.permute.xlu0 %885 }
0x14b5   :  { %1878 = vmatmul.msk.f32.vlgmr.msrb.gmra.mxu0 %vm157_vm0, %v886_v15 }
0x1532   :  { %v906_v20 = vpop.f32.mrf.mxu0 }
0x1533   :  { %v909_v23 = vadd.f32 %v906_v20, %v883_v17 }
0x1535   :  { %2003 = vtanh.f32 %v909_v23  ;;  %v1879_v25 = vmul.f32 -1.442695, %v909_v23 }
0x1537   :  { %2005 = vpow2.f32 %v1879_v25 }
0x153b   :  { %v2004_v24 = vpop.eup %2003 }
0x153c   :  { %932 = vrot.lane.b32.xlu1 %v2004_v24, %s2296_s0 }
0x153d   :  { %v2006_v26 = vpop.eup %2005 }
0x153e   :  { %v913_v27 = vadd.f32 1.0, %v2006_v26 }
0x1540   :  { %2007 = vrcp.f32 %v913_v27  ;;  %v925_v33 = vand.u32 2147483648, %v913_v27  ;;  %vm919_vm9 = vweird.f32 %v913_v27  ;;  %v923_v34 = vand.u32 2147483647, %v913_v27 }
0x1542   :  { %v926_v36 = vor.u32 1.1754944e-38, %v925_v33  ;;  %vm924_vm3 = vcmp.eq.f32.partialorder %v923_v34, 8.507059e+37  ;;  %v1021_v34 = vsel %vm2413_vm1, %v2563_v53, %v2565_v54 }
0x1546   :  { %v2008_v28 = vpop.eup %2007 }
0x1547   :  { %v915_v29 = vmul.f32 %v2008_v28, %v913_v27  ;;  %vm920_vm7 = vweird.f32 %v2008_v28 }
0x1548   :  { %vm921_vm2 = vmor %vm919_vm9, %vm920_vm7 }
0x1549   :  { %v916_v30 = vsub.f32 1.0, %v915_v29 }
0x154b   :  { %v917_v31 = vmul.f32 %v2008_v28, %v916_v30 }
0x154d   :  { %v918_v32 = vadd.f32 %v2008_v28, %v917_v31 }
0x154f   :  { %v922_v35 = vsel %vm921_vm2, %v2008_v28, %v918_v32 }
0x1550   :  { %v927_v38 = vsel %vm924_vm3, %v926_v36, %v922_v35 }
0x1551   :  { %v930_v40 = vmul.f32 %v927_v38, %v871_v22 }
0x15ae   :  { %v933_v37 = vpop.permute.xlu1 %932 }
0x15af   :  { %v935_v39 = vmul.f32 %v933_v37, %v927_v38 }
0x15b1   :  { %937 = vrot.lane.b32.xlu2 %v935_v39, %s2297_s1 }
0x160b   :  { %v938_v41 = vpop.permute.xlu2 %937 }
0x160c   :  { %v940_v42 = vadd.f32 %v938_v41, %v930_v40 }
0x160e   :  { %2009 = vtanh.f32 %v940_v42 }
0x1614   :  { %v2010_v43 = vpop.eup %2009 }
0x1615   :  { %943 = vrot.lane.b32.xlu0 %v2010_v43, %s2296_s0 }
0x1687   :  { %v944_v52 = vpop.permute.xlu0 %943 }
0x1688   :  { %v946_v58 = vmul.f32 %v944_v52, %v927_v38 }
0x168a   :  { %v947_v59 = vperm.slane %v946_v58, 0  ;;  %954 = vrot.lane.b32.xlu1 %v946_v58, %s2297_s1 }
0x168c   :  { %v948_v62 = vsel %vm325_vm12, %v947_v59, %v879_v60  ;;  %v949_v63 = vsel %vm330_vm13, %v947_v59, %v880_v61 }
0x16fc   :  { %v955_v0 = vpop.permute.xlu1 %954 }
0x16fd   :  { %1880 = vmatmul.msk.f32.vlgmr.msrb.gmra.mxu1 %vm157_vm0, %v955_v0 }
0x177a   :  { %v975_v2 = vpop.f32.mrf.mxu1 }
0x177b   :  { %v978_v3 = vadd.f32 %v975_v2, %v952_v1 }
0x177d   :  { %2011 = vtanh.f32 %v978_v3  ;;  %v1881_v5 = vmul.f32 -1.442695, %v978_v3 }
0x177f   :  { %2013 = vpow2.f32 %v1881_v5 }
0x1783   :  { %v2012_v4 = vpop.eup %2011 }
0x1784   :  { %1001 = vrot.lane.b32.xlu2 %v2012_v4, %s2296_s0 }
0x1785   :  { %v2014_v7 = vpop.eup %2013 }
0x1786   :  { %v982_v8 = vadd.f32 1.0, %v2014_v7 }
0x1788   :  { %2015 = vrcp.f32 %v982_v8  ;;  %v994_v13 = vand.u32 2147483648, %v982_v8  ;;  %vm988_vm7 = vweird.f32 %v982_v8  ;;  %v992_v14 = vand.u32 2147483647, %v982_v8 }
0x178a   :  { %v995_v15 = vor.u32 1.1754944e-38, %v994_v13  ;;  %vm993_vm2 = vcmp.eq.f32.partialorder %v992_v14, 8.507059e+37 }
0x178e   :  { %v2016_v11 = vpop.eup %2015 }
0x178f   :  { %v984_v18 = vmul.f32 %v2016_v11, %v982_v8  ;;  %vm989_vm6 = vweird.f32 %v2016_v11 }
0x1790   :  { %vm990_vm9 = vmor %vm988_vm7, %vm989_vm6 }
0x1791   :  { %v985_v19 = vsub.f32 1.0, %v984_v18 }
0x1793   :  { %v986_v21 = vmul.f32 %v2016_v11, %v985_v19 }
0x1795   :  { %v987_v22 = vadd.f32 %v2016_v11, %v986_v21 }
0x1797   :  { %v991_v10 = vsel %vm990_vm9, %v2016_v11, %v987_v22 }
0x1798   :  { %v996_v20 = vsel %vm993_vm2, %v995_v15, %v991_v10 }
0x1799   :  { %v999_v24 = vmul.f32 %v996_v20, %v940_v42 }
0x17de   :  { %v1002_v17 = vpop.permute.xlu2 %1001 }
0x17df   :  { %v1004_v23 = vmul.f32 %v1002_v17, %v996_v20 }
0x17e1   :  { %1006 = vrot.lane.b32.xlu0 %v1004_v23, %s2297_s1 }
0x1853   :  { %v1007_v25 = vpop.permute.xlu0 %1006 }
0x1854   :  { %v1009_v26 = vadd.f32 %v1007_v25, %v999_v24 }
0x1856   :  { %2017 = vtanh.f32 %v1009_v26 }
0x185c   :  { %v2018_v27 = vpop.eup %2017 }
0x185d   :  { %1012 = vrot.lane.b32.xlu1 %v2018_v27, %s2296_s0 }
0x18cf   :  { %v1013_v28 = vpop.permute.xlu1 %1012 }
0x18d0   :  { %v1015_v29 = vmul.f32 %v1013_v28, %v996_v20 }
0x18d2   :  { %v1016_v30 = vperm.slane %v1015_v29, 0  ;;  %1023 = vrot.lane.b32.xlu2 %v1015_v29, %s2297_s1 }
0x18d4   :  { %v1017_v31 = vsel %vm400_vm4, %v1016_v30, %v948_v62  ;;  %v1018_v32 = vsel %vm405_vm5, %v1016_v30, %v949_v63 }
0x192c   :  { %v1024_v33 = vpop.permute.xlu2 %1023 }
0x192d   :  { %1882 = vmatmul.msk.f32.vlgmr.msrb.gmra.mxu2 %vm157_vm0, %v1024_v33 }
0x19b0   :  { %v1044_v35 = vpop.f32.mrf.mxu2 }
0x19b1   :  { %v1047_v36 = vadd.f32 %v1044_v35, %v1021_v34 }
0x19b3   :  { %2019 = vtanh.f32 %v1047_v36  ;;  %v1883_v38 = vmul.f32 -1.442695, %v1047_v36 }
0x19b5   :  { %2021 = vpow2.f32 %v1883_v38 }
0x19b9   :  { %v2020_v37 = vpop.eup %2019 }
0x19ba   :  { %1070 = vrot.lane.b32.xlu0 %v2020_v37, %s2296_s0 }
0x19bb   :  { %v2022_v39 = vpop.eup %2021 }
0x19bc   :  { %v1051_v40 = vadd.f32 1.0, %v2022_v39 }
0x19be   :  { %2023 = vrcp.f32 %v1051_v40  ;;  %v1063_v58 = vand.u32 2147483648, %v1051_v40  ;;  %vm1057_vm6 = vweird.f32 %v1051_v40  ;;  %v1061_v59 = vand.u32 2147483647, %v1051_v40 }
0x19c0   :  { %v1064_v61 = vor.u32 1.1754944e-38, %v1063_v58  ;;  %vm1062_vm9 = vcmp.eq.f32.partialorder %v1061_v59, 8.507059e+37 }
0x19c4   :  { %v2024_v41 = vpop.eup %2023 }
0x19c5   :  { %v1053_v42 = vmul.f32 %v2024_v41, %v1051_v40  ;;  %vm1058_vm3 = vweird.f32 %v2024_v41 }
0x19c6   :  { %vm1059_vm7 = vmor %vm1057_vm6, %vm1058_vm3 }
0x19c7   :  { %v1054_v43 = vsub.f32 1.0, %v1053_v42 }
0x19c9   :  { %v1055_v47 = vmul.f32 %v2024_v41, %v1054_v43 }
0x19cb   :  { %v1056_v52 = vadd.f32 %v2024_v41, %v1055_v47 }
0x19cd   :  { %v1060_v60 = vsel %vm1059_vm7, %v2024_v41, %v1056_v52 }
0x19ce   :  { %v1065_v63 = vsel %vm1062_vm9, %v1064_v61, %v1060_v60 }
0x19cf   :  { %v1068_v1 = vmul.f32 %v1065_v63, %v1009_v26 }
0x1a2c   :  { %v1071_v62 = vpop.permute.xlu0 %1070 }
0x1a2d   :  { %v1073_v0 = vmul.f32 %v1071_v62, %v1065_v63 }
0x1a2f   :  { %1075 = vrot.lane.b32.xlu1 %v1073_v0, %s2297_s1 }
0x1aa1   :  { %v1076_v2 = vpop.permute.xlu1 %1075 }
0x1aa2   :  { %v1078_v3 = vadd.f32 %v1076_v2, %v1068_v1 }
0x1aa4   :  { %2025 = vtanh.f32 %v1078_v3 }
0x1aaa   :  { %v2026_v4 = vpop.eup %2025 }
0x1aab   :  { %1081 = vrot.lane.b32.xlu2 %v2026_v4, %s2296_s0 }
0x1b05   :  { %v1082_v5 = vpop.permute.xlu2 %1081 }
0x1b06   :  { %v1084_v7 = vmul.f32 %v1082_v5, %v1065_v63 }
0x1b08   :  { %v1085_v8 = vperm.slane %v1084_v7, 0  ;;  %1090 = vrot.lane.b32.xlu0 %v1084_v7, %s2297_s1 }
0x1b0a   :  { %v1086_v11 = vsel %vm475_vm14, %v1085_v8, %v1017_v31  ;;  %v1087_v18 = vsel %vm480_vm15, %v1085_v8, %v1018_v32 }
0x1b7a   :  { %v1091_v19 = vpop.permute.xlu0 %1090 }
0x1b7b   :  { %1884 = vmatmul.msk.f32.vlgmr.msrb.gmra.mxu3 %vm157_vm0, %v1091_v19 }
0x1bfe   :  { %v1111_v21 = vpop.f32.mrf.mxu3 }
0x1bff   :  { %v1114_v22 = vadd.f32 %v1111_v21, %v1088_v56 }
0x1c01   :  { %2027 = vtanh.f32 %v1114_v22  ;;  %v1885_v14 = vmul.f32 -1.442695, %v1114_v22 }
0x1c03   :  { %2029 = vpow2.f32 %v1885_v14 }
0x1c07   :  { %v2028_v13 = vpop.eup %2027 }
0x1c08   :  { %1137 = vrot.lane.b32.xlu1 %v2028_v13, %s2296_s0 }
0x1c09   :  { %v2030_v10 = vpop.eup %2029 }
0x1c0a   :  { %v1118_v15 = vadd.f32 1.0, %v2030_v10 }
0x1c0c   :  { %2031 = vrcp.f32 %v1118_v15  ;;  %v1130_v26 = vand.u32 2147483648, %v1118_v15  ;;  %vm1124_vm3 = vweird.f32 %v1118_v15  ;;  %v1128_v27 = vand.u32 2147483647, %v1118_v15 }
0x1c0e   :  { %v1131_v54 = vor.u32 1.1754944e-38, %v1130_v26  ;;  %vm1129_vm7 = vcmp.eq.f32.partialorder %v1128_v27, 8.507059e+37 }
0x1c12   :  { %v2032_v17 = vpop.eup %2031 }
0x1c13   :  { %v1120_v20 = vmul.f32 %v2032_v17, %v1118_v15  ;;  %vm1125_vm2 = vweird.f32 %v2032_v17 }
0x1c14   :  { %vm1126_vm6 = vmor %vm1124_vm3, %vm1125_vm2 }
0x1c15   :  { %v1121_v23 = vsub.f32 1.0, %v1120_v20 }
0x1c17   :  { %v1122_v24 = vmul.f32 %v2032_v17, %v1121_v23 }
0x1c19   :  { %v1123_v25 = vadd.f32 %v2032_v17, %v1122_v24 }
0x1c1b   :  { %v1127_v53 = vsel %vm1126_vm6, %v2032_v17, %v1123_v25 }
0x1c1c   :  { %v1132_v28 = vsel %vm1129_vm7, %v1131_v54, %v1127_v53 }
0x1c1d   :  { %v1135_v30 = vmul.f32 %v1132_v28, %v1078_v3 }
0x1c7a   :  { %v1138_v56 = vpop.permute.xlu1 %1137 }
0x1c7b   :  { %v1140_v29 = vmul.f32 %v1138_v56, %v1132_v28 }
0x1c7d   :  { %1142 = vrot.lane.b32.xlu2 %v1140_v29, %s2297_s1 }
0x1cd7   :  { %v1143_v31 = vpop.permute.xlu2 %1142 }
0x1cd8   :  { %v1145_v32 = vadd.f32 %v1143_v31, %v1135_v30 }
0x1cda   :  { %2033 = vtanh.f32 %v1145_v32 }
0x1ce0   :  { %v2034_v33 = vpop.eup %2033 }
0x1ce1   :  { %1148 = vrot.lane.b32.xlu0 %v2034_v33, %s2296_s0 }
0x1d53   :  { %v1149_v34 = vpop.permute.xlu0 %1148 }
0x1d54   :  { %v1151_v35 = vmul.f32 %v1149_v34, %v1132_v28 }
0x1d56   :  { %v1152_v36 = vperm.slane %v1151_v35, 0  ;;  %1157 = vrot.lane.b32.xlu1 %v1151_v35, %s2297_s1 }
0x1d58   :  { %v1153_v37 = vsel %vm480_vm15, %v1152_v36, %v1086_v11  ;;  %v1154_v38 = vsel %vm475_vm14, %v1152_v36, %v1087_v18 }
0x1dc8   :  { %v1158_v39 = vpop.permute.xlu1 %1157 }
0x1dc9   :  { %1886 = vmatmul.msk.f32.vlgmr.msra.gmra.mxu0 %vm157_vm0, %v1158_v39 }
0x1e46   :  { %v1178_v40 = vpop.f32.mrf.mxu0 }
0x1e47   :  { %v1181_v41 = vadd.f32 %v1178_v40, %v1155_v55 }
0x1e49   :  { %2035 = vtanh.f32 %v1181_v41  ;;  %v1887_v43 = vmul.f32 -1.442695, %v1181_v41 }
0x1e4b   :  { %2037 = vpow2.f32 %v1887_v43 }
0x1e4f   :  { %v2036_v42 = vpop.eup %2035 }
0x1e50   :  { %1204 = vrot.lane.b32.xlu2 %v2036_v42, %s2296_s0 }
0x1e51   :  { %v2038_v47 = vpop.eup %2037 }
0x1e52   :  { %v1185_v52 = vadd.f32 1.0, %v2038_v47 }
0x1e54   :  { %2039 = vrcp.f32 %v1185_v52  ;;  %v1197_v63 = vand.u32 2147483648, %v1185_v52  ;;  %vm1191_vm2 = vweird.f32 %v1185_v52  ;;  %v1195_v0 = vand.u32 2147483647, %v1185_v52 }
0x1e56   :  { %v1198_v50 = vor.u32 1.1754944e-38, %v1197_v63  ;;  %vm1196_vm6 = vcmp.eq.f32.partialorder %v1195_v0, 8.507059e+37 }
0x1e5a   :  { %v2040_v58 = vpop.eup %2039 }
0x1e5b   :  { %v1187_v59 = vmul.f32 %v2040_v58, %v1185_v52  ;;  %vm1192_vm9 = vweird.f32 %v2040_v58 }
0x1e5c   :  { %vm1193_vm3 = vmor %vm1191_vm2, %vm1192_vm9 }
0x1e5d   :  { %v1188_v60 = vsub.f32 1.0, %v1187_v59 }
0x1e5f   :  { %v1189_v61 = vmul.f32 %v2040_v58, %v1188_v60 }
0x1e61   :  { %v1190_v62 = vadd.f32 %v2040_v58, %v1189_v61 }
0x1e63   :  { %v1194_v49 = vsel %vm1193_vm3, %v2040_v58, %v1190_v62 }
0x1e64   :  { %v1199_v1 = vsel %vm1196_vm6, %v1198_v50, %v1194_v49 }
0x1e65   :  { %v1202_v3 = vmul.f32 %v1199_v1, %v1145_v32 }
0x1eaa   :  { %v1205_v55 = vpop.permute.xlu2 %1204 }
0x1eab   :  { %v1207_v2 = vmul.f32 %v1205_v55, %v1199_v1 }
0x1ead   :  { %1209 = vrot.lane.b32.xlu0 %v1207_v2, %s2297_s1  ;;  %v1357_v2 = vld [vmem:[%s2801_s7 + $0x8] sm:$0xff] }
0x1eae   :  { %1404 = vmatpush.msrb.mxu0 %v1357_v2 }
0x1f1f   :  { %v1210_v4 = vpop.permute.xlu0 %1209 }
0x1f20   :  { %v1212_v5 = vadd.f32 %v1210_v4, %v1202_v3  ;;  %v1356_v3 = vld [vmem:[%s2801_s7] sm:$0xff] }
0x1f21   :  { %1405 = vmatpush.msrb.mxu0 %v1356_v3 }
0x1f22   :  { %2041 = vtanh.f32 %v1212_v5 }
0x1f28   :  { %v2042_v7 = vpop.eup %2041 }
0x1f29   :  { %1215 = vrot.lane.b32.xlu1 %v2042_v7, %s2296_s0 }
0x1f9b   :  { %v1216_v8 = vpop.permute.xlu1 %1215 }
0x1f9c   :  { %v1218_v11 = vmul.f32 %v1216_v8, %v1199_v1 }
0x1f9e   :  { %v1219_v18 = vperm.slane %v1218_v11, 0  ;;  %1224 = vrot.lane.b32.xlu2 %v1218_v11, %s2297_s1 }
0x1fa0   :  { %v1221_v19 = vsel %vm400_vm4, %v1219_v18, %v1154_v38  ;;  %v1220_v21 = vsel %vm405_vm5, %v1219_v18, %v1153_v37 }
0x1ff8   :  { %v1225_v22 = vpop.permute.xlu2 %1224 }
0x1ff9   :  { %1888 = vmatmul.msk.f32.vlgmr.msra.gmra.mxu1 %vm157_vm0, %v1225_v22  ;;  %v2299_v22 = vmov 1.0  }
0x2076   :  { %v1245_v13 = vpop.f32.mrf.mxu1 }
0x2077   :  { %v1248_v14 = vadd.f32 %v1245_v13, %v1222_v57  ;;  %v2300_v13 = vmov -10000.0  }
0x2079   :  { %2043 = vtanh.f32 %v1248_v14  ;;  %v1889_v15 = vmul.f32 -1.442695, %v1248_v14 }
0x207b   :  { %2045 = vpow2.f32 %v1889_v15  ;;  %v2716_v15 = vld [vmem:[%s2803_s9] sm:$0x3f]  ;;  %s2301_s9 = smov [#allocation14]  }
0x207c   :  { %s1813_s4 = sshll.u32 %s2301_s9, 4  ;;  %s1814_s4 = int_to_ptr.vmem [resolvable:$true] %s1813_s4 }
0x207f   :  { %v2044_v10 = vpop.eup %2043 }
0x2080   :  { %1271 = vrot.lane.b32.xlu0 %v2044_v10, %s2296_s0 }
0x2081   :  { %v2046_v17 = vpop.eup %2045 }
0x2082   :  { %v1252_v20 = vadd.f32 1.0, %v2046_v17 }
0x2084   :  { %2047 = vrcp.f32 %v1252_v20  ;;  %v1264_v53 = vand.u32 2147483648, %v1252_v20  ;;  %vm1258_vm9 = vweird.f32 %v1252_v20  ;;  %v1262_v54 = vand.u32 2147483647, %v1252_v20 }
0x2086   :  { %v1265_v48 = vor.u32 1.1754944e-38, %v1264_v53  ;;  %vm1263_vm3 = vcmp.eq.f32.partialorder %v1262_v54, 8.507059e+37 }
0x208a   :  { %v2048_v23 = vpop.eup %2047 }
0x208b   :  { %v1254_v24 = vmul.f32 %v2048_v23, %v1252_v20  ;;  %vm1259_vm7 = vweird.f32 %v2048_v23 }
0x208c   :  { %vm1260_vm2 = vmor %vm1258_vm9, %vm1259_vm7  ;;  %vm1418_vm9 = vcmp.eq.s32.totalorder %v2442_v6, %v2410_v12 }
0x208d   :  { %v1255_v25 = vsub.f32 1.0, %v1254_v24  ;;  %v2692_v18 = vsel %vm1418_vm9, 1.0, %v2295_v9 }
0x208f   :  { %v1256_v26 = vmul.f32 %v2048_v23, %v1255_v25 }
0x2091   :  { %v1257_v27 = vadd.f32 %v2048_v23, %v1256_v26 }
0x2093   :  { %v1261_v44 = vsel %vm1260_vm2, %v2048_v23, %v1257_v27  ;;  %vm1427_vm2 = vcmask 1045504  }
0x2094   :  { %v1266_v56 = vsel %vm1263_vm3, %v1265_v48, %v1261_v44  ;;  %vm1421_vm3 = vcmp.eq.s32.totalorder %v2410_v12, 4  ;;  %1895 = vmatpush.msk.msrb.mxu1 %vm1427_vm2, %v2299_v22  ;;  %1897 = vmatpush.msk.msrb.mxu2 %vm1427_vm2, %v2299_v22  ;;  %v1930_v44 = vld [vmem:[#allocation12] ss:$0 sm:$0xff] }
0x2095   :  { %v1269_v29 = vmul.f32 %v1266_v56, %v1212_v5  ;;  %v1422_v14 = vsel %vm1421_vm3, 0.0, %v2300_v13  ;;  %1901 = vmatpush.msk.msra.mxu0 %vm1427_vm2, %v2299_v22 }
0x2096   :  { %v1423_v9 = vmul.f32 %v2692_v18, %v1422_v14  ;;  %1903 = vmatpush.msk.msra.mxu1 %vm1427_vm2, %v2299_v22 }
0x20f2   :  { %v1272_v57 = vpop.permute.xlu0 %1271 }
0x20f3   :  { %v1274_v28 = vmul.f32 %v1272_v57, %v1266_v56 }
0x20f5   :  { %1276 = vrot.lane.b32.xlu1 %v1274_v28, %s2297_s1 }
0x2167   :  { %v1277_v30 = vpop.permute.xlu1 %1276 }
0x2168   :  { %v1279_v31 = vadd.f32 %v1277_v30, %v1269_v29 }
0x216a   :  { %2049 = vtanh.f32 %v1279_v31 }
0x2170   :  { %v2050_v32 = vpop.eup %2049 }
0x2171   :  { %1282 = vrot.lane.b32.xlu2 %v2050_v32, %s2296_s0 }
0x21cb   :  { %v1283_v33 = vpop.permute.xlu2 %1282 }
0x21cc   :  { %v1285_v34 = vmul.f32 %v1283_v33, %v1266_v56 }
0x21ce   :  { %v1286_v35 = vperm.slane %v1285_v34, 0  ;;  %1291 = vrot.lane.b32.xlu0 %v1285_v34, %s2297_s1 }
0x21d0   :  { %v1288_v36 = vsel %vm325_vm12, %v1286_v35, %v1221_v19  ;;  %v1287_v37 = vsel %vm330_vm13, %v1286_v35, %v1220_v21  ;;  %v1359_v19 = vld [vmem:[%s2801_s7 + $0x18] sm:$0xff]  ;;  %v1358_v21 = vld [vmem:[%s2801_s7 + $0x10] sm:$0xff] }
0x21d1   :  { %1379 = vmatpush.msra.mxu3 %v1359_v19 }
0x21d3   :  { %1380 = vmatpush.msra.mxu3 %v1358_v21 }
0x21d5   :  { %1899 = vmatpush.msk.msrb.mxu3 %vm1427_vm2, %v2299_v22 }
0x2240   :  { %v1292_v38 = vpop.permute.xlu0 %1291 }
0x2241   :  { %1890 = vmatmul.msk.f32.vlgmr.msra.gmra.mxu2 %vm157_vm0, %v1292_v38 }
0x2242   :  { %1905 = vmatpush.msk.msra.mxu2 %vm1427_vm2, %v2299_v22 }
0x22c4   :  { %v1312_v39 = vpop.f32.mrf.mxu2 }
0x22c5   :  { %v1315_v40 = vadd.f32 %v1312_v39, %v1289_v51 }
0x22c7   :  { %2051 = vtanh.f32 %v1315_v40  ;;  %v1891_v42 = vmul.f32 -1.442695, %v1315_v40 }
0x22c9   :  { %2053 = vpow2.f32 %v1891_v42 }
0x22cd   :  { %v2052_v41 = vpop.eup %2051 }
0x22ce   :  { %1338 = vrot.lane.b32.xlu1 %v2052_v41, %s2296_s0 }
0x22cf   :  { %v2054_v43 = vpop.eup %2053 }
0x22d0   :  { %v1319_v47 = vadd.f32 1.0, %v2054_v43 }
0x22d2   :  { %2055 = vrcp.f32 %v1319_v47  ;;  %v1331_v16 = vand.u32 2147483648, %v1319_v47  ;;  %vm1325_vm6 = vweird.f32 %v1319_v47  ;;  %v1329_v62 = vand.u32 2147483647, %v1319_v47 }
0x22d4   :  { %v1332_v46 = vor.u32 1.1754944e-38, %v1331_v16  ;;  %vm1330_vm7 = vcmp.eq.f32.partialorder %v1329_v62, 8.507059e+37 }
0x22d8   :  { %v2056_v52 = vpop.eup %2055 }
0x22d9   :  { %v1321_v58 = vmul.f32 %v2056_v52, %v1319_v47  ;;  %vm1326_vm0 = vweird.f32 %v2056_v52 }
0x22da   :  { %vm1327_vm1 = vmor %vm1325_vm6, %vm1326_vm0  ;;  %vm1415_vm0 = vcmask 48128   ;;  %vm1451_vm6 = vcmask 46080  }
0x22db   :  { %v1322_v59 = vsub.f32 1.0, %v1321_v58  ;;  %1896 = vmatmul.msk.f32.vlgmr.msrb.gmra.mxu1 %vm1415_vm0, %v1423_v9 }
0x22dd   :  { %v1323_v60 = vmul.f32 %v2056_v52, %v1322_v59 }
0x22df   :  { %v1324_v61 = vadd.f32 %v2056_v52, %v1323_v60 }
0x22e1   :  { %v1328_v45 = vsel %vm1327_vm1, %v2056_v52, %v1324_v61 }
0x22e2   :  { %v1333_v63 = vsel %vm1330_vm7, %v1332_v46, %v1328_v45 }
0x22e3   :  { %v1336_v49 = vmul.f32 %v1333_v63, %v1279_v31 }
0x2340   :  { %v1339_v51 = vpop.permute.xlu1 %1338 }
0x2341   :  { %v1341_v0 = vmul.f32 %v1339_v51, %v1333_v63 }
0x2343   :  { %1343 = vrot.lane.b32.xlu2 %v1341_v0, %s2297_s1 }
0x2358   :  { %v1448_v17 = vpop.f32.mrf.mxu1 }
0x2359   :  { %v1449_v20 = vadd.f32 %v1448_v17, %v2716_v15 }
0x235b   :  { %v1452_v23 = vsel %vm1451_vm6, %v1449_v20, -inf }
0x235c   :  { %v1453_v24 = vrot.slane %v1452_v23, 4 }
0x235e   :  { %v1454_v25 = vmax.f32 %v1452_v23, %v1453_v24 }
0x2360   :  { %v1455_v26 = vrot.slane %v1454_v25, 2 }
0x2362   :  { %v1456_v27 = vmax.f32 %v1454_v25, %v1455_v26 }
0x2364   :  { %v1457_v53 = vrot.slane %v1456_v27, 1 }
0x2366   :  { %v1458_v54 = vmax.f32 %v1456_v27, %v1457_v53 }
0x239d   :  { %v1344_v50 = vpop.permute.xlu2 %1343 }
0x239e   :  { %v1346_v55 = vadd.f32 %v1344_v50, %v1336_v49 }
0x23a0   :  { %2057 = vtanh.f32 %v1346_v55 }
0x23a6   :  { %v2058_v1 = vpop.eup %2057 }
0x23a7   :  { %1349 = vrot.lane.b32.xlu0 %v2058_v1, %s2296_s0  ;;  %s1837_s0 = sshll.u32 %s2807_s13, 4  ;;  %s1838_s0 = int_to_ptr.hbm [resolvable:$true] %s1837_s0 }
0x2419   :  { %v1350_v4 = vpop.permute.xlu0 %1349 }
0x241a   :  { %v1352_v5 = vmul.f32 %v1350_v4, %v1333_v63 }
0x241c   :  { %v1353_v7 = vperm.slane %v1352_v5, 0 }
0x241e   :  { %v1355_v8 = vsel %vm250_vm10, %v1353_v7, %v1288_v36  ;;  %v1354_v11 = vsel %vm255_vm11, %v1353_v7, %v1287_v37 }
0x241f   :  { %1361 = vrot.lane.b32.xlu1 %v1355_v8, %s2298_s26  ;;  %1386 = vrot.lane.b32.xlu2 %v1354_v11, %s2297_s1 }
0x2479   :  { %v1387_v12 = vpop.permute.xlu2 %1386 }
0x247a   :  { %1893 = vmatmul.msk.f32.vlgmr.msrb.gmra.mxu0 %vm759_vm8, %v1387_v12 }
0x247b   :  { %1909 = vmatpush.msk.msrb.mxu0 %vm1427_vm2, %v2299_v22 }
0x2491   :  { %v1362_v10 = vpop.permute.xlu1 %1361 }
0x2492   :  { %1892 = vmatmul.msk.f32.vlgmr.msra.gmra.mxu3 %vm759_vm8, %v1362_v10  ;;  %vm1459_vm8 = vcmp.eq.f32.partialorder %v1449_v20, %v1458_v54 }
0x2493   :  { %1907 = vmatpush.msk.msra.mxu3 %vm1427_vm2, %v2299_v22  ;;  %v1460_v33 = vsel %vm1459_vm8, %v2442_v6, 6 }
0x2494   :  { %v1461_v34 = vsel %vm1451_vm6, %v1460_v33, 2147483647 }
0x2495   :  { %v1462_v35 = vrot.slane %v1461_v34, 4 }
0x2497   :  { %vm1463_vm1 = vcmp.lt.s32.totalorder %v1461_v34, %v1462_v35 }
0x2498   :  { %v1464_v41 = vsel %vm1463_vm1, %v1461_v34, %v1462_v35 }
0x2499   :  { %v1465_v43 = vrot.slane %v1464_v41, 2 }
0x249b   :  { %vm1466_vm7 = vcmp.lt.s32.totalorder %v1464_v41, %v1465_v43 }
0x249c   :  { %v1467_v61 = vsel %vm1466_vm7, %v1464_v41, %v1465_v43 }
0x249d   :  { %v1468_v51 = vrot.slane %v1467_v61, 1 }
0x249f   :  { %vm1469_vm3 = vcmp.lt.s32.totalorder %v1467_v61, %v1468_v51 }
0x24a0   :  { %v1470_v55 = vsel %vm1469_vm3, %v1467_v61, %v1468_v51 }
0x24a1   :  { %v1471_v2 = vsel %vm250_vm10, %v1470_v55, 0 }
0x24f7   :  { %v1407_v48 = vpop.f32.mrf.mxu0 }
0x2515   :  { %v1382_v57 = vpop.f32.mrf.mxu3 }
0x2516   :  { %v1408_v56 = vadd.f32 %v1407_v48, %v1382_v57 }
0x2518   :  { %v1414_v28 = vadd.f32 %v1930_v44, %v1408_v56 }
0x251a   :  { %1416 = vst.msk [vmem:[#allocation14] sm:$0xff] %vm1415_vm0, %v1414_v28 }
0x251b   :  { %1818 = dma.vmem_to_hbm [thread:$0]  %s1814_s4, 128, %s1816_s6, [#allocation5]  }
0x2521   :  { %v1472_v29 = vld [vmem:[#allocation14] sm:$0x1]  ;;  %v1519_v59 = vld [vmem:[#allocation14 + $0x1] sm:$0x1]  ;;  %v1566_v9 = vld [vmem:[#allocation14 + $0x2] sm:$0x1] }
0x2522   :  { %v1473_v30 = vadd.f32 %v1472_v29, %v1458_v54  ;;  %v1613_v34 = vld [vmem:[#allocation14 + $0x3] sm:$0x1] }
0x2524   :  { %v1474_v31 = vperm.slane %v1473_v30, 0 }
0x2526   :  { %v1475_v32 = vmul.f32 %v2692_v18, %v1474_v31 }
0x2528   :  { %1898 = vmatmul.msk.f32.vlgmr.msrb.gmra.mxu2 %vm1415_vm0, %v1475_v32 }
0x25ab   :  { %v1496_v36 = vpop.f32.mrf.mxu2 }
0x25ac   :  { %v1497_v37 = vadd.f32 %v1496_v36, %v2716_v15 }
0x25ae   :  { %v1499_v38 = vsel %vm1451_vm6, %v1497_v37, -inf }
0x25af   :  { %v1500_v39 = vrot.slane %v1499_v38, 4 }
0x25b1   :  { %v1501_v40 = vmax.f32 %v1499_v38, %v1500_v39 }
0x25b3   :  { %v1502_v42 = vrot.slane %v1501_v40, 2 }
0x25b5   :  { %v1503_v47 = vmax.f32 %v1501_v40, %v1502_v42 }
0x25b7   :  { %v1504_v52 = vrot.slane %v1503_v47, 1 }
0x25b9   :  { %v1505_v58 = vmax.f32 %v1503_v47, %v1504_v52 }
0x25bb   :  { %vm1506_vm9 = vcmp.eq.f32.partialorder %v1497_v37, %v1505_v58  ;;  %v1520_v60 = vadd.f32 %v1519_v59, %v1505_v58 }
0x25bc   :  { %v1507_v16 = vsel %vm1506_vm9, %v2442_v6, 6 }
0x25bd   :  { %v1508_v62 = vsel %vm1451_vm6, %v1507_v16, 2147483647  ;;  %v1521_v45 = vperm.slane %v1520_v60, 0 }
0x25be   :  { %v1509_v46 = vrot.slane %v1508_v62, 4 }
0x25bf   :  { %v1522_v63 = vmul.f32 %v2692_v18, %v1521_v45 }
0x25c0   :  { %vm1510_vm2 = vcmp.lt.s32.totalorder %v1508_v62, %v1509_v46 }
0x25c1   :  { %v1511_v0 = vsel %vm1510_vm2, %v1508_v62, %v1509_v46  ;;  %1900 = vmatmul.msk.f32.vlgmr.msrb.gmra.mxu3 %vm1415_vm0, %v1522_v63 }
0x25c2   :  { %v1512_v49 = vrot.slane %v1511_v0, 2 }
0x25c4   :  { %vm1513_vm8 = vcmp.lt.s32.totalorder %v1511_v0, %v1512_v49 }
0x25c5   :  { %v1514_v50 = vsel %vm1513_vm8, %v1511_v0, %v1512_v49  ;;  %v1660_v0 = vld [vmem:[#allocation14 + $0x4] sm:$0x1] }
0x25c6   :  { %v1515_v1 = vrot.slane %v1514_v50, 1 }
0x25c8   :  { %vm1516_vm1 = vcmp.lt.s32.totalorder %v1514_v50, %v1515_v1 }
0x25c9   :  { %v1517_v3 = vsel %vm1516_vm1, %v1514_v50, %v1515_v1 }
0x25ca   :  { %v1518_v4 = vsel %vm325_vm12, %v1517_v3, %v1471_v2 }
0x2644   :  { %v1543_v5 = vpop.f32.mrf.mxu3 }
0x2645   :  { %v1544_v7 = vadd.f32 %v1543_v5, %v2716_v15 }
0x2647   :  { %v1546_v8 = vsel %vm1451_vm6, %v1544_v7, -inf }
0x2648   :  { %v1547_v11 = vrot.slane %v1546_v8, 4 }
0x264a   :  { %v1548_v19 = vmax.f32 %v1546_v8, %v1547_v11 }
0x264c   :  { %v1549_v21 = vrot.slane %v1548_v19, 2 }
0x264e   :  { %v1550_v22 = vmax.f32 %v1548_v19, %v1549_v21 }
0x2650   :  { %v1551_v13 = vrot.slane %v1550_v22, 1 }
0x2652   :  { %v1552_v14 = vmax.f32 %v1550_v22, %v1551_v13 }
0x2654   :  { %vm1553_vm7 = vcmp.eq.f32.partialorder %v1544_v7, %v1552_v14  ;;  %v1567_v12 = vadd.f32 %v1566_v9, %v1552_v14 }
0x2655   :  { %v1554_v10 = vsel %vm1553_vm7, %v2442_v6, 6 }
0x2656   :  { %v1555_v17 = vsel %vm1451_vm6, %v1554_v10, 2147483647  ;;  %v1568_v20 = vperm.slane %v1567_v12, 0 }
0x2657   :  { %v1556_v23 = vrot.slane %v1555_v17, 4 }
0x2658   :  { %v1569_v24 = vmul.f32 %v2692_v18, %v1568_v20 }
0x2659   :  { %vm1557_vm10 = vcmp.lt.s32.totalorder %v1555_v17, %v1556_v23 }
0x265a   :  { %v1558_v25 = vsel %vm1557_vm10, %v1555_v17, %v1556_v23  ;;  %1902 = vmatmul.msk.f32.vlgmr.msra.gmra.mxu0 %vm1415_vm0, %v1569_v24  ;;  %v1707_v23 = vld [vmem:[#allocation14 + $0x5] sm:$0x1] }
0x265b   :  { %v1559_v26 = vrot.slane %v1558_v25, 2 }
0x265d   :  { %vm1560_vm12 = vcmp.lt.s32.totalorder %v1558_v25, %v1559_v26 }
0x265e   :  { %v1561_v27 = vsel %vm1560_vm12, %v1558_v25, %v1559_v26 }
0x265f   :  { %v1562_v53 = vrot.slane %v1561_v27, 1 }
0x2661   :  { %vm1563_vm9 = vcmp.lt.s32.totalorder %v1561_v27, %v1562_v53 }
0x2662   :  { %v1564_v54 = vsel %vm1563_vm9, %v1561_v27, %v1562_v53 }
0x2663   :  { %v1565_v44 = vsel %vm400_vm4, %v1564_v54, %v1518_v4 }
0x26d7   :  { %v1590_v48 = vpop.f32.mrf.mxu0 }
0x26d8   :  { %v1591_v57 = vadd.f32 %v1590_v48, %v2716_v15 }
0x26da   :  { %v1593_v56 = vsel %vm1451_vm6, %v1591_v57, -inf }
0x26db   :  { %v1594_v28 = vrot.slane %v1593_v56, 4 }
0x26dd   :  { %v1595_v29 = vmax.f32 %v1593_v56, %v1594_v28 }
0x26df   :  { %v1596_v30 = vrot.slane %v1595_v29, 2 }
0x26e1   :  { %v1597_v31 = vmax.f32 %v1595_v29, %v1596_v30 }
0x26e3   :  { %v1598_v32 = vrot.slane %v1597_v31, 1 }
0x26e5   :  { %v1599_v33 = vmax.f32 %v1597_v31, %v1598_v32 }
0x26e7   :  { %vm1600_vm2 = vcmp.eq.f32.partialorder %v1591_v57, %v1599_v33  ;;  %v1614_v35 = vadd.f32 %v1613_v34, %v1599_v33 }
0x26e8   :  { %v1601_v36 = vsel %vm1600_vm2, %v2442_v6, 6 }
0x26e9   :  { %v1602_v37 = vsel %vm1451_vm6, %v1601_v36, 2147483647  ;;  %v1615_v38 = vperm.slane %v1614_v35, 0 }
0x26ea   :  { %v1603_v39 = vrot.slane %v1602_v37, 4 }
0x26eb   :  { %v1616_v40 = vmul.f32 %v2692_v18, %v1615_v38 }
0x26ec   :  { %vm1604_vm4 = vcmp.lt.s32.totalorder %v1602_v37, %v1603_v39 }
0x26ed   :  { %v1605_v41 = vsel %vm1604_vm4, %v1602_v37, %v1603_v39  ;;  %1904 = vmatmul.msk.f32.vlgmr.msra.gmra.mxu1 %vm1415_vm0, %v1616_v40  ;;  %v1754_v39 = vld [vmem:[#allocation14 + $0x6] sm:$0x1] }
0x26ee   :  { %v1606_v42 = vrot.slane %v1605_v41, 2 }
0x26f0   :  { %vm1607_vm3 = vcmp.lt.s32.totalorder %v1605_v41, %v1606_v42 }
0x26f1   :  { %v1608_v43 = vsel %vm1607_vm3, %v1605_v41, %v1606_v42 }
0x26f2   :  { %v1609_v47 = vrot.slane %v1608_v43, 1 }
0x26f4   :  { %vm1610_vm8 = vcmp.lt.s32.totalorder %v1608_v43, %v1609_v47 }
0x26f5   :  { %v1611_v52 = vsel %vm1610_vm8, %v1608_v43, %v1609_v47 }
0x26f6   :  { %v1612_v58 = vsel %vm475_vm14, %v1611_v52, %v1565_v44 }
0x276a   :  { %v1637_v59 = vpop.f32.mrf.mxu1 }
0x276b   :  { %v1638_v60 = vadd.f32 %v1637_v59, %v2716_v15 }
0x276d   :  { %v1640_v61 = vsel %vm1451_vm6, %v1638_v60, -inf }
0x276e   :  { %v1641_v16 = vrot.slane %v1640_v61, 4 }
0x2770   :  { %v1642_v62 = vmax.f32 %v1640_v61, %v1641_v16 }
0x2772   :  { %v1643_v45 = vrot.slane %v1642_v62, 2 }
0x2774   :  { %v1644_v46 = vmax.f32 %v1642_v62, %v1643_v45 }
0x2776   :  { %v1645_v51 = vrot.slane %v1644_v46, 1 }
0x2778   :  { %v1646_v63 = vmax.f32 %v1644_v46, %v1645_v51 }
0x277a   :  { %vm1647_vm1 = vcmp.eq.f32.partialorder %v1638_v60, %v1646_v63  ;;  %v1661_v49 = vadd.f32 %v1660_v0, %v1646_v63 }
0x277b   :  { %v1648_v50 = vsel %vm1647_vm1, %v2442_v6, 6  ;;  %vm1806_vm1 = vcmask 40960  }
0x277c   :  { %v1649_v55 = vsel %vm1451_vm6, %v1648_v50, 2147483647  ;;  %v1662_v1 = vperm.slane %v1661_v49, 0 }
0x277d   :  { %v1650_v2 = vrot.slane %v1649_v55, 4 }
0x277e   :  { %v1663_v3 = vmul.f32 %v2692_v18, %v1662_v1  ;;  %v1801_v1 = vld [vmem:[#allocation14 + $0x7] sm:$0x1] }
0x277f   :  { %vm1651_vm14 = vcmp.lt.s32.totalorder %v1649_v55, %v1650_v2 }
0x2780   :  { %v1652_v4 = vsel %vm1651_vm14, %v1649_v55, %v1650_v2  ;;  %1906 = vmatmul.msk.f32.vlgmr.msra.gmra.mxu2 %vm1415_vm0, %v1663_v3  ;;  %v1804_v2 = vld [vmem:[%s2804_s10] sm:$0x1] }
0x2781   :  { %v1653_v5 = vrot.slane %v1652_v4, 2 }
0x2783   :  { %vm1654_vm7 = vcmp.lt.s32.totalorder %v1652_v4, %v1653_v5 }
0x2784   :  { %v1655_v7 = vsel %vm1654_vm7, %v1652_v4, %v1653_v5 }
0x2785   :  { %v1656_v8 = vrot.slane %v1655_v7, 1 }
0x2787   :  { %vm1657_vm10 = vcmp.lt.s32.totalorder %v1655_v7, %v1656_v8 }
0x2788   :  { %v1658_v11 = vsel %vm1657_vm10, %v1655_v7, %v1656_v8 }
0x2789   :  { %v1659_v19 = vsel %vm480_vm15, %v1658_v11, %v1612_v58 }
0x2803   :  { %v1684_v21 = vpop.f32.mrf.mxu2 }
0x2804   :  { %v1685_v22 = vadd.f32 %v1684_v21, %v2716_v15 }
0x2806   :  { %v1687_v13 = vsel %vm1451_vm6, %v1685_v22, -inf }
0x2807   :  { %v1688_v14 = vrot.slane %v1687_v13, 4 }
0x2809   :  { %v1689_v9 = vmax.f32 %v1687_v13, %v1688_v14 }
0x280b   :  { %v1690_v12 = vrot.slane %v1689_v9, 2 }
0x280d   :  { %v1691_v10 = vmax.f32 %v1689_v9, %v1690_v12 }
0x280f   :  { %v1692_v17 = vrot.slane %v1691_v10, 1 }
0x2811   :  { %v1693_v20 = vmax.f32 %v1691_v10, %v1692_v17 }
0x2813   :  { %vm1694_vm12 = vcmp.eq.f32.partialorder %v1685_v22, %v1693_v20  ;;  %v1708_v24 = vadd.f32 %v1707_v23, %v1693_v20 }
0x2814   :  { %v1695_v25 = vsel %vm1694_vm12, %v2442_v6, 6 }
0x2815   :  { %v1696_v26 = vsel %vm1451_vm6, %v1695_v25, 2147483647  ;;  %v1709_v27 = vperm.slane %v1708_v24, 0 }
0x2816   :  { %v1697_v53 = vrot.slane %v1696_v26, 4 }
0x2817   :  { %v1710_v54 = vmul.f32 %v2692_v18, %v1709_v27 }
0x2818   :  { %vm1698_vm15 = vcmp.lt.s32.totalorder %v1696_v26, %v1697_v53 }
0x2819   :  { %v1699_v44 = vsel %vm1698_vm15, %v1696_v26, %v1697_v53  ;;  %1908 = vmatmul.msk.f32.vlgmr.msra.gmra.mxu3 %vm1415_vm0, %v1710_v54 }
0x281a   :  { %v1700_v48 = vrot.slane %v1699_v44, 2 }
0x281c   :  { %vm1701_vm9 = vcmp.lt.s32.totalorder %v1699_v44, %v1700_v48 }
0x281d   :  { %v1702_v57 = vsel %vm1701_vm9, %v1699_v44, %v1700_v48 }
0x281e   :  { %v1703_v56 = vrot.slane %v1702_v57, 1 }
0x2820   :  { %vm1704_vm2 = vcmp.lt.s32.totalorder %v1702_v57, %v1703_v56 }
0x2821   :  { %v1705_v28 = vsel %vm1704_vm2, %v1702_v57, %v1703_v56 }
0x2822   :  { %v1706_v29 = vsel %vm405_vm5, %v1705_v28, %v1659_v19 }
0x289c   :  { %v1731_v30 = vpop.f32.mrf.mxu3 }
0x289d   :  { %v1732_v31 = vadd.f32 %v1731_v30, %v2716_v15 }
0x289f   :  { %v1734_v32 = vsel %vm1451_vm6, %v1732_v31, -inf }
0x28a0   :  { %v1735_v33 = vrot.slane %v1734_v32, 4 }
0x28a2   :  { %v1736_v34 = vmax.f32 %v1734_v32, %v1735_v33 }
0x28a4   :  { %v1737_v35 = vrot.slane %v1736_v34, 2 }
0x28a6   :  { %v1738_v36 = vmax.f32 %v1736_v34, %v1737_v35 }
0x28a8   :  { %v1739_v37 = vrot.slane %v1738_v36, 1 }
0x28aa   :  { %v1740_v38 = vmax.f32 %v1738_v36, %v1739_v37 }
0x28ac   :  { %vm1741_vm4 = vcmp.eq.f32.partialorder %v1732_v31, %v1740_v38  ;;  %v1755_v40 = vadd.f32 %v1754_v39, %v1740_v38 }
0x28ad   :  { %v1742_v41 = vsel %vm1741_vm4, %v2442_v6, 6 }
0x28ae   :  { %v1743_v42 = vsel %vm1451_vm6, %v1742_v41, 2147483647  ;;  %v1756_v43 = vperm.slane %v1755_v40, 0 }
0x28af   :  { %v1744_v47 = vrot.slane %v1743_v42, 4 }
0x28b0   :  { %v1757_v52 = vmul.f32 %v2692_v18, %v1756_v43 }
0x28b1   :  { %vm1745_vm5 = vcmp.lt.s32.totalorder %v1743_v42, %v1744_v47 }
0x28b2   :  { %v1746_v58 = vsel %vm1745_vm5, %v1743_v42, %v1744_v47  ;;  %1910 = vmatmul.msk.f32.vlgmr.msrb.gmra.mxu0 %vm1415_vm0, %v1757_v52 }
0x28b3   :  { %v1747_v59 = vrot.slane %v1746_v58, 2 }
0x28b5   :  { %vm1748_vm3 = vcmp.lt.s32.totalorder %v1746_v58, %v1747_v59 }
0x28b6   :  { %v1749_v60 = vsel %vm1748_vm3, %v1746_v58, %v1747_v59 }
0x28b7   :  { %v1750_v61 = vrot.slane %v1749_v60, 1 }
0x28b9   :  { %vm1751_vm8 = vcmp.lt.s32.totalorder %v1749_v60, %v1750_v61 }
0x28ba   :  { %v1752_v16 = vsel %vm1751_vm8, %v1749_v60, %v1750_v61 }
0x28bb   :  { %v1753_v62 = vsel %vm330_vm13, %v1752_v16, %v1706_v29 }
0x292f   :  { %v1778_v18 = vpop.f32.mrf.mxu0 }
0x2930   :  { %v1779_v45 = vadd.f32 %v1778_v18, %v2716_v15 }
0x2932   :  { %v1781_v46 = vsel %vm1451_vm6, %v1779_v45, -inf }
0x2933   :  { %v1782_v51 = vrot.slane %v1781_v46, 4 }
0x2935   :  { %v1783_v63 = vmax.f32 %v1781_v46, %v1782_v51 }
0x2937   :  { %v1784_v0 = vrot.slane %v1783_v63, 2 }
0x2939   :  { %v1785_v49 = vmax.f32 %v1783_v63, %v1784_v0 }
0x293b   :  { %v1786_v50 = vrot.slane %v1785_v49, 1 }
0x293d   :  { %v1787_v55 = vmax.f32 %v1785_v49, %v1786_v50 }
0x293f   :  { %vm1788_vm13 = vcmp.eq.f32.partialorder %v1779_v45, %v1787_v55  ;;  %v1802_v3 = vadd.f32 %v1801_v1, %v1787_v55 }
0x2940   :  { %v1789_v4 = vsel %vm1788_vm13, %v2442_v6, 6 }
0x2941   :  { %v1790_v15 = vsel %vm1451_vm6, %v1789_v4, 2147483647  ;;  %v1805_v5 = vadd.f32 %v1804_v2, %v1802_v3 }
0x2942   :  { %v1791_v7 = vrot.slane %v1790_v15, 4 }
0x2943   :  { %1807 = vst.msk [vmem:[#allocation17] sm:$0x1] %vm1806_vm1, %v1805_v5 }
0x2944   :  { %vm1792_vm14 = vcmp.lt.s32.totalorder %v1790_v15, %v1791_v7 }
0x2945   :  { %v1793_v8 = vsel %vm1792_vm14, %v1790_v15, %v1791_v7 }
0x2946   :  { %v1794_v11 = vrot.slane %v1793_v8, 2 }
0x2948   :  { %vm1795_vm7 = vcmp.lt.s32.totalorder %v1793_v8, %v1794_v11 }
0x2949   :  { %v1796_v19 = vsel %vm1795_vm7, %v1793_v8, %v1794_v11 }
0x294a   :  { %v1797_v21 = vrot.slane %v1796_v19, 1 }
0x294c   :  { %vm1798_vm6 = vcmp.lt.s32.totalorder %v1796_v19, %v1797_v21 }
0x294d   :  { %v1799_v22 = vsel %vm1798_vm6, %v1796_v19, %v1797_v21 }
0x294e   :  { %v1800_v13 = vsel %vm255_vm11, %v1799_v22, %v1753_v62 }
0x294f   :  { %1803 = vst.msk [vmem:[#allocation15] sm:$0xff] %vm1415_vm0, %v1800_v13 }
0x2950   :  { %1829 = dma.vmem_to_hbm [thread:$0]  %s1825_s20, 128, %s1827_s21, [#allocation16]  }
0x2951   :  { %1840 = dma.vmem_to_hbm [thread:$0]  %s1836_s23, 16, %s1838_s0, [#allocation16]  }
0x2952   :  { %2283 = dma.done.wait [#allocation5], 128  }
0x2953   :  { %2284 = vsyncadd [#allocation5], 4294967168 }
0x2954   :  { %2285 = dma.done.wait [#allocation16], 144  }
0x2955   :  { %2286 = vsyncadd [#allocation16], 4294967152 }
0x2956   :  { %1853 = vsyncpa [#allocation4], 1 }
0x2957   :  { %1854 = vsyncpa [#allocation7], 1 }
0x2958   :  { %1855 = vsyncpa [#allocation10], 1 }
0x2959   :  { %1856 = vsyncpa [#allocation13], 1 }
0x295a   :  { %1857 = vsyncpa [#allocation5], 1 }
0x295b   :  { %1858 = vsyncpa [#allocation16], 1 }

</bundles_post_ra>
